<compile_context>
chip_gen: v7x
topology: tpu7x:2x2x1
jax: 0.10.0
libtpu: 0.0.40
codegen_flags: <defaults>
</compile_context>

<pallas_src>
import numpy as np
import jax
import jax.numpy as jnp
from jax.experimental import pallas as pl
from jax.experimental.pallas import tpu as pltpu


# ----------------------------------------------------------------------------
# Deterministic "db2" wavelet filter bank (stands in for pywt.Wavelet('db2')).
# ----------------------------------------------------------------------------
def _db2_filter_bank():
    s3 = np.sqrt(3.0)
    den = 4.0 * np.sqrt(2.0)
    rec_lo = np.array([1.0 + s3, 3.0 + s3, 3.0 - s3, 1.0 - s3], dtype=np.float64) / den
    dec_lo = rec_lo[::-1].copy()
    dec_hi = rec_lo * np.array([-1.0, 1.0, -1.0, 1.0])
    rec_hi = dec_lo * np.array([1.0, -1.0, 1.0, -1.0])
    return dec_lo, dec_hi, rec_lo, rec_hi


def _build_ndim_filter(filters_1d, dim):
    # Mirrors _WaveletFilterNd._register_filters.build_ndim_filter exactly (reference only).
    filters_1d = [np.asarray(f, dtype=np.float64) for f in filters_1d]
    out = [f[None, ...] for f in filters_1d]                 # unsqueeze(0)
    for _ in range(1, dim):
        filters_1d = [f[..., None] for f in filters_1d]      # unsqueeze(-1)
        out = [f1 * fn for f1 in filters_1d for fn in out]
    return np.stack(out, axis=0)[:, None]                    # (2**dim, 1, f, ..., f)


# ----------------------------------------------------------------------------
# Band matrix: folds zero padding + stride-2 conv with (low, high) taps into (L, 2*Lo).
#   out[c, o] = sum_t xpad[2o + t] * g[c, t]   with  xpad = zero-pad(x, pad_left, pad_right)
# ----------------------------------------------------------------------------
def _band_matrix(length, pad_left, pad_right, g):
    flen = g.shape[1]
    lp = length + pad_left + pad_right
    lo = (lp - flen) // 2 + 1
    m = np.zeros((length, 2 * lo), np.float32)
    for c in range(2):
        for o in range(lo):
            for t in range(flen):
                i = 2 * o + t - pad_left
                if 0 <= i < length:
                    m[i, c * lo + o] = g[c, t]
    return m, lo


# ----------------------------------------------------------------------------
# Pallas kernel factory.
# Grid: (BC, nk).  Per step: one MXU matmul for the D pass (accumulated across d-tiles in a
# f32 VMEM scratch); on the last d-tile the H and W passes run as 2-D matmuls and the 8
# wavelet channels are stored lane-dense as (8, Do, Ho*Wo).
# ----------------------------------------------------------------------------
def _make_kernel(H, W, Do, Ho, Wo):
    Do2, Ho2, Wo2 = 2 * Do, 2 * Ho, 2 * Wo

    def kernel(x_ref, md_ref, mh_ref, mw_ref, o_ref, acc_ref):
        k = pl.program_id(1)

        # ---- D pass (only per-d-tile work): (Do2, d_tile) @ (d_tile, H*W) on the MXU ----
        x2 = x_ref[0].astype(jnp.float32)                       # (d_tile, H*W), lane-dense
        part = jnp.dot(md_ref[...].T, x2,
                       preferred_element_type=jnp.float32)      # (Do2, H*W)

        @pl.when(k == 0)
        def _init():
            acc_ref[...] = part

        @pl.when(k > 0)
        def _accumulate():
            acc_ref[...] = acc_ref[...] + part

        # ---- finalize on last d-tile: H pass, W pass, channel split, dense store ----
        @pl.when(k == pl.num_programs(1) - 1)
        def _finalize():
            t = acc_ref[...].reshape(Do2, H, W)                 # rows index (a, do)
            # H pass: bring H to the lane axis, contract it on the MXU.
            t = jnp.swapaxes(t, 1, 2).reshape(Do2 * W, H)
            t = jnp.dot(t, mh_ref[...],
                        preferred_element_type=jnp.float32)     # (Do2*W, Ho2)
            # W pass: bring W to the lane axis, contract it on the MXU.
            t = jnp.swapaxes(t.reshape(Do2, W, Ho2), 1, 2).reshape(Do2 * Ho2, W)
            t = jnp.dot(t, mw_ref[...],
                        preferred_element_type=jnp.float32)     # (Do2*Ho2, Wo2)
            y = t.reshape(Do2, Ho2, Wo2)                        # ((a,do), (b,ho), (c,wo))
            for a in range(2):
                for b in range(2):
                    for c in range(2):
                        slab = y[a * Do:(a + 1) * Do,
                                 b * Ho:(b + 1) * Ho,
                                 c * Wo:(c + 1) * Wo]           # (Do, Ho, Wo)
                        o_ref[0, 4 * a + 2 * b + c] = (
                            slab.reshape(Do, Ho * Wo).astype(o_ref.dtype))

    return kernel


# ----------------------------------------------------------------------------
# Tiling / VMEM budgeting helpers.
# ----------------------------------------------------------------------------
def _vmem_budget_bytes():
    # Physical VMEM: 128 MiB (v5e/v6e), 64 MiB per TensorCore (v7x).  Keep ~25% headroom
    # for Mosaic internal scratch (do not request the whole 64 MiB on v7x).
    cap = 64 << 20
    try:
        cap = int(pltpu.get_tpu_info().vmem_capacity_bytes)
    except Exception:
        pass
    return (cap * 3) // 4


def _choose_d_tile(D, HW, itemsize, budget):
    # Double-buffered input block should use at most ~1/4 of the VMEM budget.
    per_row = max(1, HW * itemsize)
    max_rows = budget // (8 * per_row)
    if max_rows >= D:
        return D, D
    dt = max(8, (int(max_rows) // 8) * 8)   # second-minor block dim must be a multiple of 8
    dk = ((D + dt - 1) // dt) * dt
    return dt, dk


# ----------------------------------------------------------------------------
# Wrapper == _WaveletFilterNd.forward (encode, coeffs only) for dim = 3.
# ----------------------------------------------------------------------------
def wavelet_encode_3d(x, dec_lo, dec_hi, d_tile=None):
    B, C, D, H, W = x.shape
    BC = B * C
    g = np.stack([np.asarray(dec_lo, np.float64)[::-1],    # fwd_low.flip(-1)
                  np.asarray(dec_hi, np.float64)[::-1]])   # fwd_high.flip(-1)
    flen = g.shape[1]
    assert flen % 2 == 0, "even filter length required (as in the module)"
    p = (2 * flen - 3) // 2

    # _get_padding_size + F.pad axis ordering, including the odd-size/axis pairing quirk:
    #   W right pad += D%2, H right pad += H%2, D right pad += W%2.
    padW = (p, p + D % 2)
    padH = (p, p + H % 2)
    padD = (p, p + W % 2)

    # Fold zero padding + stride-2 conv into tiny per-axis band matrices: no jnp.pad and no
    # polyphase reshape/transpose pass over the input in the wrapper.
    MD, Do = _band_matrix(D, *padD, g)
    MH, Ho = _band_matrix(H, *padH, g)
    MW, Wo = _band_matrix(W, *padW, g)
    Do2, Ho2, Wo2 = 2 * Do, 2 * Ho, 2 * Wo
    HW = H * W

    itemsize = jnp.dtype(x.dtype).itemsize
    budget = _vmem_budget_bytes()
    if d_tile is None:
        d_tile, Dk = _choose_d_tile(D, HW, itemsize, budget)
    else:
        d_tile = int(d_tile)
        if d_tile >= D:
            d_tile, Dk = D, D
        else:
            d_tile = max(8, (d_tile // 8) * 8)
            Dk = ((D + d_tile - 1) // d_tile) * d_tile

    # Input presented contiguously as (BC, D, H*W): free reshape in XLA, dense DMA rows.
    x2 = x.reshape(BC, D, HW)
    if Dk != D:
        x2 = jnp.pad(x2, ((0, 0), (0, Dk - D), (0, 0)))
        MD = np.concatenate([MD, np.zeros((Dk - D, Do2), np.float32)], axis=0)
    nk = Dk // d_tile

    kernel = _make_kernel(H, W, Do, Ho, Wo)

    # VMEM accounting: double-buffered in/out blocks + band matrices + f32 accumulator +
    # finalize temporaries (a few copies of the (Do2, H*W)-sized intermediate).
    x_blk = d_tile * HW * itemsize
    o_blk = 8 * Do * Ho * Wo * itemsize
    m_blk = (d_tile * Do2 + H * Ho2 + W * Wo2) * 4
    acc_b = Do2 * HW * 4
    fin_b = 6 * Do2 * H * W * 4
    need = 2 * (x_blk + o_blk + m_blk) + acc_b + fin_b + (4 << 20)
    vmem_limit = int(min(budget, max(32 << 20, need)))

    out = pl.pallas_call(
        kernel,
        out_shape=jax.ShapeDtypeStruct((BC, 8, Do, Ho * Wo), x.dtype),
        grid=(BC, nk),                      # bc parallel (even for B*C>1: v7x dual-TC),
        in_specs=[                          # D-reduction axis last ("arbitrary").
            pl.BlockSpec((1, d_tile, HW), lambda i, k: (i, k, 0)),
            pl.BlockSpec((d_tile, Do2), lambda i, k: (k, 0)),
            pl.BlockSpec((H, Ho2), lambda i, k: (0, 0)),
            pl.BlockSpec((W, Wo2), lambda i, k: (0, 0)),
        ],
        out_specs=pl.BlockSpec((1, 8, Do, Ho * Wo), lambda i, k: (i, 0, 0, 0)),
        scratch_shapes=[pltpu.VMEM((Do2, HW), jnp.float32)],
        compiler_params=pltpu.CompilerParams(
            dimension_semantics=("parallel", "arbitrary"),
            vmem_limit_bytes=vmem_limit),
    )(x2, jnp.asarray(MD, jnp.float32), jnp.asarray(MH, jnp.float32),
      jnp.asarray(MW, jnp.float32))

    # Contiguous splits only: free in XLA.
    return out.reshape(B, C, 8, Do, Ho, Wo)


# ----------------------------------------------------------------------------
# Pure-JAX reference (grouped conv3d, mirrors the torch code path) for checking.
# ----------------------------------------------------------------------------
def reference_encode(x, filter_fwd):
    B, C, D, H, W = x.shape
    flen = filter_fwd.shape[-1]
    p = (2 * flen - 3) // 2
    is_odd = [D % 2, H % 2, W % 2]
    pad6 = [p] * 6
    pad6[1] += is_odd[0]
    pad6[3] += is_odd[1]
    pad6[5] += is_odd[2]
    pad_widths = ((0, 0), (0, 0),
                  (pad6[4], pad6[5]), (pad6[2], pad6[3]), (pad6[0], pad6[1]))
    xp = jnp.pad(x, pad_widths)
    weight = jnp.tile(jnp.asarray(filter_fwd, x.dtype), (C, 1, 1, 1, 1))  # torch .repeat
    out = jax.lax.conv_general_dilated(
        xp, weight, window_strides=(2, 2, 2), padding='VALID',
        dimension_numbers=('NCDHW', 'OIDHW', 'NCDHW'),
        feature_group_count=C, precision=jax.lax.Precision.HIGHEST)
    return out.reshape(B, C, 8, *out.shape[2:])


if __name__ == "__main__":
    dec_lo, dec_hi, rec_lo, rec_hi = _db2_filter_bank()
    # filter_fwd = build_ndim_filter([fwd_low.flip(-1), fwd_high.flip(-1)]), dim=3
    filter_fwd = _build_ndim_filter([dec_lo[::-1], dec_hi[::-1]], dim=3).astype(np.float32)
    assert filter_fwd.shape == (8, 1, 4, 4, 4)
    assert filter_fwd.shape[-1] % 2 == 0  # even filter length, like the module asserts

    key = jax.random.PRNGKey(0)
    B, C, D, H, W = 2, 4, 16, 16, 16
    x = jax.random.normal(key, (B, C, D, H, W), dtype=jnp.float32)

    coeffs = jax.block_until_ready(wavelet_encode_3d(x, dec_lo, dec_hi))
    assert coeffs.shape == (B, C, 8, 9, 9, 9), coeffs.shape

    ref = reference_encode(x, filter_fwd)
    np.testing.assert_allclose(np.asarray(coeffs), np.asarray(ref), atol=2e-3, rtol=2e-3)

    print("KERNEL_OK")
</pallas_src>

<mosaic_0001>
module attributes {stable_mosaic.version = 11 : i64} {
  func.func @kernel(%arg0: i32, %arg1: i32, %arg2: memref<1x16x256xf32, #tpu.memory_space<vmem>>, %arg3: memref<16x18xf32, #tpu.memory_space<vmem>>, %arg4: memref<16x18xf32, #tpu.memory_space<vmem>>, %arg5: memref<16x18xf32, #tpu.memory_space<vmem>>, %arg6: memref<1x8x9x81xf32, #tpu.memory_space<vmem>>, %arg7: memref<18x256xf32, #tpu.memory_space<vmem>>) attributes {dimension_semantics = [#tpu.dimension_semantics<parallel>, #tpu.dimension_semantics<arbitrary>], iteration_bounds = array<i64: 8, 1>, scalar_prefetch = 0 : i64, scratch_operands = 1 : i64, tpu.core_type = #tpu.core_type<tc>, window_params = [{transform_indices = @transform_0, window_bounds = array<i64: 1, 16, 256>}, {transform_indices = @transform_1, window_bounds = array<i64: 16, 18>}, {pipeline_mode = #tpu.pipeline_mode<synchronous>, transform_indices = @transform_2, window_bounds = array<i64: 16, 18>}, {pipeline_mode = #tpu.pipeline_mode<synchronous>, transform_indices = @transform_3, window_bounds = array<i64: 16, 18>}, {transform_indices = @transform_4, window_bounds = array<i64: 1, 8, 9, 81>}]} {
    %c0 = arith.constant 0 : index
    %c0_0 = arith.constant 0 : index
    %c0_1 = arith.constant 0 : index
    %0 = vector.load %arg2[%c0, %c0_0, %c0_1] : memref<1x16x256xf32, #tpu.memory_space<vmem>>, vector<1x16x256xf32>
    %1 = vector.shape_cast %0 : vector<1x16x256xf32> to vector<16x256xf32>
    %c0_2 = arith.constant 0 : index
    %c0_3 = arith.constant 0 : index
    %2 = vector.load %arg3[%c0_2, %c0_3] : memref<16x18xf32, #tpu.memory_space<vmem>>, vector<16x18xf32>
    %3 = tpu.transpose %2, [1, 0] : vector<16x18xf32> -> vector<18x16xf32>
    %cst = arith.constant dense<0.000000e+00> : vector<18x256xf32>
    %4 = tpu.matmul %3, %1, %cst {dimension_numbers = #tpu.dot_dimension_numbers<[1], [0], [0], [1], [0, 0, 1, 1], [], []>} : vector<18x16xf32>, vector<16x256xf32>, vector<18x256xf32> -> vector<18x256xf32>
    %c0_i32 = arith.constant 0 : i32
    %5 = arith.cmpi eq, %arg1, %c0_i32 : i32
    %6 = arith.extui %5 : i1 to i32
    %c0_i32_4 = arith.constant 0 : i32
    %7 = arith.cmpi ne, %6, %c0_i32_4 : i32
    scf.if %7 {
      %c0_9 = arith.constant 0 : index
      %c0_10 = arith.constant 0 : index
      %14 = vector.load %arg7[%c0_9, %c0_10] : memref<18x256xf32, #tpu.memory_space<vmem>>, vector<18x256xf32>
      tpu.vector_store %arg7[%c0_9, %c0_10], %4 {strides = array<i32>} : memref<18x256xf32, #tpu.memory_space<vmem>>, vector<18x256xf32>,
    } else {
    }
    %c0_i32_5 = arith.constant 0 : i32
    %8 = arith.cmpi sgt, %arg1, %c0_i32_5 : i32
    %9 = arith.extui %8 : i1 to i32
    %c0_i32_6 = arith.constant 0 : i32
    %10 = arith.cmpi ne, %9, %c0_i32_6 : i32
    scf.if %10 {
      %c0_9 = arith.constant 0 : index
      %c0_10 = arith.constant 0 : index
      %14 = vector.load %arg7[%c0_9, %c0_10] : memref<18x256xf32, #tpu.memory_space<vmem>>, vector<18x256xf32>
      %15 = arith.addf %14, %4 : vector<18x256xf32>
      %c0_11 = arith.constant 0 : index
      %c0_12 = arith.constant 0 : index
      %16 = vector.load %arg7[%c0_11, %c0_12] : memref<18x256xf32, #tpu.memory_space<vmem>>, vector<18x256xf32>
      tpu.vector_store %arg7[%c0_11, %c0_12], %15 {strides = array<i32>} : memref<18x256xf32, #tpu.memory_space<vmem>>, vector<18x256xf32>,
    } else {
    }
    %c0_i32_7 = arith.constant 0 : i32
    %11 = arith.cmpi eq, %arg1, %c0_i32_7 : i32
    %12 = arith.extui %11 : i1 to i32
    %c0_i32_8 = arith.constant 0 : i32
    %13 = arith.cmpi ne, %12, %c0_i32_8 : i32
    scf.if %13 {
      %c0_9 = arith.constant 0 : index
      %c0_10 = arith.constant 0 : index
      %14 = vector.load %arg7[%c0_9, %c0_10] : memref<18x256xf32, #tpu.memory_space<vmem>>, vector<18x256xf32>
      %15 = vector.shape_cast %14 : vector<18x256xf32> to vector<18x16x16xf32>
      %16 = tpu.transpose %15, [0, 2, 1] : vector<18x16x16xf32> -> vector<18x16x16xf32>
      %17 = vector.shape_cast %16 : vector<18x16x16xf32> to vector<288x16xf32>
      %c0_11 = arith.constant 0 : index
      %c0_12 = arith.constant 0 : index
      %18 = vector.load %arg4[%c0_11, %c0_12] : memref<16x18xf32, #tpu.memory_space<vmem>>, vector<16x18xf32>
      %cst_13 = arith.constant dense<0.000000e+00> : vector<288x18xf32>
      %19 = tpu.matmul %17, %18, %cst_13 {dimension_numbers = #tpu.dot_dimension_numbers<[1], [0], [0], [1], [0, 0, 1, 1], [], []>} : vector<288x16xf32>, vector<16x18xf32>, vector<288x18xf32> -> vector<288x18xf32>
      %20 = vector.shape_cast %19 : vector<288x18xf32> to vector<18x16x18xf32>
      %21 = tpu.transpose %20, [0, 2, 1] : vector<18x16x18xf32> -> vector<18x18x16xf32>
      %22 = vector.shape_cast %21 : vector<18x18x16xf32> to vector<324x16xf32>
      %c0_14 = arith.constant 0 : index
      %c0_15 = arith.constant 0 : index
      %23 = vector.load %arg5[%c0_14, %c0_15] : memref<16x18xf32, #tpu.memory_space<vmem>>, vector<16x18xf32>
      %cst_16 = arith.constant dense<0.000000e+00> : vector<324x18xf32>
      %24 = tpu.matmul %22, %23, %cst_16 {dimension_numbers = #tpu.dot_dimension_numbers<[1], [0], [0], [1], [0, 0, 1, 1], [], []>} : vector<324x16xf32>, vector<16x18xf32>, vector<324x18xf32> -> vector<324x18xf32>
      %25 = vector.shape_cast %24 : vector<324x18xf32> to vector<18x18x18xf32>
      %26 = vector.extract_strided_slice %25 {offsets = [0, 0, 0], sizes = [9, 9, 9], strides = [1, 1, 1]} : vector<18x18x18xf32> to vector<9x9x9xf32>
      %27 = vector.shape_cast %26 : vector<9x9x9xf32> to vector<9x81xf32>
      %c0_17 = arith.constant 0 : index
      %c0_18 = arith.constant 0 : index
      %c0_19 = arith.constant 0 : index
      %c0_20 = arith.constant 0 : index
      %28 = vector.load %arg6[%c0_17, %c0_18, %c0_19, %c0_20] : memref<1x8x9x81xf32, #tpu.memory_space<vmem>>, vector<1x1x9x81xf32>
      %29 = vector.shape_cast %28 : vector<1x1x9x81xf32> to vector<9x81xf32>
      %30 = vector.shape_cast %27 : vector<9x81xf32> to vector<1x1x9x81xf32>
      tpu.vector_store %arg6[%c0_17, %c0_18, %c0_19, %c0_20], %30 {strides = array<i32>} : memref<1x8x9x81xf32, #tpu.memory_space<vmem>>, vector<1x1x9x81xf32>,
      %31 = vector.extract_strided_slice %25 {offsets = [0, 0, 9], sizes = [9, 9, 9], strides = [1, 1, 1]} : vector<18x18x18xf32> to vector<9x9x9xf32>
      %32 = vector.shape_cast %31 : vector<9x9x9xf32> to vector<9x81xf32>
      %c0_21 = arith.constant 0 : index
      %c1 = arith.constant 1 : index
      %c0_22 = arith.constant 0 : index
      %c0_23 = arith.constant 0 : index
      %33 = vector.load %arg6[%c0_21, %c1, %c0_22, %c0_23] : memref<1x8x9x81xf32, #tpu.memory_space<vmem>>, vector<1x1x9x81xf32>
      %34 = vector.shape_cast %33 : vector<1x1x9x81xf32> to vector<9x81xf32>
      %35 = vector.shape_cast %32 : vector<9x81xf32> to vector<1x1x9x81xf32>
      tpu.vector_store %arg6[%c0_21, %c1, %c0_22, %c0_23], %35 {strides = array<i32>} : memref<1x8x9x81xf32, #tpu.memory_space<vmem>>, vector<1x1x9x81xf32>,
      %36 = vector.extract_strided_slice %25 {offsets = [0, 9, 0], sizes = [9, 9, 9], strides = [1, 1, 1]} : vector<18x18x18xf32> to vector<9x9x9xf32>
      %37 = vector.shape_cast %36 : vector<9x9x9xf32> to vector<9x81xf32>
      %c0_24 = arith.constant 0 : index
      %c2 = arith.constant 2 : index
      %c0_25 = arith.constant 0 : index
      %c0_26 = arith.constant 0 : index
      %38 = vector.load %arg6[%c0_24, %c2, %c0_25, %c0_26] : memref<1x8x9x81xf32, #tpu.memory_space<vmem>>, vector<1x1x9x81xf32>
      %39 = vector.shape_cast %38 : vector<1x1x9x81xf32> to vector<9x81xf32>
      %40 = vector.shape_cast %37 : vector<9x81xf32> to vector<1x1x9x81xf32>
      tpu.vector_store %arg6[%c0_24, %c2, %c0_25, %c0_26], %40 {strides = array<i32>} : memref<1x8x9x81xf32, #tpu.memory_space<vmem>>, vector<1x1x9x81xf32>,
      %41 = vector.extract_strided_slice %25 {offsets = [0, 9, 9], sizes = [9, 9, 9], strides = [1, 1, 1]} : vector<18x18x18xf32> to vector<9x9x9xf32>
      %42 = vector.shape_cast %41 : vector<9x9x9xf32> to vector<9x81xf32>
      %c0_27 = arith.constant 0 : index
      %c3 = arith.constant 3 : index
      %c0_28 = arith.constant 0 : index
      %c0_29 = arith.constant 0 : index
      %43 = vector.load %arg6[%c0_27, %c3, %c0_28, %c0_29] : memref<1x8x9x81xf32, #tpu.memory_space<vmem>>, vector<1x1x9x81xf32>
      %44 = vector.shape_cast %43 : vector<1x1x9x81xf32> to vector<9x81xf32>
      %45 = vector.shape_cast %42 : vector<9x81xf32> to vector<1x1x9x81xf32>
      tpu.vector_store %arg6[%c0_27, %c3, %c0_28, %c0_29], %45 {strides = array<i32>} : memref<1x8x9x81xf32, #tpu.memory_space<vmem>>, vector<1x1x9x81xf32>,
      %46 = vector.extract_strided_slice %25 {offsets = [9, 0, 0], sizes = [9, 9, 9], strides = [1, 1, 1]} : vector<18x18x18xf32> to vector<9x9x9xf32>
      %47 = vector.shape_cast %46 : vector<9x9x9xf32> to vector<9x81xf32>
      %c0_30 = arith.constant 0 : index
      %c4 = arith.constant 4 : index
      %c0_31 = arith.constant 0 : index
      %c0_32 = arith.constant 0 : index
      %48 = vector.load %arg6[%c0_30, %c4, %c0_31, %c0_32] : memref<1x8x9x81xf32, #tpu.memory_space<vmem>>, vector<1x1x9x81xf32>
      %49 = vector.shape_cast %48 : vector<1x1x9x81xf32> to vector<9x81xf32>
      %50 = vector.shape_cast %47 : vector<9x81xf32> to vector<1x1x9x81xf32>
      tpu.vector_store %arg6[%c0_30, %c4, %c0_31, %c0_32], %50 {strides = array<i32>} : memref<1x8x9x81xf32, #tpu.memory_space<vmem>>, vector<1x1x9x81xf32>,
      %51 = vector.extract_strided_slice %25 {offsets = [9, 0, 9], sizes = [9, 9, 9], strides = [1, 1, 1]} : vector<18x18x18xf32> to vector<9x9x9xf32>
      %52 = vector.shape_cast %51 : vector<9x9x9xf32> to vector<9x81xf32>
      %c0_33 = arith.constant 0 : index
      %c5 = arith.constant 5 : index
      %c0_34 = arith.constant 0 : index
      %c0_35 = arith.constant 0 : index
      %53 = vector.load %arg6[%c0_33, %c5, %c0_34, %c0_35] : memref<1x8x9x81xf32, #tpu.memory_space<vmem>>, vector<1x1x9x81xf32>
      %54 = vector.shape_cast %53 : vector<1x1x9x81xf32> to vector<9x81xf32>
      %55 = vector.shape_cast %52 : vector<9x81xf32> to vector<1x1x9x81xf32>
      tpu.vector_store %arg6[%c0_33, %c5, %c0_34, %c0_35], %55 {strides = array<i32>} : memref<1x8x9x81xf32, #tpu.memory_space<vmem>>, vector<1x1x9x81xf32>,
      %56 = vector.extract_strided_slice %25 {offsets = [9, 9, 0], sizes = [9, 9, 9], strides = [1, 1, 1]} : vector<18x18x18xf32> to vector<9x9x9xf32>
      %57 = vector.shape_cast %56 : vector<9x9x9xf32> to vector<9x81xf32>
      %c0_36 = arith.constant 0 : index
      %c6 = arith.constant 6 : index
      %c0_37 = arith.constant 0 : index
      %c0_38 = arith.constant 0 : index
      %58 = vector.load %arg6[%c0_36, %c6, %c0_37, %c0_38] : memref<1x8x9x81xf32, #tpu.memory_space<vmem>>, vector<1x1x9x81xf32>
      %59 = vector.shape_cast %58 : vector<1x1x9x81xf32> to vector<9x81xf32>
      %60 = vector.shape_cast %57 : vector<9x81xf32> to vector<1x1x9x81xf32>
      tpu.vector_store %arg6[%c0_36, %c6, %c0_37, %c0_38], %60 {strides = array<i32>} : memref<1x8x9x81xf32, #tpu.memory_space<vmem>>, vector<1x1x9x81xf32>,
      %61 = vector.extract_strided_slice %25 {offsets = [9, 9, 9], sizes = [9, 9, 9], strides = [1, 1, 1]} : vector<18x18x18xf32> to vector<9x9x9xf32>
      %62 = vector.shape_cast %61 : vector<9x9x9xf32> to vector<9x81xf32>
      %c0_39 = arith.constant 0 : index
      %c7 = arith.constant 7 : index
      %c0_40 = arith.constant 0 : index
      %c0_41 = arith.constant 0 : index
      %63 = vector.load %arg6[%c0_39, %c7, %c0_40, %c0_41] : memref<1x8x9x81xf32, #tpu.memory_space<vmem>>, vector<1x1x9x81xf32>
      %64 = vector.shape_cast %63 : vector<1x1x9x81xf32> to vector<9x81xf32>
      %65 = vector.shape_cast %62 : vector<9x81xf32> to vector<1x1x9x81xf32>
      tpu.vector_store %arg6[%c0_39, %c7, %c0_40, %c0_41], %65 {strides = array<i32>} : memref<1x8x9x81xf32, #tpu.memory_space<vmem>>, vector<1x1x9x81xf32>,
    } else {
    }
    return
  }
  func.func @transform_0(%arg0: i32, %arg1: i32) -> (i32, i32, i32) {
    %c0_i32 = arith.constant 0 : i32
    %c0_i32_0 = arith.constant 0 : i32
    return %arg0, %arg1, %c0_i32 : i32, i32, i32
  }
  func.func @transform_1(%arg0: i32, %arg1: i32) -> (i32, i32) {
    %c0_i32 = arith.constant 0 : i32
    %c0_i32_0 = arith.constant 0 : i32
    return %arg1, %c0_i32 : i32, i32
  }
  func.func @transform_2(%arg0: i32, %arg1: i32) -> (i32, i32) {
    %c0_i32 = arith.constant 0 : i32
    %c0_i32_0 = arith.constant 0 : i32
    %c0_i32_1 = arith.constant 0 : i32
    return %c0_i32, %c0_i32_0 : i32, i32
  }
  func.func @transform_3(%arg0: i32, %arg1: i32) -> (i32, i32) {
    %c0_i32 = arith.constant 0 : i32
    %c0_i32_0 = arith.constant 0 : i32
    %c0_i32_1 = arith.constant 0 : i32
    return %c0_i32, %c0_i32_0 : i32, i32
  }
  func.func @transform_4(%arg0: i32, %arg1: i32) -> (i32, i32, i32, i32) {
    %c0_i32 = arith.constant 0 : i32
    %c0_i32_0 = arith.constant 0 : i32
    %c0_i32_1 = arith.constant 0 : i32
    %c0_i32_2 = arith.constant 0 : i32
    return %arg0, %c0_i32, %c0_i32_0, %c0_i32_1 : i32, i32, i32, i32
  }
}

</mosaic_0001>

<bundles_post_ra>
// kernel: tpu_custom_call.1
= control target key start
LH: loop header
LB: loop body
LE: loop exit
PB: predicated region body
PF: predicated region fallthrough
CT: control target
= control target key end

     0   :  { %9 = vsyncpa [#allocation4], 0  ;;  %s16338_s0 = inlined_call_operand.hbm [shape: f32[8,16,256], index: 0, kind: input, shape index: {}]   ;;  %s16339_s1 = inlined_call_operand.hbm [shape: f32[16,18], index: 1, kind: input, shape index: {}]   ;;  %s16340_s2 = inlined_call_operand.hbm [shape: f32[16,18], index: 2, kind: input, shape index: {}]   ;;  %s16341_s3 = inlined_call_operand.hbm [shape: f32[16,18], index: 3, kind: input, shape index: {}]   ;;  %s16342_s4 = inlined_call_operand.vmem [shape: f32[8,8,9,81], index: 4, kind: output, shape index: {}]  }
   0x1   :  { %11 = vsyncpa [#allocation4 + $0x1], 0 }
   0x2   :  { %12 = vsyncpa [#allocation6], 0 }
   0x3   :  { %13 = vsyncpa [#allocation9], 0  ;;  %s11507_s15 = smov 0   ;;  %s11509_s16 = smov 0  }
   0x4   :  { %s11511_s17 = smov 0   ;;  %s11513_s18 = smov 0  }
   0x5   :  { %s11515_s19 = smov 0   ;;  %s11517_s20 = smov 0  }
   0x6 LB: > { %s10692_s21 = sadd.s32 4294967295, %s11451_s20   ;;  %p53_p0 = scmp.ne.s32.totalorder %s11435_s16, %s11431_s15  ;;  %s11451_s20 = sphi %s11517_s20, %s19_s20   ;;  %s11447_s19 = sphi %s11515_s19, %s17352_s19   ;;  %s11443_s18 = sphi %s11513_s18, %s17351_s18   ;;  %s11439_s17 = sphi %s11511_s17, %s17350_s17   ;;  %s11435_s16 = sphi %s11509_s16, %s17349_s16   ;;  %s11431_s15 = sphi %s11507_s15, %s17348_s15  }
   0x7   : > { %p11537_p1 = scmp.eq.s32.totalorder %s10692_s21, 0  ;;  %p10694_p2 = scmp.ge.s32.totalorder %s11451_s20, 1 }
   0x8   : > { %p158_p3 = scmp.lt.s32.totalorder %s11451_s20, 9  ;;  %s11453_s25 = smov [#allocation5]  }
   0x9   : > { %s16565_s22 = scalar_select %p11537_p1, 1, 0 }
   0xa   : > { %p11545_p4 = por %p11537_p1, %p53_p0  ;;  %p11549_p5 = pnand %p10694_p2, %p158_p3 }
   0xb   : > { %s173_s26 = sshll.u32 %s11453_s25, 4  ;;  %s11454_s28 = smov [#allocation7]   ;;  %s11553_s26 = int_to_ptr.vmem [resolvable:$true] %s173_s26 }
   0xc   : > { %s16566_s23 = scalar_select %p11545_p4, 1, 0 }
   0xd   : > { %s16567_s24 = scalar_select %p11549_p5, 1, 0 }
   0xe   : > { %p11182_p6 = pneg %p11549_p5  ;;  %s186_s29 = sshll.u32 %s11454_s28, 4  ;;  %s11563_s29 = int_to_ptr.vmem [resolvable:$true] %s186_s29 }
   0xf   : > { %s11455_s30 = smov [#allocation8]   ;;  %s11279_s8 = scalar_lea.hbm %s16339_s1, 256 }
  0x10   : > { %p11559_p7 = pnand %p11182_p6, %p11537_p1  ;;  %s11565_s5 = sshll.u32 %s11455_s30, 4  ;;  %s200_s5 = int_to_ptr.vmem [resolvable:$true] %s11565_s5 }
  0x11   : > { %p11280_p8 = scmp.ne.s32.totalorder %s16339_s1, %s11279_s8  ;;  %p11286_p12 = scmp.lt.u32.totalorder %s11279_s8, %s16339_s1 }
  0x12   : > { %p11575_p9 = pneg %p11559_p7 }
  0x14   : > { %p11282_p10 = pnand %p11575_p9, %p11280_p8 }
  0x16   : > { %p11283_p11 = pneg %p11282_p10 }
  0x18   : > { %p11288_p13 = pnand %p11286_p12, %p11283_p11 }
  0x1a   : > { %11291 = shalt.err (!%p11288_p13)
}
  0x1b   : > { %s11292_s14 = scalar_lea.vmem %s11553_s26, 256  ;;  %p11300_p6 = scmp.lt.s32.totalorder %s11553_s26, %s11553_s26 }
  0x1c   : > { %p11293_p0 = scmp.ne.s32.totalorder %s11553_s26, %s11292_s14  ;;  %p11301_p1 = scmp.lt.s32.totalorder %s11292_s14, %s11292_s14 }
  0x1e   : > { %p11295_p2 = pnand %p11293_p0, %p11575_p9  ;;  %p11302_p8 = por %p11301_p1, %p11300_p6 }
  0x20   : > { %p11296_p3 = pneg %p11295_p2 }
  0x22   : > { %p11303_p10 = pnand %p11302_p8, %p11296_p3 }
  0x24   : > { %11306 = shalt.err (!%p11303_p10)
}
  0x25   : > { %s11456_s15 = smov 128   ;;  %s11457_s21 = smov 8  }
  0x26   : > { %11185 = dma.hbm_to_vmem [thread:$0]  (!%p11559_p7), %s16339_s1, 256, %s11553_s26, [#allocation6], %s11456_s15, %s11456_s15, %s11457_s21  }
  0x27   : > { %s11307_s7 = scalar_lea.hbm %s16340_s2, 256 }
  0x28   : > { %p11308_p1 = scmp.ne.s32.totalorder %s16340_s2, %s11307_s7  ;;  %p11314_p13 = scmp.lt.u32.totalorder %s11307_s7, %s16340_s2 }
  0x2a   : > { %p11310_p11 = pnand %p11308_p1, %p11575_p9 }
  0x2c   : > { %p11311_p12 = pneg %p11310_p11 }
  0x2e   : > { %p11316_p0 = pnand %p11314_p13, %p11311_p12 }
  0x30   : > { %11319 = shalt.err (!%p11316_p0)
}
  0x31   : > { %s11320_s26 = scalar_lea.vmem %s11563_s29, 256  ;;  %p11328_p8 = scmp.lt.s32.totalorder %s11563_s29, %s11563_s29 }
  0x32   : > { %p11321_p2 = scmp.ne.s32.totalorder %s11563_s29, %s11320_s26  ;;  %p11329_p10 = scmp.lt.s32.totalorder %s11320_s26, %s11320_s26 }
  0x34   : > { %p11323_p3 = pnand %p11321_p2, %p11575_p9  ;;  %p11330_p1 = por %p11329_p10, %p11328_p8 }
  0x36   : > { %p11324_p6 = pneg %p11323_p3 }
  0x38   : > { %p11331_p11 = pnand %p11330_p1, %p11324_p6 }
  0x3a   : > { %11334 = shalt.err (!%p11331_p11)
}
  0x3b   : > { %11188 = dma.hbm_to_vmem [thread:$0]  (!%p11559_p7), %s16340_s2, 256, %s11563_s29, [#allocation6], %s11456_s15, %s11456_s15, %s11457_s21  }
  0x3c   : > { %s11335_s30 = scalar_lea.hbm %s16341_s3, 256 }
  0x3d   : > { %p11336_p12 = scmp.ne.s32.totalorder %s16341_s3, %s11335_s30  ;;  %p11342_p2 = scmp.lt.u32.totalorder %s11335_s30, %s16341_s3 }
  0x3f   : > { %p11338_p13 = pnand %p11336_p12, %p11575_p9 }
  0x41   : > { %p11339_p0 = pneg %p11338_p13 }
  0x43   : > { %p11344_p3 = pnand %p11342_p2, %p11339_p0 }
  0x45   : > { %11347 = shalt.err (!%p11344_p3)
}
  0x46   : > { %s11348_s10 = scalar_lea.vmem %s200_s5, 256  ;;  %p11356_p1 = scmp.lt.s32.totalorder %s200_s5, %s200_s5 }
  0x47   : > { %p11349_p6 = scmp.ne.s32.totalorder %s200_s5, %s11348_s10  ;;  %p11357_p11 = scmp.lt.s32.totalorder %s11348_s10, %s11348_s10 }
  0x49   : > { %p11351_p8 = pnand %p11349_p6, %p11575_p9  ;;  %p11358_p4 = por %p11357_p11, %p11356_p1 }
  0x4b   : > { %p11352_p10 = pneg %p11351_p8 }
  0x4d   : > { %p11359_p5 = pnand %p11358_p4, %p11352_p10 }
  0x4f   : > { %11362 = shalt.err (!%p11359_p5)
}
  0x50   : > { %11191 = dma.hbm_to_vmem [thread:$0]  (!%p11559_p7), %s16341_s3, 256, %s200_s5, [#allocation9], %s11456_s15, %s11456_s15, %s11457_s21  }
  0x51   : > { %s40_s11 = sadd.s32 1, %s11439_s17  ;;  %s31_s26 = sadd.s32 1, %s11447_s19 }
  0x52   : > { %p47_p4 = scmp.ne.s32.totalorder %s11439_s17, %s11435_s16  ;;  %p33_p5 = scmp.ge.s32.totalorder %s31_s26, 8 }
  0x53   : > { %p48_p9 = scmp.eq.s32.totalorder %s11451_s20, 0  ;;  %p11199_p12 = scmp.lt.s32.totalorder %s11451_s20, 8 }
  0x54   : > { %s213_s27 = sand.u32 1, %s11439_s17   ;;  %s17354_s26 = smov (%p33_p5, %s31_s26), 0 }
  0x55   : > { %p49_p13 = por %p48_p9, %p47_p4  ;;  %s35_s13 = ssub.s32 %s11447_s19, %s17354_s26 }
  0x56   : > { %s10699_s14 = sshll.u32 %s213_s27, 5  ;;  %p38_p0 = scmp.eq.s32.totalorder %s35_s13, 0 }
  0x57   : > { %s10887_s25 = sshll.u32 %s11447_s19, 9  ;;  %s217_s28 = scalar_lea.vmem [#allocation3], %s10699_s14 }
  0x58   : > { %s227_s30 = sshll.u32 %s217_s28, 4  ;;  %s11665_s6 = scalar_lea.hbm %s16338_s0, %s10887_s25  ;;  %s11667_s30 = int_to_ptr.vmem [resolvable:$true] %s227_s30 }
  0x59   : > { %s11660_s5 = scalar_select %p38_p0, %s11439_s17, %s40_s11  }
  0x5a   : > { %p11671_p7 = pnand %p11199_p12, %p49_p13  ;;  %s11675_s8 = scalar_lea.sflag [#allocation4], %s213_s27 }
  0x5b   : > { %s11363_s9 = scalar_lea.hbm %s11665_s6, 512  ;;  %s11368_s12 = scalar_lea.hbm %s16338_s0, 4096 }
  0x5c   : > { %p11364_p2 = scmp.ne.s32.totalorder %s11665_s6, %s11363_s9  ;;  %p11365_p3 = pneg %p11671_p7 }
  0x5d   : > { %p11369_p10 = scmp.lt.u32.totalorder %s11665_s6, %s16338_s0  ;;  %p11370_p1 = scmp.lt.u32.totalorder %s11368_s12, %s11363_s9 }
  0x5e   : > { %p11366_p6 = pnand %p11365_p3, %p11364_p2  ;;  %p11372_p4 = scmp.lt.u32.totalorder %s11363_s9, %s11665_s6 }
  0x5f   : > { %p11371_p11 = por %p11370_p1, %p11369_p10 }
  0x60   : > { %p11367_p8 = pneg %p11366_p6 }
  0x61   : > { %p11373_p5 = por %p11372_p4, %p11371_p11 }
  0x63   : > { %p11374_p9 = pnand %p11373_p5, %p11367_p8 }
  0x65   : > { %11377 = shalt.err (!%p11374_p9)
}
  0x66   : > { %s11378_s27 = scalar_lea.vmem %s11667_s30, 512  ;;  %s11458_s14 = smov [#allocation3]  }
  0x67   : > { %p11379_p12 = scmp.ne.s32.totalorder %s11667_s30, %s11378_s27  ;;  %s11383_s25 = sshll.u32 %s11458_s14, 4  ;;  %s11384_s25 = int_to_ptr.vmem [resolvable:$false] %s11383_s25 }
  0x68   : > { %s11385_s28 = scalar_lea.vmem %s11384_s25, 1024  ;;  %p11386_p2 = scmp.lt.s32.totalorder %s11667_s30, %s11384_s25 }
  0x69   : > { %p11381_p13 = pnand %p11379_p12, %p11365_p3  ;;  %p11387_p6 = scmp.lt.s32.totalorder %s11385_s28, %s11378_s27 }
  0x6b   : > { %p11382_p0 = pneg %p11381_p13  ;;  %p11388_p10 = por %p11387_p6, %p11386_p2 }
  0x6d   : > { %p11389_p1 = pnand %p11388_p10, %p11382_p0 }
  0x6f   : > { %11392 = shalt.err (!%p11389_p1)
}
  0x70   : > { %s11459_s15 = smov 256   ;;  %s11460_s21 = smov 16  }
  0x71   : > { %11195 = dma.hbm_to_vmem [thread:$0]  (!%p11671_p7), %s11665_s6, 512, %s11667_s30, %s11675_s8, %s11459_s15, %s11459_s15, %s11460_s21  }
  0x72   : > { %p16571_p3 = scmp.ne.s32.totalorder %s16567_s24, 0 }
  0x74   : > { %239 = sbr.rel (%p16571_p3) target bundleno = 2080 (0x820), region = 36 }
  0x7b   : > { %s241_s9 = sand.u32 1, %s11435_s16   ;;  %p16572_p8 = scmp.ne.s32.totalorder %s16566_s23, 0 }
  0x7c   : > { %s10703_s10 = sshll.u32 %s241_s9, 5  ;;  %s242_s29 = scalar_lea.sflag [#allocation4], %s241_s9 }
  0x7d   : > { %s245_s12 = scalar_lea.vmem [#allocation3], %s10703_s10 }
  0x7e   : > { %11418 = dma.done.wait (%p16572_p8), %s242_s29, 512  }
  0x7f   : > { %11420 = vsyncadd (%p16572_p8), %s242_s29, 4294966784  ;;  %p16573_p11 = scmp.ne.s32.totalorder %s16565_s22, 0 }
  0x81   : > { %11422 = dma.done.wait (%p16573_p11), [#allocation6], 512  }
  0x82   : > { %11424 = vsyncadd (%p16573_p11), [#allocation6], 4294966784 }
  0x83   : > { %11426 = dma.done.wait (%p16573_p11), [#allocation9], 256  }
  0x84   : > { %11428 = vsyncadd (%p16573_p11), [#allocation9], 4294967040  ;;  %v16347_v0 = vmov 0.0   ;;  %v293_v1 = vld [vmem:[#allocation5] sm:$0xff]  ;;  %v290_v2 = vld [vmem:[%s245_s12 + $0x8] sm:$0xff]  ;;  %vm327_vm0 = vcmask 130048   ;;  %v598_v26 = vlaneseq }
  0x85   : > { %401 = vmatprep.mubr.f32.mxu0 %v16347_v0  ;;  %295 = vxpose.xlu0.b32.start [1/2] (short) (narrow) %v293_v1, 24  ;;  %v292_v3 = vld [vmem:[%s245_s12 + $0x18] sm:$0xff]  ;;  %v289_v4 = vld [vmem:[%s245_s12] sm:$0xff]  ;;  %v291_v5 = vld [vmem:[%s245_s12 + $0x10] sm:$0xff]  ;;  %s11462_s22 = smov 32   ;;  %s11463_s23 = smov 112  }
  0x86   : > { %v294_v6 = vld [vmem:[#allocation5 + $0x8] sm:$0xff]  ;;  %v11155_v7 = vpack.c.bf16 %v292_v3, %v290_v2  ;;  %v11157_v8 = vpack.c.bf16 %v291_v5, %v289_v4  ;;  %s11464_s24 = smov 96   ;;  %s11465_s30 = smov 80   ;;  %v11469_v24 = vmov 1983009808   ;;  %v599_v30 = vshrl.u32 %v598_v26, 7 }
  0x87   : > { %s11466_s6 = smov 64   ;;  %s11467_s7 = smov 48   ;;  %v596_v25 = vunpack.c.l.s4 %v11469_v24  ;;  %v11470_v34 = vmov 1934713408   ;;  %vm11472_vm1 = vmmov 0   ;;  %vm6608_vm2 = vcmask 1040384  }
  0x88   : > { %11156 = vmatprep.subr.bf16.mxu0 %v11155_v7  ;;  %s11468_s8 = smov 16   ;;  %v660_v35 = vunpack.c.l.s4 %v11470_v34  ;;  %vm6609_vm3 = vcmask 1042434   ;;  %s11473_s11 = smov 119   ;;  %vm6611_vm5 = vcmask 1044484   ;;  %vm6613_vm7 = vcmask 1046534  }
  0x89   : > { %296 = vxpose.xlu0.b32.end [2/2] (short) (narrow) %v294_v6, 24  ;;  %11158 = vmatpush1.bf16.msra.mxu0 %v11157_v8  ;;  %v597_v29 = vunpack.c.0.s8 %v596_v25  ;;  %vm6610_vm4 = vmor %vm6608_vm2, %vm6609_vm3  ;;  %s11474_s13 = smov 9   ;;  %s11475_s27 = smov 18   ;;  %vm5909_vm9 = vcmask 72704   ;;  %vm5912_vm10 = vcmask 146432   ;;  %vm5915_vm11 = vcmask 220160  }
  0x8a   : > { %v661_v41 = vunpack.c.0.s8 %v660_v35  ;;  %vm12433_vm6 = vmor %vm6610_vm4, %vm6611_vm5  ;;  %s11476_s14 = smov 27   ;;  %s11477_s25 = smov 36   ;;  %vm5918_vm12 = vcmask 293888   ;;  %vm5921_vm13 = vcmask 367616   ;;  %vm5924_vm14 = vcmask 441344  }
  0x8b   : > { %v11824_v36 = vsub.s32 %v597_v29, %v599_v30  ;;  %vm12453_vm8 = vmor %vm12433_vm6, %vm6613_vm7  ;;  %s11478_s28 = smov 45   ;;  %s11479_s15 = smov 72   ;;  %vm5927_vm15 = vcmask 515072   ;;  %vm5935_vm2 = vcmask 655360  }
  0x8c   : > { %v11837_v49 = vsub.s32 %v661_v41, %v599_v30  ;;  %s11480_s21 = smov 54   ;;  %s11481_s9 = smov 63  }
  0x8d   : > { %p284_p7 = scmp.lt.s32.totalorder %s11443_s18, 7 }
  0x8f   : > { %s17356_s18 = smov (!%p284_p7, %s11443_s18), 7 }
  0x90   : > { %s10888_s10 = sshll.u32 %s17356_s18, 7 }
  0x91   : > { %s15230_s12 = scalar_lea.vmem %s16342_s4, %s10888_s10 }
 0x105   : > { %v311_v9 = vpop.trf.xlu0 }
 0x106   : > { %10709 = vmatmul.mubr.msk.f32.vlgmr.msra.gmra.mrb[0].mxu0 %vm327_vm0, %v311_v9 }
 0x107   : > { %407 = vmatprep.mubr.f32.mxu0 %v16347_v0 }
 0x109   : > { %v312_v10 = vpop.trf.xlu0 }
 0x10a   : > { %10710 = vmatmul.mubr.msk.f32.gmra.mrb[2].mxu0 %vm327_vm0, %v312_v10 }
 0x10b   : > { %413 = vmatprep.mubr.f32.mxu0 %v16347_v0 }
 0x10d   : > { %v313_v11 = vpop.trf.xlu0 }
 0x10e   : > { %10711 = vmatmul.mubr.msk.f32.gmra.mrb[4].mxu0 %vm327_vm0, %v313_v11 }
 0x10f   : > { %11032 = vmatprep.mubr.msk.f32.mxu0 %vm11472_vm1, %v16347_v0 }
 0x1d9   : > { %v11724_v12 = vpop.f32.mrb[0].mxu0 }
 0x1da   : > { %v11726_v13 = vpop.f32.mrb[1].mxu0  ;;  %509 = vrot.lane.b32.xlu0 %v11724_v12, %s11462_s22  ;;  %464 = vrot.lane.b32.xlu1 %v11724_v12, %s11463_s23 }
 0x1dd   : > { %v11732_v14 = vpop.f32.mrb[2].mxu0 }
 0x1de   : > { %473 = vrot.lane.b32.xlu1 %v11724_v12, %s11464_s24  ;;  %530 = vrot.lane.b32.xlu0 %v11726_v13, %s11463_s23  ;;  %v11738_v15 = vpop.f32.mrb[3].mxu0 }
 0x1e1   : > { %v415_v16 = vpop.f32.mrb[4].mxu0 }
 0x1e2   : > { %482 = vrot.lane.b32.xlu1 %v11724_v12, %s11465_s30  ;;  %548 = vrot.lane.b32.xlu0 %v11726_v13, %s11465_s30  ;;  %428 = vst [vmem:[#allocation2 + $0x20] sm:$0x3] %v415_v16  ;;  %v417_v17 = vpop.f32.mrb[5].mxu0 }
 0x1e3   : > { %429 = vst [vmem:[#allocation2 + $0x28] sm:$0x3] %v417_v17 }
 0x1e6   : > { %491 = vrot.lane.b32.xlu1 %v11724_v12, %s11466_s6  ;;  %566 = vrot.lane.b32.xlu0 %v11726_v13, %s11467_s7 }
 0x1e9   : > { %v11764_v18 = vld [vmem:[#allocation2 + $0x20] sm:$0x3] }
 0x1ea   : > { %500 = vrot.lane.b32.xlu1 %v11724_v12, %s11467_s7  ;;  %584 = vrot.lane.b32.xlu0 %v11726_v13, %s11468_s8  ;;  %v11774_v19 = vld [vmem:[#allocation2 + $0x28] sm:$0x3] }
 0x1ee   : > { %518 = vrot.lane.b32.xlu1 %v11724_v12, %s11468_s8  ;;  %520 = vrot.lane.b32.xlu0 %v11732_v14, %s11468_s8 }
 0x1f2   : > { %539 = vrot.lane.b32.xlu1 %v11726_v13, %s11464_s24  ;;  %541 = vrot.lane.b32.xlu0 %v11738_v15, %s11464_s24 }
 0x1f6   : > { %557 = vrot.lane.b32.xlu1 %v11726_v13, %s11466_s6  ;;  %559 = vrot.lane.b32.xlu0 %v11738_v15, %s11466_s6 }
 0x1fa   : > { %575 = vrot.lane.b32.xlu1 %v11726_v13, %s11462_s22  ;;  %468 = vrot.lane.b32.xlu0 %v11764_v18, %s11463_s23 }
 0x1fe   : > { %466 = vrot.lane.b32.xlu1 %v11732_v14, %s11463_s23  ;;  %513 = vrot.lane.b32.xlu0 %v11764_v18, %s11462_s22 }
 0x202   : > { %475 = vrot.lane.b32.xlu1 %v11732_v14, %s11464_s24  ;;  %534 = vrot.lane.b32.xlu0 %v11774_v19, %s11463_s23 }
 0x206   : > { %484 = vrot.lane.b32.xlu1 %v11732_v14, %s11465_s30  ;;  %552 = vrot.lane.b32.xlu0 %v11774_v19, %s11465_s30 }
 0x20a   : > { %493 = vrot.lane.b32.xlu1 %v11732_v14, %s11466_s6  ;;  %570 = vrot.lane.b32.xlu0 %v11774_v19, %s11467_s7 }
 0x20e   : > { %502 = vrot.lane.b32.xlu1 %v11732_v14, %s11467_s7  ;;  %579 = vrot.lane.b32.xlu0 %v11774_v19, %s11462_s22 }
 0x212   : > { %511 = vrot.lane.b32.xlu1 %v11732_v14, %s11462_s22  ;;  %588 = vrot.lane.b32.xlu0 %v11774_v19, %s11468_s8 }
 0x216   : > { %532 = vrot.lane.b32.xlu1 %v11738_v15, %s11463_s23 }
 0x21a   : > { %550 = vrot.lane.b32.xlu1 %v11738_v15, %s11465_s30 }
 0x21e   : > { %568 = vrot.lane.b32.xlu1 %v11738_v15, %s11467_s7 }
 0x222   : > { %577 = vrot.lane.b32.xlu1 %v11738_v15, %s11462_s22 }
 0x226   : > { %586 = vrot.lane.b32.xlu1 %v11738_v15, %s11468_s8 }
 0x22a   : > { %477 = vrot.lane.b32.xlu1 %v11764_v18, %s11464_s24 }
 0x22e   : > { %486 = vrot.lane.b32.xlu1 %v11764_v18, %s11465_s30 }
 0x232   : > { %495 = vrot.lane.b32.xlu1 %v11764_v18, %s11466_s6 }
 0x236   : > { %504 = vrot.lane.b32.xlu1 %v11764_v18, %s11467_s7 }
 0x23a   : > { %522 = vrot.lane.b32.xlu1 %v11764_v18, %s11468_s8 }
 0x23e   : > { %543 = vrot.lane.b32.xlu1 %v11774_v19, %s11464_s24 }
 0x242   : > { %561 = vrot.lane.b32.xlu1 %v11774_v19, %s11466_s6 }
 0x24c   : > { %v465_v20 = vpop.permute.xlu1 %464  ;;  %v510_v21 = vpop.permute.xlu0 %509 }
 0x250   : > { %v474_v22 = vpop.permute.xlu1 %473  ;;  %v11820_v27 = vpop.permute.xlu0 %530 }
 0x251   : > { %v593_v37 = vcombine.low %v11724_v12, %v474_v22  ;;  %v594_v1 = vcombine.high %v11724_v12, %v474_v22 }
 0x253   : > { %v11831_v43 = vrot.slane %v593_v37, %v11824_v36  ;;  %v608_v17 = vrot.slane %v594_v1, %v11824_v36 }
 0x254   : > { %v483_v23 = vpop.permute.xlu1 %482  ;;  %v11822_v32 = vpop.permute.xlu0 %548 }
 0x255   : > { %v609_v31 = vcombine.low %v465_v20, %v483_v23  ;;  %v745_v57 = vcombine.low %v11820_v27, %v11822_v32  ;;  %v610_v58 = vcombine.high %v465_v20, %v483_v23  ;;  %v746_v20 = vcombine.high %v11820_v27, %v11822_v32  ;;  %v1814_v32 = vld [vmem:[#allocation7 + $0x8] sm:$0xff] }
 0x257   : > { %v11828_v38 = vrot.slane %v609_v31, %v11824_v36  ;;  %v753_v4 = vrot.slane %v745_v57, %v11824_v36  ;;  %v624_v7 = vrot.slane %v610_v58, %v11824_v36  ;;  %v1813_v31 = vld [vmem:[#allocation7] sm:$0xff] }
 0x258   : > { %v492_v28 = vpop.permute.xlu1 %491  ;;  %v567_v44 = vpop.permute.xlu0 %566 }
 0x259   : > { %v625_v39 = vcombine.low %v492_v28, %v510_v21  ;;  %v657_v48 = vcombine.low %v11831_v43, %v11828_v38  ;;  %v626_v59 = vcombine.high %v492_v28, %v510_v21  ;;  %v673_v26 = vcombine.low %v608_v17, %v624_v7 }
 0x25b   : > { %v633_v46 = vrot.slane %v625_v39, %v11824_v36  ;;  %v665_v55 = vrot.slane %v657_v48, %v11837_v49  ;;  %v640_v8 = vrot.slane %v626_v59, %v11824_v36  ;;  %v11159_v39 = vpack.c.bf16 %v1814_v32, %v1813_v31 }
 0x25c   : > { %v501_v33 = vpop.permute.xlu1 %500  ;;  %v585_v52 = vpop.permute.xlu0 %584 }
 0x25d   : > { %v777_v62 = vcombine.low %v567_v44, %v585_v52  ;;  %v778_v9 = vcombine.high %v567_v44, %v585_v52  ;;  %11160 = vmatprep.subr.bf16.mxu1 %v11159_v39 }
 0x25e   : > { %11162 = vmatpush3.bf16.msra.mxu1 %v11159_v39 }
 0x25f   : > { %v785_v10 = vrot.slane %v777_v62, %v11824_v36  ;;  %v792_v28 = vrot.slane %v778_v9, %v11824_v36 }
 0x260   : > { %v519_v40 = vpop.permute.xlu1 %518  ;;  %v11884_v58 = vpop.permute.xlu0 %520 }
 0x261   : > { %v641_v42 = vcombine.low %v501_v33, %v519_v40  ;;  %v642_v53 = vcombine.high %v501_v33, %v519_v40  ;;  %v760_v33 = vrot.slane %v746_v20, %v11824_v36 }
 0x263   : > { %v649_v45 = vrot.slane %v641_v42, %v11824_v36  ;;  %v11847_v2 = vrot.slane %v642_v53, %v11824_v36 }
 0x264   : > { %v540_v47 = vpop.permute.xlu1 %539 }
 0x265   : > { %v689_v50 = vcombine.low %v633_v46, %v649_v45  ;;  %v729_v51 = vcombine.low %v11726_v13, %v540_v47  ;;  %v730_v11 = vcombine.high %v11726_v13, %v540_v47  ;;  %v705_v22 = vcombine.low %v640_v8, %v11847_v2 }
 0x266   : > { %v690_v23 = vcombine.high %v633_v46, %v649_v45  ;;  %v658_v13 = vcombine.high %v11831_v43, %v11828_v38  ;;  %v681_v43 = vrot.slane %v673_v26, %v11837_v49  ;;  %v706_v48 = vcombine.high %v640_v8, %v11847_v2  ;;  %v11895_v8 = vpop.permute.xlu0 %541 }
 0x267   : > { %v697_v56 = vrot.slane %v689_v50, %v11837_v49  ;;  %v737_v63 = vrot.slane %v729_v51, %v11824_v36  ;;  %v744_v29 = vrot.slane %v730_v11, %v11824_v36  ;;  %v713_v35 = vrot.slane %v705_v22, %v11837_v49 }
 0x268   : > { %v558_v54 = vpop.permute.xlu1 %557  ;;  %v704_v37 = vrot.slane %v690_v23, %v11837_v49  ;;  %v672_v46 = vrot.slane %v658_v13, %v11837_v49  ;;  %v720_v62 = vrot.slane %v706_v48, %v11837_v49 }
 0x269   : > { %v721_v60 = vcombine.low %v665_v55, %v697_v56  ;;  %v722_v61 = vcombine.high %v665_v55, %v697_v56  ;;  %v793_v12 = vcombine.low %v737_v63, %v753_v4  ;;  %v794_v44 = vcombine.high %v737_v63, %v753_v4 }
 0x26a   : > { %v809_v45 = vcombine.low %v744_v29, %v760_v33  ;;  %v725_v50 = vcombine.low %v681_v43, %v713_v35  ;;  %v723_v51 = vcombine.low %v672_v46, %v704_v37  ;;  %v674_v56 = vcombine.high %v608_v17, %v624_v7  ;;  %v11907_v23 = vpop.permute.xlu0 %559 }
 0x26b   : > { %1237 = vxpose.xlu1.b32.start [1/2] (short) (narrow) %v721_v60, 16  ;;  %1269 = vxpose.xlu0.b32.start [1/2] (short) (narrow) %v722_v61, 16  ;;  %v801_v30 = vrot.slane %v793_v12, %v11837_v49  ;;  %v808_v55 = vrot.slane %v794_v44, %v11837_v49  ;;  %v810_v63 = vcombine.high %v744_v29, %v760_v33 }
 0x26c   : > { %v576_v3 = vpop.permute.xlu1 %575  ;;  %v688_v2 = vrot.slane %v674_v56, %v11837_v49 }
 0x26d   : > { %v761_v5 = vcombine.low %v558_v54, %v576_v3  ;;  %v762_v6 = vcombine.high %v558_v54, %v576_v3  ;;  %v817_v54 = vrot.slane %v809_v45, %v11837_v49  ;;  %v824_v11 = vrot.slane %v810_v63, %v11837_v49 }
 0x26f   : > { %v769_v16 = vrot.slane %v761_v5, %v11824_v36  ;;  %v776_v24 = vrot.slane %v762_v6, %v11824_v36  ;;  %v727_v5 = vcombine.low %v688_v2, %v720_v62  ;;  %v724_v6 = vcombine.high %v672_v46, %v704_v37 }
 0x270   : > { %v11858_v21 = vpop.permute.xlu1 %466 }
 0x271   : > { %v825_v25 = vcombine.low %v769_v16, %v785_v10  ;;  %v826_v38 = vcombine.high %v769_v16, %v785_v10  ;;  %v841_v40 = vcombine.low %v776_v24, %v792_v28  ;;  %v842_v59 = vcombine.high %v776_v24, %v792_v28 }
 0x272   : > { %v726_v28 = vcombine.high %v681_v43, %v713_v35 }
 0x273   : > { %v833_v27 = vrot.slane %v825_v25, %v11837_v49  ;;  %v849_v52 = vrot.slane %v841_v40, %v11837_v49  ;;  %v840_v53 = vrot.slane %v826_v38, %v11837_v49  ;;  %v856_v7 = vrot.slane %v842_v59, %v11837_v49 }
 0x274   : > { %v11869_v34 = vpop.permute.xlu1 %475  ;;  %v728_v40 = vcombine.high %v688_v2, %v720_v62 }
 0x275   : > { %v857_v41 = vcombine.low %v801_v30, %v833_v27  ;;  %v858_v42 = vcombine.high %v801_v30, %v833_v27  ;;  %v861_v60 = vcombine.low %v817_v54, %v849_v52  ;;  %v859_v61 = vcombine.low %v808_v55, %v840_v53  ;;  %v11915_v30 = vpop.permute.xlu0 %468 }
 0x276   : > { %v865_v4 = vcombine.low %v11732_v14, %v11869_v34  ;;  %v863_v20 = vcombine.low %v824_v11, %v856_v7  ;;  %v860_v22 = vcombine.high %v808_v55, %v840_v53  ;;  %v862_v37 = vcombine.high %v817_v54, %v849_v52 }
 0x277   : > { %1238 = vxpose.xlu1.b32.end [2/2] (short) (narrow) %v857_v41, 16  ;;  %1270 = vxpose.xlu0.b32.end [2/2] (short) (narrow) %v858_v42, 16  ;;  %v1001_v42 = vcombine.low %v11738_v15, %v11895_v8  ;;  %v864_v43 = vcombine.high %v824_v11, %v856_v7 }
 0x278   : > { %v11875_v47 = vpop.permute.xlu1 %484  ;;  %v11904_v16 = vrot.slane %v865_v4, %v11824_v36 }
 0x279   : > { %v881_v1 = vcombine.low %v11858_v21, %v11875_v47  ;;  %v11919_v38 = vpop.permute.xlu0 %513  ;;  %v882_v63 = vcombine.high %v11858_v21, %v11875_v47 }
 0x27b   : > { %1365 = vxpose.xlu1.b32.start [1/2] (short) (narrow) %v725_v50, 16  ;;  %1301 = vxpose.xlu0.b32.start [1/2] (short) (narrow) %v723_v51, 16  ;;  %v11898_v9 = vrot.slane %v881_v1, %v11824_v36  ;;  %v1009_v50 = vrot.slane %v1001_v42, %v11824_v36 }
 0x27c   : > { %v11882_v57 = vpop.permute.xlu1 %493 }
 0x27d   : > { %v929_v26 = vcombine.low %v11904_v16, %v11898_v9  ;;  %v11926_v46 = vpop.permute.xlu0 %534  ;;  %v930_v2 = vcombine.high %v11904_v16, %v11898_v9 }
 0x27f   : > { %1366 = vxpose.xlu1.b32.end [2/2] (short) (narrow) %v861_v60, 16  ;;  %1302 = vxpose.xlu0.b32.end [2/2] (short) (narrow) %v859_v61, 16  ;;  %v937_v27 = vrot.slane %v929_v26, %v11837_v49 }
 0x280   : > { %v11890_v3 = vpop.permute.xlu1 %502 }
 0x281   : > { %v913_v10 = vcombine.low %v11890_v3, %v11884_v58  ;;  %v11934_v62 = vpop.permute.xlu0 %552  ;;  %v914_v1 = vcombine.high %v11890_v3, %v11884_v58  ;;  %v896_v3 = vrot.slane %v882_v63, %v11824_v36 }
 0x283   : > { %1429 = vxpose.xlu1.b32.start [1/2] (short) (narrow) %v727_v5, 16  ;;  %1333 = vxpose.xlu0.b32.start [1/2] (short) (narrow) %v724_v6, 16  ;;  %v921_v24 = vrot.slane %v913_v10, %v11824_v36  ;;  %v928_v9 = vrot.slane %v914_v1, %v11824_v36 }
 0x284   : > { %v512_v12 = vpop.permute.xlu1 %511 }
 0x285   : > { %v897_v17 = vcombine.low %v11882_v57, %v512_v12  ;;  %v898_v56 = vcombine.high %v11882_v57, %v512_v12  ;;  %v866_v57 = vcombine.high %v11732_v14, %v11869_v34  ;;  %v944_v12 = vrot.slane %v930_v2, %v11837_v49  ;;  %v11955_v34 = vpop.permute.xlu0 %570 }
 0x287   : > { %v905_v25 = vrot.slane %v897_v17, %v11824_v36  ;;  %1430 = vxpose.xlu1.b32.end [2/2] (short) (narrow) %v863_v20, 16  ;;  %1334 = vxpose.xlu0.b32.end [2/2] (short) (narrow) %v860_v22, 16  ;;  %v912_v6 = vrot.slane %v898_v56, %v11824_v36  ;;  %v1002_v20 = vcombine.high %v11738_v15, %v11895_v8 }
 0x288   : > { %v11913_v13 = vpop.permute.xlu1 %532  ;;  %v880_v22 = vrot.slane %v866_v57, %v11824_v36 }
 0x289   : > { %v961_v29 = vcombine.low %v905_v25, %v921_v24  ;;  %v962_v60 = vcombine.high %v905_v25, %v921_v24  ;;  %v977_v25 = vcombine.low %v912_v6, %v928_v9  ;;  %v1016_v15 = vrot.slane %v1002_v20, %v11824_v36 }
 0x28b   : > { %1397 = vxpose.xlu0.b32.start [1/2] (short) (narrow) %v726_v28, 16  ;;  %v969_v31 = vrot.slane %v961_v29, %v11837_v49  ;;  %v976_v10 = vrot.slane %v962_v60, %v11837_v49 }
 0x28c   : > { %v551_v32 = vpop.permute.xlu1 %550 }
 0x28d   : > { %v993_v33 = vcombine.low %v937_v27, %v969_v31  ;;  %v1017_v41 = vcombine.low %v11913_v13, %v551_v32  ;;  %v994_v52 = vcombine.high %v937_v27, %v969_v31  ;;  %v1018_v16 = vcombine.high %v11913_v13, %v551_v32 }
 0x28e   : > { %v995_v28 = vcombine.low %v944_v12, %v976_v10  ;;  %v996_v29 = vcombine.high %v944_v12, %v976_v10  ;;  %v945_v27 = vcombine.low %v880_v22, %v896_v3 }
 0x28f   : > { %1493 = vxpose.xlu1.b32.start [1/2] (short) (narrow) %v993_v33, 16  ;;  %1398 = vxpose.xlu0.b32.end [2/2] (short) (narrow) %v862_v37, 16  ;;  %v1025_v44 = vrot.slane %v1017_v41, %v11824_v36  ;;  %v580_v37 = vpop.permute.xlu0 %579  ;;  %v985_v41 = vrot.slane %v977_v25, %v11837_v49 }
 0x290   : > { %v569_v39 = vpop.permute.xlu1 %568  ;;  %v953_v42 = vrot.slane %v945_v27, %v11837_v49 }
 0x291   : > { %v1065_v53 = vcombine.low %v1009_v50, %v1025_v44  ;;  %v1066_v17 = vcombine.high %v1009_v50, %v1025_v44  ;;  %v978_v44 = vcombine.high %v912_v6, %v928_v9 }
 0x292   : > { %v998_v50 = vcombine.high %v953_v42, %v985_v41 }
 0x293   : > { %1461 = vxpose.xlu0.b32.start [1/2] (short) (narrow) %v728_v40, 16  ;;  %v1073_v4 = vrot.slane %v1065_v53, %v11837_v49  ;;  %v1080_v32 = vrot.slane %v1066_v17, %v11837_v49  ;;  %v992_v63 = vrot.slane %v978_v44, %v11837_v49 }
 0x294   : > { %v578_v35 = vpop.permute.xlu1 %577 }
 0x295   : > { %v1033_v45 = vcombine.low %v11907_v23, %v578_v35  ;;  %v1034_v14 = vcombine.high %v11907_v23, %v578_v35  ;;  %v1032_v23 = vrot.slane %v1018_v16, %v11824_v36 }
 0x297   : > { %1462 = vxpose.xlu0.b32.end [2/2] (short) (narrow) %v864_v43, 16  ;;  %v1041_v54 = vrot.slane %v1033_v45, %v11824_v36  ;;  %v1048_v31 = vrot.slane %v1034_v14, %v11824_v36  ;;  %v1081_v35 = vcombine.low %v1016_v15, %v1032_v23  ;;  %v1082_v57 = vcombine.high %v1016_v15, %v1032_v23 }
 0x298   : > { %v587_v48 = vpop.permute.xlu1 %586 }
 0x299   : > { %v1049_v51 = vcombine.low %v569_v39, %v587_v48  ;;  %v1050_v21 = vcombine.high %v569_v39, %v587_v48  ;;  %v997_v48 = vcombine.low %v953_v42, %v985_v41  ;;  %v1089_v56 = vrot.slane %v1081_v35, %v11837_v49 }
 0x29a   : > { %v1096_v16 = vrot.slane %v1082_v57, %v11837_v49 }
 0x29b   : > { %v1057_v55 = vrot.slane %v1049_v51, %v11824_v36  ;;  %1525 = vxpose.xlu0.b32.start [1/2] (short) (narrow) %v994_v52, 16  ;;  %v1064_v26 = vrot.slane %v1050_v21, %v11824_v36  ;;  %v946_v52 = vcombine.high %v880_v22, %v896_v3 }
 0x29c   : > { %v11932_v59 = vpop.permute.xlu1 %477 }
 0x29d   : > { %v1097_v61 = vcombine.low %v1041_v54, %v1057_v55  ;;  %v1098_v47 = vcombine.high %v1041_v54, %v1057_v55  ;;  %v1113_v33 = vcombine.low %v1048_v31, %v1064_v26  ;;  %v589_v55 = vpop.permute.xlu0 %588  ;;  %v1114_v60 = vcombine.high %v1048_v31, %v1064_v26 }
 0x29e   : > { %v1137_v1 = vcombine.low %v11764_v18, %v11932_v59  ;;  %v1195_v18 = vcombine.low %v11926_v46, %v11934_v62 }
 0x29f   : > { %v1105_v5 = vrot.slane %v1097_v61, %v11837_v49  ;;  %v1112_v13 = vrot.slane %v1098_v47, %v11837_v49  ;;  %v1121_v51 = vrot.slane %v1113_v33, %v11837_v49  ;;  %v1128_v3 = vrot.slane %v1114_v60, %v11837_v49 }
 0x2a0   : > { %v11947_v7 = vpop.permute.xlu1 %486  ;;  %v1202_v62 = vrot.slane %v1195_v18, %v11824_v36 }
 0x2a1   : > { %v1129_v11 = vcombine.low %v1073_v4, %v1105_v5  ;;  %v1130_v58 = vcombine.high %v1073_v4, %v1105_v5  ;;  %v1131_v39 = vcombine.low %v1080_v32, %v1112_v13  ;;  %v1132_v40 = vcombine.high %v1080_v32, %v1112_v13 }
 0x2a2   : > { %v1145_v53 = vcombine.low %v11915_v30, %v11947_v7  ;;  %v1133_v4 = vcombine.low %v1089_v56, %v1121_v51  ;;  %v1134_v5 = vcombine.high %v1089_v56, %v1121_v51  ;;  %v1211_v30 = vcombine.low %v11955_v34, %v589_v55 }
 0x2a3   : > { %1494 = vxpose.xlu1.b32.end [2/2] (short) (narrow) %v1129_v11, 16  ;;  %1526 = vxpose.xlu0.b32.end [2/2] (short) (narrow) %v1130_v58, 16  ;;  %v1144_v11 = vrot.slane %v1137_v1, %v11824_v36  ;;  %v1135_v34 = vcombine.low %v1096_v16, %v1128_v3  ;;  %v1136_v20 = vcombine.high %v1096_v16, %v1128_v3  ;;  %v3537_v16 = vld [vmem:[#allocation8 + $0x8] sm:$0xff] }
 0x2a4   : > { %v496_v24 = vpop.permute.xlu1 %495  ;;  %v1152_v6 = vrot.slane %v1145_v53, %v11824_v36  ;;  %v1218_v12 = vrot.slane %v1211_v30, %v11824_v36 }
 0x2a5   : > { %v1153_v54 = vcombine.low %v496_v24, %v11919_v38  ;;  %v960_v38 = vrot.slane %v946_v52, %v11837_v49 }
 0x2a6   : > { %v1169_v46 = vcombine.low %v1144_v11, %v1152_v6 }
 0x2a7   : > { %1557 = vxpose.xlu1.b32.start [1/2] (short) (narrow) %v995_v28, 16  ;;  %1589 = vxpose.xlu0.b32.start [1/2] (short) (narrow) %v996_v29, 16  ;;  %v1160_v7 = vrot.slane %v1153_v54, %v11824_v36  ;;  %v999_v21 = vcombine.low %v960_v38, %v992_v63  ;;  %v1000_v47 = vcombine.high %v960_v38, %v992_v63 }
 0x2a8   : > { %v505_v8 = vpop.permute.xlu1 %504  ;;  %v1176_v25 = vrot.slane %v1169_v46, %v11837_v49 }
 0x2ab   : > { %1558 = vxpose.xlu1.b32.end [2/2] (short) (narrow) %v1131_v39, 16  ;;  %1590 = vxpose.xlu0.b32.end [2/2] (short) (narrow) %v1132_v40, 16 }
 0x2ac   : > { %v523_v43 = vpop.permute.xlu1 %522 }
 0x2ad   : > { %v1161_v45 = vcombine.low %v505_v8, %v523_v43 }
 0x2af   : > { %1621 = vxpose.xlu1.b32.start [1/2] (short) (narrow) %v997_v48, 16  ;;  %1653 = vxpose.xlu0.b32.start [1/2] (short) (narrow) %v998_v50, 16  ;;  %v1168_v2 = vrot.slane %v1161_v45, %v11824_v36 }
 0x2b0   : > { %v544_v61 = vpop.permute.xlu1 %543 }
 0x2b1   : > { %v1187_v10 = vcombine.low %v11774_v19, %v544_v61  ;;  %v1177_v9 = vcombine.low %v1160_v7, %v1168_v2 }
 0x2b3   : > { %1622 = vxpose.xlu1.b32.end [2/2] (short) (narrow) %v1133_v4, 16  ;;  %1654 = vxpose.xlu0.b32.end [2/2] (short) (narrow) %v1134_v5, 16  ;;  %v1194_v19 = vrot.slane %v1187_v10, %v11824_v36  ;;  %v1184_v22 = vrot.slane %v1177_v9, %v11837_v49 }
 0x2b4   : > { %v562_v59 = vpop.permute.xlu1 %561 }
 0x2b5   : > { %v1203_v58 = vcombine.low %v562_v59, %v580_v37  ;;  %v1219_v24 = vcombine.low %v1194_v19, %v1202_v62  ;;  %v1185_v26 = vcombine.low %v1176_v25, %v1184_v22  ;;  %v1186_v28 = vcombine.high %v1176_v25, %v1184_v22 }
 0x2b6   : > { %v11471_v59 = vmov 0.0|0.0  }
 0x2b7   : > { %v1210_v17 = vrot.slane %v1203_v58, %v11824_v36  ;;  %1685 = vxpose.xlu1.b32.start [1/2] (short) (narrow) %v999_v21, 16  ;;  %1717 = vxpose.xlu0.b32.start [1/2] (short) (narrow) %v1000_v47, 16  ;;  %v1226_v13 = vrot.slane %v1219_v24, %v11837_v49 }
 0x2b8   : > { %11163 = vmatprep.subr.bf16.mxu0 %v11471_v59  ;;  %11166 = vmatprep.subr.bf16.mxu1 %v11471_v59 }
 0x2b9   : > { %v1227_v14 = vcombine.low %v1210_v17, %v1218_v12  ;;  %v3536_v12 = vld [vmem:[#allocation8] sm:$0xff] }
 0x2ba   : > { %v11164_v19 = vpack.c.bf16 %v3537_v16, %v3536_v12 }
 0x2bb   : > { %1686 = vxpose.xlu1.b32.end [2/2] (short) (narrow) %v1135_v34, 16  ;;  %1718 = vxpose.xlu0.b32.end [2/2] (short) (narrow) %v1136_v20, 16  ;;  %v1234_v29 = vrot.slane %v1227_v14, %v11837_v49 }
 0x2bc   : > { %11165 = vmatpush3.bf16.msra.mxu0 %v11164_v19 }
 0x2bd   : > { %v1236_v27 = vcombine.high %v1226_v13, %v1234_v29  ;;  %v1235_v23 = vcombine.low %v1226_v13, %v1234_v29 }
 0x2bf   : > { %1749 = vxpose.xlu1.b32.start [1/2] (short) (narrow) %v1185_v26, 16  ;;  %1781 = vxpose.xlu0.b32.start [1/2] (short) (narrow) %v1186_v28, 16 }
 0x2c3   : > { %1782 = vxpose.xlu0.b32.end [2/2] (short) (narrow) %v1236_v27, 16  ;;  %1750 = vxpose.xlu1.b32.end [2/2] (short) (narrow) %v1235_v23, 16 }
 0x2f3   : > { %v1253_v31 = vpop.trf.xlu1  ;;  %v1285_v32 = vpop.trf.xlu0 }
 0x2f4   : > { %10974 = vmatprep.mubr.msk.f32.mxu1 %vm327_vm0, %v1253_v31 }
 0x2f7   : > { %v1254_v15 = vpop.trf.xlu1  ;;  %v1286_v8 = vpop.trf.xlu0 }
 0x2f8   : > { %10975 = vmatmul.mubr.msk.f32.vlgmr.msra.gmra.mrb[0].mxu1 %vm327_vm0, %v1254_v15 }
 0x2f9   : > { %10977 = vmatprep.mubr.msk.f32.mxu1 %vm327_vm0, %v1285_v32  ;;  %11167 = vmatpush3.bf16.msra.mxu1 %v11164_v19 }
 0x2fb   : > { %v1317_v33 = vpop.trf.xlu0  ;;  %v1381_v39 = vpop.trf.xlu1 }
 0x2fc   : > { %10978 = vmatmul.mubr.msk.f32.gmra.mrb[2].mxu1 %vm327_vm0, %v1286_v8 }
 0x2fd   : > { %10980 = vmatprep.mubr.msk.f32.mxu1 %vm327_vm0, %v1317_v33 }
 0x2ff   : > { %v1318_v37 = vpop.trf.xlu0  ;;  %v1382_v35 = vpop.trf.xlu1 }
 0x300   : > { %10981 = vmatmul.mubr.msk.f32.gmra.mrb[4].mxu1 %vm327_vm0, %v1318_v37 }
 0x303   : > { %v1349_v40 = vpop.trf.xlu0  ;;  %v1445_v43 = vpop.trf.xlu1 }
 0x304   : > { %10983 = vmatprep.mubr.msk.f32.mxu1 %vm327_vm0, %v1349_v40 }
 0x307   : > { %v1350_v41 = vpop.trf.xlu0  ;;  %v1446_v45 = vpop.trf.xlu1 }
 0x308   : > { %10984 = vmatmul.mubr.msk.f32.gmra.mrb[6].mxu1 %vm327_vm0, %v1350_v41 }
 0x309   : > { %10986 = vmatprep.mubr.msk.f32.mxu1 %vm327_vm0, %v1381_v39 }
 0x30b   : > { %v1413_v42 = vpop.trf.xlu0 }
 0x30c   : > { %10987 = vmatmul.mubr.msk.f32.gmra.mrb[8].mxu1 %vm327_vm0, %v1382_v35 }
 0x30d   : > { %10989 = vmatprep.mubr.msk.f32.mxu1 %vm327_vm0, %v1413_v42 }
 0x30f   : > { %v1414_v44 = vpop.trf.xlu0 }
 0x310   : > { %10990 = vmatmul.mubr.msk.f32.gmra.mrb[10].mxu1 %vm327_vm0, %v1414_v44 }
 0x311   : > { %10992 = vmatprep.mubr.msk.f32.mxu1 %vm327_vm0, %v1445_v43 }
 0x313   : > { %v1477_v48 = vpop.trf.xlu0 }
 0x314   : > { %10993 = vmatmul.mubr.msk.f32.gmra.mrb[12].mxu1 %vm327_vm0, %v1446_v45 }
 0x315   : > { %10995 = vmatprep.mubr.msk.f32.mxu1 %vm327_vm0, %v1477_v48 }
 0x317   : > { %v1478_v50 = vpop.trf.xlu0 }
 0x318   : > { %10996 = vmatmul.mubr.msk.f32.gmra.mrb[14].mxu1 %vm327_vm0, %v1478_v50 }
 0x31f   : > { %v1509_v51 = vpop.trf.xlu1  ;;  %v1541_v52 = vpop.trf.xlu0 }
 0x320   : > { %10998 = vmatprep.mubr.msk.f32.mxu1 %vm327_vm0, %v1509_v51 }
 0x323   : > { %v1510_v53 = vpop.trf.xlu1  ;;  %v1542_v54 = vpop.trf.xlu0 }
 0x324   : > { %10999 = vmatmul.mubr.msk.f32.gmra.mrb[16].mxu1 %vm327_vm0, %v1510_v53 }
 0x325   : > { %11001 = vmatprep.mubr.msk.f32.mxu1 %vm327_vm0, %v1541_v52 }
 0x327   : > { %v1573_v55 = vpop.trf.xlu1  ;;  %v1605_v56 = vpop.trf.xlu0 }
 0x328   : > { %11002 = vmatmul.mubr.msk.f32.gmra.mrb[18].mxu1 %vm327_vm0, %v1542_v54 }
 0x329   : > { %11004 = vmatprep.mubr.msk.f32.mxu1 %vm327_vm0, %v1573_v55 }
 0x32b   : > { %v1574_v60 = vpop.trf.xlu1  ;;  %v1606_v61 = vpop.trf.xlu0 }
 0x32c   : > { %11005 = vmatmul.mubr.msk.f32.gmra.mrb[20].mxu1 %vm327_vm0, %v1574_v60 }
 0x32d   : > { %11007 = vmatprep.mubr.msk.f32.mxu1 %vm327_vm0, %v1605_v56 }
 0x32f   : > { %v1637_v63 = vpop.trf.xlu1  ;;  %v1669_v1 = vpop.trf.xlu0 }
 0x330   : > { %11008 = vmatmul.mubr.msk.f32.gmra.mrb[22].mxu1 %vm327_vm0, %v1606_v61 }
 0x331   : > { %11010 = vmatprep.mubr.msk.f32.mxu1 %vm327_vm0, %v1637_v63 }
 0x333   : > { %v1638_v2 = vpop.trf.xlu1  ;;  %v1670_v4 = vpop.trf.xlu0 }
 0x334   : > { %11011 = vmatmul.mubr.msk.f32.gmra.mrb[24].mxu1 %vm327_vm0, %v1638_v2 }
 0x335   : > { %11013 = vmatprep.mubr.msk.f32.mxu1 %vm327_vm0, %v1669_v1 }
 0x337   : > { %v1701_v5 = vpop.trf.xlu1  ;;  %v1733_v57 = vpop.trf.xlu0 }
 0x338   : > { %11014 = vmatmul.mubr.msk.f32.gmra.mrb[26].mxu1 %vm327_vm0, %v1670_v4 }
 0x339   : > { %11016 = vmatprep.mubr.msk.f32.mxu1 %vm327_vm0, %v1701_v5 }
 0x33b   : > { %v1702_v30 = vpop.trf.xlu1  ;;  %v1734_v38 = vpop.trf.xlu0 }
 0x33c   : > { %11017 = vmatmul.mubr.msk.f32.gmra.mrb[28].mxu1 %vm327_vm0, %v1702_v30 }
 0x33d   : > { %11019 = vmatprep.mubr.msk.f32.mxu1 %vm327_vm0, %v1733_v57 }
 0x33f   : > { %v1765_v6 = vpop.trf.xlu1  ;;  %v1797_v7 = vpop.trf.xlu0 }
 0x340   : > { %11020 = vmatmul.mubr.msk.f32.gmra.mrb[30].mxu1 %vm327_vm0, %v1734_v38 }
 0x341   : > { %11022 = vmatprep.mubr.msk.f32.mxu1 %vm327_vm0, %v1765_v6 }
 0x343   : > { %v1766_v10 = vpop.trf.xlu1  ;;  %v1798_v18 = vpop.trf.xlu0 }
 0x344   : > { %11023 = vmatmul.mubr.msk.f32.gmra.mrb[32].mxu1 %vm327_vm0, %v1766_v10 }
 0x345   : > { %11025 = vmatprep.mubr.msk.f32.mxu1 %vm327_vm0, %v1797_v7 }
 0x348   : > { %11026 = vmatmul.mubr.msk.f32.gmra.mrb[34].mxu1 %vm327_vm0, %v1798_v18 }
 0x349   : > { %11116 = vmatprep.mubr.msk.f32.mxu1 %vm11472_vm1, %v16347_v0 }
 0x3cb   : > { %v10976_v21 = vpop.f32.mrb[0].mxu1 }
 0x3cc   : > { %v1989_v47 = vpop.f32.mrb[1].mxu1 }
 0x3cd   : > { %2168 = vxpose.xlu1.b32.start [1/2] (short) (narrow) %v1989_v47, 24 }
 0x3cf   : > { %v10979_v11 = vpop.f32.mrb[2].mxu1 }
 0x3d0   : > { %v1999_v58 = vpop.f32.mrb[3].mxu1 }
 0x3d1   : > { %2169 = vxpose.xlu1.b32.end [2/2] (short) (narrow) %v10976_v21, 24  ;;  %2200 = vxpose.xlu0.b32.start [1/2] (short) (narrow) %v1999_v58, 24 }
 0x3d3   : > { %v10982_v3 = vpop.f32.mrb[4].mxu1 }
 0x3d4   : > { %v2009_v9 = vpop.f32.mrb[5].mxu1 }
 0x3d5   : > { %2201 = vxpose.xlu0.b32.end [2/2] (short) (narrow) %v10979_v11, 24 }
 0x3d6   : > { %2232 = vxpose.xlu1.b32.start [1/2] (short) (narrow) %v2009_v9, 24 }
 0x3da   : > { %2233 = vxpose.xlu1.b32.end [2/2] (short) (narrow) %v10982_v3, 24 }
 0x3db   : > { %v10985_v17 = vpop.f32.mrb[6].mxu1 }
 0x3dc   : > { %v2019_v46 = vpop.f32.mrb[7].mxu1 }
 0x3dd   : > { %2264 = vxpose.xlu0.b32.start [1/2] (short) (narrow) %v2019_v46, 24 }
 0x3df   : > { %v10988_v62 = vpop.f32.mrb[8].mxu1 }
 0x3e0   : > { %v2029_v14 = vpop.f32.mrb[9].mxu1 }
 0x3e1   : > { %2296 = vxpose.xlu1.b32.start [1/2] (short) (narrow) %v2029_v14, 24  ;;  %2265 = vxpose.xlu0.b32.end [2/2] (short) (narrow) %v10985_v17, 24 }
 0x3e3   : > { %v10991_v34 = vpop.f32.mrb[10].mxu1 }
 0x3e4   : > { %v2039_v20 = vpop.f32.mrb[11].mxu1 }
 0x3e5   : > { %2297 = vxpose.xlu1.b32.end [2/2] (short) (narrow) %v10988_v62, 24 }
 0x3e6   : > { %2328 = vxpose.xlu0.b32.start [1/2] (short) (narrow) %v2039_v20, 24 }
 0x3e7   : > { %v10994_v22 = vpop.f32.mrb[12].mxu1 }
 0x3e8   : > { %v2049_v24 = vpop.f32.mrb[13].mxu1 }
 0x3ea   : > { %2360 = vxpose.xlu1.b32.start [1/2] (short) (narrow) %v2049_v24, 24  ;;  %2329 = vxpose.xlu0.b32.end [2/2] (short) (narrow) %v10991_v34, 24 }
 0x3eb   : > { %v10997_v25 = vpop.f32.mrb[14].mxu1 }
 0x3ec   : > { %v2059_v26 = vpop.f32.mrb[15].mxu1 }
 0x3ee   : > { %2361 = vxpose.xlu1.b32.end [2/2] (short) (narrow) %v10994_v22, 24 }
 0x3ef   : > { %2392 = vxpose.xlu0.b32.start [1/2] (short) (narrow) %v2059_v26, 24 }
 0x3f3   : > { %2393 = vxpose.xlu0.b32.end [2/2] (short) (narrow) %v10997_v25, 24 }
 0x3f7   : > { %v11000_v28 = vpop.f32.mrb[16].mxu1 }
 0x3f8   : > { %v2069_v29 = vpop.f32.mrb[17].mxu1 }
 0x3f9   : > { %2424 = vxpose.xlu1.b32.start [1/2] (short) (narrow) %v2069_v29, 24 }
 0x3fb   : > { %v11003_v13 = vpop.f32.mrb[18].mxu1 }
 0x3fc   : > { %v2079_v27 = vpop.f32.mrb[19].mxu1 }
 0x3fd   : > { %2425 = vxpose.xlu1.b32.end [2/2] (short) (narrow) %v11000_v28, 24  ;;  %2456 = vxpose.xlu0.b32.start [1/2] (short) (narrow) %v2079_v27, 24 }
 0x3ff   : > { %v11006_v23 = vpop.f32.mrb[20].mxu1 }
 0x400   : > { %v2089_v31 = vpop.f32.mrb[21].mxu1 }
 0x401   : > { %2457 = vxpose.xlu0.b32.end [2/2] (short) (narrow) %v11003_v13, 24 }
 0x402   : > { %2488 = vxpose.xlu1.b32.start [1/2] (short) (narrow) %v2089_v31, 24 }
 0x403   : > { %v11009_v32 = vpop.f32.mrb[22].mxu1 }
 0x404   : > { %v2099_v15 = vpop.f32.mrb[23].mxu1 }
 0x406   : > { %2489 = vxpose.xlu1.b32.end [2/2] (short) (narrow) %v11006_v23, 24  ;;  %2520 = vxpose.xlu0.b32.start [1/2] (short) (narrow) %v2099_v15, 24 }
 0x407   : > { %v11012_v8 = vpop.f32.mrb[24].mxu1 }
 0x408   : > { %v2109_v33 = vpop.f32.mrb[25].mxu1 }
 0x40a   : > { %2521 = vxpose.xlu0.b32.end [2/2] (short) (narrow) %v11009_v32, 24 }
 0x40b   : > { %2552 = vxpose.xlu1.b32.start [1/2] (short) (narrow) %v2109_v33, 24  ;;  %v11015_v37 = vpop.f32.mrb[26].mxu1 }
 0x40c   : > { %v2119_v39 = vpop.f32.mrb[27].mxu1 }
 0x40f   : > { %2553 = vxpose.xlu1.b32.end [2/2] (short) (narrow) %v11012_v8, 24  ;;  %2584 = vxpose.xlu0.b32.start [1/2] (short) (narrow) %v2119_v39, 24  ;;  %v11018_v40 = vpop.f32.mrb[28].mxu1 }
 0x410   : > { %v2129_v41 = vpop.f32.mrb[29].mxu1 }
 0x413   : > { %2585 = vxpose.xlu0.b32.end [2/2] (short) (narrow) %v11015_v37, 24  ;;  %v11021_v35 = vpop.f32.mrb[30].mxu1 }
 0x414   : > { %2616 = vxpose.xlu1.b32.start [1/2] (short) (narrow) %v2129_v41, 24  ;;  %v2139_v42 = vpop.f32.mrb[31].mxu1 }
 0x417   : > { %v11024_v43 = vpop.f32.mrb[32].mxu1 }
 0x418   : > { %2617 = vxpose.xlu1.b32.end [2/2] (short) (narrow) %v11018_v40, 24  ;;  %2648 = vxpose.xlu0.b32.start [1/2] (short) (narrow) %v2139_v42, 24  ;;  %v2149_v44 = vpop.f32.mrb[33].mxu1 }
 0x41b   : > { %v11027_v45 = vpop.f32.mrb[34].mxu1 }
 0x41c   : > { %2649 = vxpose.xlu0.b32.end [2/2] (short) (narrow) %v11021_v35, 24  ;;  %v2159_v48 = vpop.f32.mrb[35].mxu1 }
 0x41d   : > { %2680 = vxpose.xlu1.b32.start [1/2] (short) (narrow) %v2149_v44, 24 }
 0x421   : > { %2681 = vxpose.xlu1.b32.end [2/2] (short) (narrow) %v11024_v43, 24  ;;  %2712 = vxpose.xlu0.b32.start [1/2] (short) (narrow) %v2159_v48, 24 }
 0x425   : > { %2713 = vxpose.xlu0.b32.end [2/2] (short) (narrow) %v11027_v45, 24 }
 0x44d   : > { %v2184_v50 = vpop.trf.xlu1 }
 0x44e   : > { %v2798_v51 = vcombine.high %v2184_v50, %v2184_v50  ;;  %v2805_v52 = vrot.slane %v2184_v50, %v11824_v36 }
 0x450   : > { %v2812_v53 = vrot.slane %v2798_v51, %v11824_v36  ;;  %v2813_v54 = vcombine.high %v2805_v52, %v2805_v52 }
 0x451   : > { %v2185_v55 = vpop.trf.xlu1  ;;  %v2216_v56 = vpop.trf.xlu0 }
 0x452   : > { %v2814_v60 = vcombine.high %v2812_v53, %v2812_v53  ;;  %v3538_v61 = vcombine.low %v2805_v52, %v2813_v54  ;;  %v2815_v63 = vcombine.high %v2185_v55, %v2185_v55  ;;  %v2822_v1 = vrot.slane %v2185_v55, %v11824_v36 }
 0x453   : > { %v2839_v2 = vcombine.high %v2216_v56, %v2216_v56  ;;  %v2846_v4 = vrot.slane %v2216_v56, %v11824_v36 }
 0x454   : > { %v3539_v5 = vcombine.low %v2812_v53, %v2814_v60  ;;  %v2829_v57 = vrot.slane %v2815_v63, %v11824_v36  ;;  %v2830_v30 = vcombine.high %v2822_v1, %v2822_v1  ;;  %v3546_v38 = vrot.slane %v3538_v61, %v11824_v36 }
 0x455   : > { %v2186_v6 = vpop.trf.xlu1  ;;  %v2853_v7 = vrot.slane %v2839_v2, %v11824_v36  ;;  %v2854_v10 = vcombine.high %v2846_v4, %v2846_v4  ;;  %v2217_v18 = vpop.trf.xlu0 }
 0x456   : > { %v3553_v59 = vrot.slane %v3539_v5, %v11824_v36  ;;  %v2831_v21 = vcombine.high %v2829_v57, %v2829_v57  ;;  %v3555_v47 = vcombine.low %v2822_v1, %v2830_v30  ;;  %v2838_v11 = vrot.slane %v2186_v6, %v11824_v36 }
 0x457   : > { %v3573_v58 = vcombine.low %v2854_v10, %v2853_v7  ;;  %v2855_v3 = vcombine.high %v2853_v7, %v2853_v7  ;;  %v2856_v9 = vcombine.high %v2217_v18, %v2217_v18  ;;  %v2863_v12 = vrot.slane %v2217_v18, %v11824_v36 }
 0x458   : > { %v3554_v16 = vcombine.low %v3546_v38, %v3553_v59  ;;  %v3556_v19 = vcombine.low %v2829_v57, %v2831_v21  ;;  %v3563_v17 = vrot.slane %v3555_v47, %v11824_v36  ;;  %v3572_v46 = vcombine.low %v2838_v11, %v2846_v4 }
 0x459   : > { %v2248_v62 = vpop.trf.xlu1  ;;  %v2870_v14 = vrot.slane %v2856_v9, %v11824_v36  ;;  %v2871_v34 = vcombine.high %v2863_v12, %v2863_v12  ;;  %v3589_v20 = vcombine.low %v2855_v3, %v2863_v12  ;;  %v2218_v22 = vpop.trf.xlu0  ;;  %v3587_v24 = vrot.slane %v3573_v58, %v11824_v36 }
 0x45a   : > { %v3580_v25 = vrot.slane %v3572_v46, %v11824_v36  ;;  %v2880_v26 = vcombine.high %v2248_v62, %v2248_v62  ;;  %v2887_v28 = vrot.slane %v2248_v62, %v11824_v36  ;;  %11033 = vmatmul.mubr.msk.f32.vlgmr.msra.gmra.mrb[6].mxu0 %vm327_vm0, %v3554_v16  ;;  %v3570_v29 = vrot.slane %v3556_v19, %v11824_v36 }
 0x45b   : > { %v3590_v13 = vcombine.low %v2871_v34, %v2870_v14  ;;  %11035 = vmatprep.mubr.msk.f32.mxu0 %vm11472_vm1, %v16347_v0  ;;  %v2872_v27 = vcombine.high %v2870_v14, %v2870_v14  ;;  %v2879_v23 = vrot.slane %v2218_v22, %v11824_v36  ;;  %v3597_v8 = vrot.slane %v3589_v20, %v11824_v36 }
 0x45c   : > { %v2894_v31 = vrot.slane %v2880_v26, %v11824_v36  ;;  %v2895_v32 = vcombine.high %v2887_v28, %v2887_v28  ;;  %v3571_v15 = vcombine.low %v3563_v17, %v3570_v29  ;;  %v3588_v39 = vcombine.low %v3580_v25, %v3587_v24 }
 0x45d   : > { %v2249_v33 = vpop.trf.xlu1  ;;  %v3606_v37 = vcombine.low %v2872_v27, %v2879_v23  ;;  %v2280_v40 = vpop.trf.xlu0  ;;  %v3604_v41 = vrot.slane %v3590_v13, %v11824_v36 }
 0x45e   : > { %v2896_v35 = vcombine.high %v2894_v31, %v2894_v31  ;;  %v3607_v42 = vcombine.low %v2887_v28, %v2895_v32  ;;  %v2897_v43 = vcombine.high %v2249_v33, %v2249_v33  ;;  %v2904_v44 = vrot.slane %v2249_v33, %v11824_v36  ;;  %11036 = vmatmul.mubr.msk.f32.gmra.mrb[8].mxu0 %vm327_vm0, %v3571_v15 }
 0x45f   : > { %11038 = vmatprep.mubr.msk.f32.mxu0 %vm11472_vm1, %v16347_v0  ;;  %v2921_v45 = vcombine.high %v2280_v40, %v2280_v40  ;;  %v3614_v51 = vrot.slane %v3606_v37, %v11824_v36  ;;  %v2928_v52 = vrot.slane %v2280_v40, %v11824_v36  ;;  %v3605_v60 = vcombine.low %v3597_v8, %v3604_v41 }
 0x460   : > { %v2911_v48 = vrot.slane %v2897_v43, %v11824_v36  ;;  %v2912_v50 = vcombine.high %v2904_v44, %v2904_v44  ;;  %v3621_v53 = vrot.slane %v3607_v42, %v11824_v36  ;;  %v3623_v54 = vcombine.low %v2894_v31, %v2896_v35 }
 0x461   : > { %v2250_v55 = vpop.trf.xlu1  ;;  %v2935_v56 = vrot.slane %v2921_v45, %v11824_v36  ;;  %v2281_v61 = vpop.trf.xlu0  ;;  %v2936_v5 = vcombine.high %v2928_v52, %v2928_v52 }
 0x462   : > { %v2913_v63 = vcombine.high %v2911_v48, %v2911_v48  ;;  %v3624_v1 = vcombine.low %v2904_v44, %v2912_v50  ;;  %v2920_v2 = vrot.slane %v2250_v55, %v11824_v36  ;;  %11039 = vmatmul.mubr.msk.f32.gmra.mrb[10].mxu0 %vm327_vm0, %v3588_v39  ;;  %v2938_v4 = vcombine.high %v2281_v61, %v2281_v61 }
 0x463   : > { %11041 = vmatprep.mubr.msk.f32.mxu0 %vm11472_vm1, %v16347_v0  ;;  %v2937_v57 = vcombine.high %v2935_v56, %v2935_v56  ;;  %v2945_v30 = vrot.slane %v2281_v61, %v11824_v36  ;;  %v3622_v10 = vcombine.low %v3614_v51, %v3621_v53  ;;  %v3631_v11 = vrot.slane %v3623_v54, %v11824_v36 }
 0x464   : > { %v3641_v38 = vcombine.low %v2920_v2, %v2928_v52  ;;  %v2952_v7 = vrot.slane %v2938_v4, %v11824_v36  ;;  %v3638_v59 = vrot.slane %v3624_v1, %v11824_v36  ;;  %v3640_v21 = vcombine.low %v2911_v48, %v2913_v63 }
 0x465   : > { %v2312_v6 = vpop.trf.xlu1  ;;  %v2282_v18 = vpop.trf.xlu0  ;;  %v3657_v58 = vcombine.low %v2936_v5, %v2935_v56  ;;  %v2953_v3 = vcombine.high %v2945_v30, %v2945_v30  ;;  %v3658_v9 = vcombine.low %v2937_v57, %v2945_v30 }
 0x466   : > { %v2962_v47 = vcombine.high %v2312_v6, %v2312_v6  ;;  %11042 = vmatmul.mubr.msk.f32.gmra.mrb[12].mxu0 %vm327_vm0, %v3605_v60  ;;  %v3655_v12 = vrot.slane %v3641_v38, %v11824_v36  ;;  %v2969_v16 = vrot.slane %v2312_v6, %v11824_v36  ;;  %v2954_v17 = vcombine.high %v2952_v7, %v2952_v7 }
 0x467   : > { %11044 = vmatprep.mubr.msk.f32.mxu0 %vm11472_vm1, %v16347_v0  ;;  %v2961_v46 = vrot.slane %v2282_v18, %v11824_v36  ;;  %v3639_v20 = vcombine.low %v3631_v11, %v3638_v59  ;;  %v3648_v22 = vrot.slane %v3640_v21, %v11824_v36  ;;  %v3672_v26 = vrot.slane %v3658_v9, %v11824_v36 }
 0x468   : > { %v2976_v14 = vrot.slane %v2962_v47, %v11824_v36  ;;  %v2977_v25 = vcombine.high %v2969_v16, %v2969_v16  ;;  %v3665_v27 = vrot.slane %v3657_v58, %v11824_v36  ;;  %v3674_v31 = vcombine.low %v2953_v3, %v2952_v7 }
 0x469   : > { %v2313_v19 = vpop.trf.xlu1  ;;  %v2344_v62 = vpop.trf.xlu0  ;;  %v3675_v32 = vcombine.low %v2954_v17, %v2961_v46  ;;  %v3656_v15 = vcombine.low %v3648_v22, %v3655_v12 }
 0x46a   : > { %v2979_v34 = vcombine.high %v2313_v19, %v2313_v19  ;;  %11045 = vmatmul.mubr.msk.f32.gmra.mrb[14].mxu0 %vm327_vm0, %v3622_v10  ;;  %v2986_v24 = vrot.slane %v2313_v19, %v11824_v36  ;;  %v2978_v23 = vcombine.high %v2976_v14, %v2976_v14  ;;  %v3003_v33 = vcombine.high %v2344_v62, %v2344_v62 }
 0x46b   : > { %11047 = vmatprep.mubr.msk.f32.mxu0 %vm11472_vm1, %v16347_v0  ;;  %v3010_v37 = vrot.slane %v2344_v62, %v11824_v36  ;;  %v3691_v39 = vcombine.low %v2969_v16, %v2977_v25  ;;  %v3673_v35 = vcombine.low %v3665_v27, %v3672_v26  ;;  %v3689_v44 = vrot.slane %v3675_v32, %v11824_v36 }
 0x46c   : > { %v2993_v28 = vrot.slane %v2979_v34, %v11824_v36  ;;  %v2994_v8 = vcombine.high %v2986_v24, %v2986_v24  ;;  %v3692_v43 = vcombine.low %v2976_v14, %v2978_v23  ;;  %v3682_v48 = vrot.slane %v3674_v31, %v11824_v36 }
 0x46d   : > { %v2314_v29 = vpop.trf.xlu1  ;;  %v2345_v13 = vpop.trf.xlu0  ;;  %v3017_v51 = vrot.slane %v3003_v33, %v11824_v36  ;;  %v3018_v52 = vcombine.high %v3010_v37, %v3010_v37  ;;  %v3699_v55 = vrot.slane %v3691_v39, %v11824_v36 }
 0x46e   : > { %11048 = vmatmul.mubr.msk.f32.gmra.mrb[16].mxu0 %vm327_vm0, %v3639_v20  ;;  %v2995_v40 = vcombine.high %v2993_v28, %v2993_v28  ;;  %v3020_v45 = vcombine.high %v2345_v13, %v2345_v13  ;;  %v3708_v50 = vcombine.low %v2986_v24, %v2994_v8  ;;  %v3027_v54 = vrot.slane %v2345_v13, %v11824_v36 }
 0x46f   : > { %11050 = vmatprep.mubr.msk.f32.mxu0 %vm11472_vm1, %v16347_v0  ;;  %v3002_v60 = vrot.slane %v2314_v29, %v11824_v36  ;;  %v3690_v4 = vcombine.low %v3682_v48, %v3689_v44  ;;  %v3706_v5 = vrot.slane %v3692_v43, %v11824_v36  ;;  %v3726_v30 = vcombine.low %v3018_v52, %v3017_v51 }
 0x470   : > { %v3709_v56 = vcombine.low %v2993_v28, %v2995_v40  ;;  %v3034_v2 = vrot.slane %v3020_v45, %v11824_v36  ;;  %v3716_v57 = vrot.slane %v3708_v50, %v11824_v36  ;;  %v3019_v38 = vcombine.high %v3017_v51, %v3017_v51 }
 0x471   : > { %v2376_v41 = vpop.trf.xlu1  ;;  %v2346_v42 = vpop.trf.xlu0  ;;  %v3035_v7 = vcombine.high %v3027_v54, %v3027_v54  ;;  %v3725_v59 = vcombine.low %v3002_v60, %v3010_v37  ;;  %v3707_v16 = vcombine.low %v3699_v55, %v3706_v5  ;;  %v3740_v14 = vrot.slane %v3726_v30, %v11824_v36 }
 0x472   : > { %11051 = vmatmul.mubr.msk.f32.gmra.mrb[18].mxu0 %vm327_vm0, %v3656_v15  ;;  %v3051_v53 = vrot.slane %v2376_v41, %v11824_v36  ;;  %v3044_v1 = vcombine.high %v2376_v41, %v2376_v41  ;;  %v3036_v10 = vcombine.high %v3034_v2, %v3034_v2  ;;  %v3043_v18 = vrot.slane %v2346_v42, %v11824_v36 }
 0x473   : > { %11053 = vmatprep.mubr.msk.f32.mxu0 %vm11472_vm1, %v16347_v0  ;;  %v3723_v3 = vrot.slane %v3709_v56, %v11824_v36  ;;  %v3742_v19 = vcombine.low %v3019_v38, %v3027_v54  ;;  %v3743_v46 = vcombine.low %v3035_v7, %v3034_v2  ;;  %v3733_v34 = vrot.slane %v3725_v59, %v11824_v36 }
 0x474   : > { %v3059_v6 = vcombine.high %v3051_v53, %v3051_v53  ;;  %v3058_v9 = vrot.slane %v3044_v1, %v11824_v36  ;;  %v3759_v62 = vcombine.low %v3036_v10, %v3043_v18 }
 0x475   : > { %v2377_v61 = vpop.trf.xlu1  ;;  %v2408_v63 = vpop.trf.xlu0  ;;  %v3724_v25 = vcombine.low %v3716_v57, %v3723_v3  ;;  %v3750_v23 = vrot.slane %v3742_v19, %v11824_v36  ;;  %v3757_v8 = vrot.slane %v3743_v46, %v11824_v36  ;;  %v3741_v45 = vcombine.low %v3733_v34, %v3740_v14 }
 0x476   : > { %11054 = vmatmul.mubr.msk.f32.gmra.mrb[20].mxu0 %vm327_vm0, %v3673_v35  ;;  %v3068_v21 = vrot.slane %v2377_v61, %v11824_v36  ;;  %v3085_v11 = vcombine.high %v2408_v63, %v2408_v63  ;;  %v3061_v12 = vcombine.high %v2377_v61, %v2377_v61  ;;  %v3760_v17 = vcombine.low %v3051_v53, %v3059_v6 }
 0x477   : > { %11056 = vmatprep.mubr.msk.f32.mxu0 %vm11472_vm1, %v16347_v0  ;;  %v3060_v28 = vcombine.high %v3058_v9, %v3058_v9  ;;  %v3092_v13 = vrot.slane %v2408_v63, %v11824_v36  ;;  %v3767_v32 = vrot.slane %v3759_v62, %v11824_v36  ;;  %v3758_v52 = vcombine.low %v3750_v23, %v3757_v8 }
 0x478   : > { %v3076_v20 = vcombine.high %v3068_v21, %v3068_v21  ;;  %v3099_v22 = vrot.slane %v3085_v11, %v11824_v36  ;;  %v3075_v29 = vrot.slane %v3061_v12, %v11824_v36  ;;  %v3774_v31 = vrot.slane %v3760_v17, %v11824_v36 }
 0x479   : > { %v2378_v47 = vpop.trf.xlu1  ;;  %v2409_v58 = vpop.trf.xlu0  ;;  %v3100_v15 = vcombine.high %v3092_v13, %v3092_v13  ;;  %v3776_v42 = vcombine.low %v3058_v9, %v3060_v28 }
 0x47a   : > { %11057 = vmatmul.mubr.msk.f32.gmra.mrb[22].mxu0 %vm327_vm0, %v3690_v4  ;;  %v3102_v27 = vcombine.high %v2409_v58, %v2409_v58  ;;  %v3777_v33 = vcombine.low %v3068_v21, %v3076_v20  ;;  %v3084_v37 = vrot.slane %v2378_v47, %v11824_v36  ;;  %v3101_v39 = vcombine.high %v3099_v22, %v3099_v22 }
 0x47b   : > { %11059 = vmatprep.mubr.msk.f32.mxu0 %vm11472_vm1, %v16347_v0  ;;  %v3109_v40 = vrot.slane %v2409_v58, %v11824_v36  ;;  %v3077_v43 = vcombine.high %v3075_v29, %v3075_v29  ;;  %v12137_v50 = vcombine.low %v3100_v15, %v3099_v22  ;;  %v3775_v53 = vcombine.low %v3767_v32, %v3774_v31 }
 0x47c   : > { %v3116_v44 = vrot.slane %v3102_v27, %v11824_v36  ;;  %v3791_v54 = vrot.slane %v3777_v33, %v11824_v36  ;;  %v12140_v55 = vcombine.low %v3084_v37, %v3092_v13  ;;  %v3784_v5 = vrot.slane %v3776_v42, %v11824_v36 }
 0x47d   : > { %v2440_v24 = vpop.trf.xlu1  ;;  %v12120_v26 = vpop.trf.xlu0  ;;  %v3117_v56 = vcombine.high %v3109_v40, %v3109_v40  ;;  %v12142_v60 = vcombine.low %v3101_v39, %v3109_v40  ;;  %v12144_v1 = vcombine.low %v3075_v29, %v3077_v43  ;;  %v3818_v59 = vrot.slane %v12137_v50, %v11824_v36 }
 0x47e   : > { %11060 = vmatmul.mubr.msk.f32.gmra.mrb[24].mxu0 %vm327_vm0, %v3707_v16  ;;  %v3126_v48 = vcombine.high %v2440_v24, %v2440_v24  ;;  %v3133_v2 = vrot.slane %v2440_v24, %v11824_v36  ;;  %v3118_v4 = vcombine.high %v3116_v44, %v3116_v44  ;;  %v3125_v38 = vrot.slane %v12120_v26, %v11824_v36 }
 0x47f   : > { %11062 = vmatprep.mubr.msk.f32.mxu0 %vm11472_vm1, %v16347_v0  ;;  %v3808_v21 = vrot.slane %v12140_v55, %v11824_v36  ;;  %v3825_v47 = vrot.slane %v12142_v60, %v11824_v36  ;;  %v12163_v11 = vcombine.low %v3117_v56, %v3116_v44  ;;  %v3792_v19 = vcombine.low %v3784_v5, %v3791_v54 }
 0x480   : > { %v3140_v57 = vrot.slane %v3126_v48, %v11824_v36  ;;  %v3141_v12 = vcombine.high %v3133_v2, %v3133_v2  ;;  %v3801_v17 = vrot.slane %v12144_v1, %v11824_v36  ;;  %v3828_v14 = vcombine.low %v3118_v4, %v3125_v38 }
 0x481   : > { %v2441_v41 = vpop.trf.xlu1  ;;  %v2472_v35 = vpop.trf.xlu0  ;;  %v3835_v23 = vrot.slane %v12163_v11, %v11824_v36 }
 0x482   : > { %11063 = vmatmul.mubr.msk.f32.gmra.mrb[26].mxu0 %vm327_vm0, %v3724_v25  ;;  %v3143_v51 = vcombine.high %v2441_v41, %v2441_v41  ;;  %v3150_v30 = vrot.slane %v2441_v41, %v11824_v36  ;;  %v3167_v6 = vcombine.high %v2472_v35, %v2472_v35  ;;  %v3174_v10 = vrot.slane %v2472_v35, %v11824_v36 }
 0x483   : > { %11065 = vmatprep.mubr.msk.f32.mxu0 %vm11472_vm1, %v16347_v0  ;;  %v3142_v46 = vcombine.high %v3140_v57, %v3140_v57  ;;  %v3844_v31 = vcombine.low %v3133_v2, %v3141_v12  ;;  %v3842_v35 = vrot.slane %v3828_v14, %v11824_v36  ;;  %v3826_v12 = vcombine.low %v3818_v59, %v3825_v47 }
 0x484   : > { %v3157_v7 = vrot.slane %v3143_v51, %v11824_v36  ;;  %v3158_v62 = vcombine.high %v3150_v30, %v3150_v30  ;;  %v3181_v34 = vrot.slane %v3167_v6, %v11824_v36  ;;  %v3182_v24 = vcombine.high %v3174_v10, %v3174_v10 }
 0x485   : > { %v2442_v61 = vpop.trf.xlu1  ;;  %v2473_v63 = vpop.trf.xlu0  ;;  %v3845_v33 = vcombine.low %v3140_v57, %v3142_v46  ;;  %v3852_v54 = vrot.slane %v3844_v31, %v11824_v36 }
 0x486   : > { %11066 = vmatmul.mubr.msk.f32.gmra.mrb[28].mxu0 %vm327_vm0, %v3741_v45  ;;  %v3184_v18 = vcombine.high %v2473_v63, %v2473_v63  ;;  %v3191_v3 = vrot.slane %v2473_v63, %v11824_v36  ;;  %v3159_v20 = vcombine.high %v3157_v7, %v3157_v7  ;;  %v3166_v22 = vrot.slane %v2442_v61, %v11824_v36 }
 0x487   : > { %11068 = vmatprep.mubr.msk.f32.mxu0 %vm11472_vm1, %v16347_v0  ;;  %v3183_v28 = vcombine.high %v3181_v34, %v3181_v34  ;;  %v3861_v37 = vcombine.low %v3150_v30, %v3158_v62  ;;  %v3879_v43 = vcombine.low %v3182_v24, %v3181_v34  ;;  %v3809_v61 = vcombine.low %v3801_v17, %v3808_v21 }
 0x488   : > { %v3198_v25 = vrot.slane %v3184_v18, %v11824_v36  ;;  %v3199_v29 = vcombine.high %v3191_v3, %v3191_v3  ;;  %v3862_v41 = vcombine.low %v3157_v7, %v3159_v20  ;;  %v3878_v42 = vcombine.low %v3166_v22, %v3174_v10 }
 0x489   : > { %v2504_v58 = vpop.trf.xlu1  ;;  %v2474_v9 = vpop.trf.xlu0  ;;  %v3895_v45 = vcombine.low %v3183_v28, %v3191_v3  ;;  %v3869_v63 = vrot.slane %v3861_v37, %v11824_v36  ;;  %v3859_v4 = vrot.slane %v3845_v33, %v11824_v36  ;;  %v3893_v38 = vrot.slane %v3879_v43, %v11824_v36 }
 0x48a   : > { %v3215_v16 = vrot.slane %v2504_v58, %v11824_v36  ;;  %11069 = vmatmul.mubr.msk.f32.gmra.mrb[30].mxu0 %vm327_vm0, %v3758_v52  ;;  %v3208_v26 = vcombine.high %v2504_v58, %v2504_v58  ;;  %v3200_v15 = vcombine.high %v3198_v25, %v3198_v25  ;;  %v3207_v8 = vrot.slane %v2474_v9, %v11824_v36 }
 0x48b   : > { %11071 = vmatprep.mubr.msk.f32.mxu0 %vm11472_vm1, %v16347_v0  ;;  %v3896_v48 = vcombine.low %v3199_v29, %v3198_v25  ;;  %v3886_v5 = vrot.slane %v3878_v42, %v11824_v36  ;;  %v3876_v30 = vrot.slane %v3862_v41, %v11824_v36  ;;  %v3903_v7 = vrot.slane %v3895_v45, %v11824_v36 }
 0x48c   : > { %v3223_v32 = vcombine.high %v3215_v16, %v3215_v16  ;;  %v3222_v44 = vrot.slane %v3208_v26, %v11824_v36  ;;  %v3912_v56 = vcombine.low %v3200_v15, %v3207_v8  ;;  %v3843_v17 = vcombine.low %v3835_v23, %v3842_v35 }
 0x48d   : > { %v2505_v13 = vpop.trf.xlu1  ;;  %v2536_v27 = vpop.trf.xlu0  ;;  %v3910_v11 = vrot.slane %v3896_v48, %v11824_v36  ;;  %v3860_v46 = vcombine.low %v3852_v54, %v3859_v4  ;;  %v12216_v34 = vcombine.low %v3869_v63, %v3876_v30  ;;  %v12218_v20 = vcombine.low %v3886_v5, %v3893_v38 }
 0x48e   : > { %11072 = vmatmul.mubr.msk.f32.gmra.mrb[32].mxu0 %vm327_vm0, %v3775_v53  ;;  %v3225_v39 = vcombine.high %v2505_v13, %v2505_v13  ;;  %v3232_v40 = vrot.slane %v2505_v13, %v11824_v36  ;;  %v3249_v52 = vcombine.high %v2536_v27, %v2536_v27  ;;  %v3913_v55 = vcombine.low %v3215_v16, %v3223_v32 }
 0x48f   : > { %11074 = vmatprep.mubr.msk.f32.mxu0 %vm11472_vm1, %v16347_v0  ;;  %v3256_v57 = vrot.slane %v2536_v27, %v11824_v36  ;;  %v3224_v6 = vcombine.high %v3222_v44, %v3222_v44  ;;  %v3920_v3 = vrot.slane %v3912_v56, %v11824_v36  ;;  %v12225_v24 = vcombine.low %v3903_v7, %v3910_v11 }
 0x490   : > { %v3239_v1 = vrot.slane %v3225_v39, %v11824_v36  ;;  %v3240_v2 = vcombine.high %v3232_v40, %v3232_v40  ;;  %v3263_v10 = vrot.slane %v3249_v52, %v11824_v36  ;;  %v3927_v58 = vrot.slane %v3913_v55, %v11824_v36 }
 0x491   : > { %v2506_v51 = vpop.trf.xlu1  ;;  %v2537_v53 = vpop.trf.xlu0  ;;  %v3264_v9 = vcombine.high %v3256_v57, %v3256_v57  ;;  %v12220_v60 = vcombine.low %v3222_v44, %v3224_v6 }
 0x492   : > { %11075 = vmatmul.mubr.msk.f32.gmra.mrb[34].mxu0 %vm327_vm0, %v3792_v19  ;;  %v3241_v16 = vcombine.high %v3239_v1, %v3239_v1  ;;  %v12211_v19 = vcombine.low %v3232_v40, %v3240_v2  ;;  %v3248_v62 = vrot.slane %v2506_v51, %v11824_v36  ;;  %v3266_v14 = vcombine.high %v2537_v53, %v2537_v53 }
 0x493   : > { %11077 = vmatprep.mubr.msk.f32.mxu0 %vm11472_vm1, %v16347_v0  ;;  %v3265_v22 = vcombine.high %v3263_v10, %v3263_v10  ;;  %v12223_v50 = vrot.slane %v2537_v53, %v11824_v36  ;;  %v12227_v25 = vcombine.low %v3264_v9, %v3263_v10  ;;  %v12231_v29 = vcombine.low %v3920_v3, %v3927_v58 }
 0x494   : > { %v3944_v13 = vrot.slane %v12211_v19, %v11824_v36  ;;  %v12235_v27 = vcombine.low %v3239_v1, %v3241_v16  ;;  %v12240_v32 = vcombine.low %v3248_v62, %v3256_v57  ;;  %v12243_v15 = vrot.slane %v3266_v14, %v11824_v36 }
 0x495   : > { %v12197_v18 = vpop.trf.xlu1  ;;  %v12199_v21 = vpop.trf.xlu0  ;;  %v3281_v37 = vcombine.high %v12223_v50, %v12223_v50  ;;  %v12249_v39 = vcombine.low %v3265_v22, %v12223_v50  ;;  %v3937_v54 = vrot.slane %v12220_v60, %v11824_v36  ;;  %v3971_v30 = vrot.slane %v12227_v25, %v11824_v36 }
 0x496   : > { %11078 = vmatmul.mubr.msk.f32.gmra.mrb[36].mxu0 %vm327_vm0, %v3809_v61  ;;  %v3961_v11 = vrot.slane %v12240_v32, %v11824_v36 }
 0x497   : > { %11080 = vmatprep.mubr.msk.f32.mxu0 %vm11472_vm1, %v16347_v0 }
 0x499   : > { %v2569_v59 = vpop.trf.xlu1  ;;  %v2600_v47 = vpop.trf.xlu0 }
 0x49a   : > { %v3307_v26 = vcombine.high %v2569_v59, %v2569_v59  ;;  %v3314_v28 = vrot.slane %v2569_v59, %v11824_v36  ;;  %11081 = vmatmul.mubr.msk.f32.gmra.mrb[38].mxu0 %vm327_vm0, %v3826_v12  ;;  %v3331_v23 = vcombine.high %v2600_v47, %v2600_v47  ;;  %v3338_v31 = vrot.slane %v2600_v47, %v11824_v36 }
 0x49b   : > { %11083 = vmatprep.mubr.msk.f32.mxu0 %vm11472_vm1, %v16347_v0  ;;  %v3290_v12 = vcombine.high %v12197_v18, %v12197_v18 }
 0x49c   : > { %v3321_v8 = vrot.slane %v3307_v26, %v11824_v36  ;;  %v3322_v33 = vcombine.high %v3314_v28, %v3314_v28  ;;  %v3345_v40 = vrot.slane %v3331_v23, %v11824_v36  ;;  %v3346_v41 = vcombine.high %v3338_v31, %v3338_v31 }
 0x49d   : > { %v2570_v35 = vpop.trf.xlu1  ;;  %v2601_v42 = vpop.trf.xlu0 }
 0x49e   : > { %v3323_v43 = vcombine.high %v3321_v8, %v3321_v8  ;;  %v4014_v44 = vcombine.low %v3314_v28, %v3322_v33  ;;  %11084 = vmatmul.mubr.msk.f32.gmra.mrb[40].mxu0 %vm327_vm0, %v3843_v17  ;;  %v3330_v45 = vrot.slane %v2570_v35, %v11824_v36  ;;  %v3348_v48 = vcombine.high %v2601_v42, %v2601_v42 }
 0x49f   : > { %v4032_v51 = vcombine.low %v3346_v41, %v3345_v40  ;;  %11086 = vmatprep.mubr.msk.f32.mxu0 %vm11472_vm1, %v16347_v0  ;;  %v3347_v52 = vcombine.high %v3345_v40, %v3345_v40  ;;  %v3355_v53 = vrot.slane %v2601_v42, %v11824_v36  ;;  %v3282_v33 = vcombine.high %v12243_v15, %v12243_v15 }
 0x4a0   : > { %v4015_v55 = vcombine.low %v3321_v8, %v3323_v43  ;;  %v4022_v56 = vrot.slane %v4014_v44, %v11824_v36  ;;  %v4031_v61 = vcombine.low %v3330_v45, %v3338_v31  ;;  %v3362_v63 = vrot.slane %v3348_v48, %v11824_v36 }
 0x4a1   : > { %v3363_v1 = vcombine.high %v3355_v53, %v3355_v53  ;;  %v4048_v2 = vcombine.low %v3347_v52, %v3355_v53  ;;  %v2632_v4 = vpop.trf.xlu1  ;;  %v2602_v5 = vpop.trf.xlu0  ;;  %v4046_v57 = vrot.slane %v4032_v51, %v11824_v36  ;;  %v12283_v8 = vrot.slane %v12197_v18, %v11824_v36 }
 0x4a2   : > { %v4029_v38 = vrot.slane %v4015_v55, %v11824_v36  ;;  %v4039_v6 = vrot.slane %v4031_v61, %v11824_v36  ;;  %11087 = vmatmul.mubr.msk.f32.gmra.mrb[42].mxu0 %vm327_vm0, %v3860_v46  ;;  %v3372_v7 = vcombine.high %v2632_v4, %v2632_v4  ;;  %v3379_v10 = vrot.slane %v2632_v4, %v11824_v36 }
 0x4a3   : > { %v4049_v58 = vcombine.low %v3363_v1, %v3362_v63  ;;  %11089 = vmatprep.mubr.msk.f32.mxu0 %vm11472_vm1, %v16347_v0  ;;  %v3364_v3 = vcombine.high %v3362_v63, %v3362_v63  ;;  %v3371_v9 = vrot.slane %v2602_v5, %v11824_v36  ;;  %v4056_v62 = vrot.slane %v4048_v2, %v11824_v36 }
 0x4a4   : > { %v4030_v16 = vcombine.low %v4022_v56, %v4029_v38  ;;  %v3386_v17 = vrot.slane %v3372_v7, %v11824_v36  ;;  %v3387_v46 = vcombine.high %v3379_v10, %v3379_v10  ;;  %v4047_v22 = vcombine.low %v4039_v6, %v4046_v57 }
 0x4a5   : > { %v4065_v14 = vcombine.low %v3364_v3, %v3371_v9  ;;  %v2633_v59 = vpop.trf.xlu1  ;;  %v4063_v47 = vrot.slane %v4049_v58, %v11824_v36  ;;  %v2664_v26 = vpop.trf.xlu0  ;;  %v3978_v56 = vrot.slane %v12249_v39, %v11824_v36  ;;  %v12307_v61 = vcombine.low %v3281_v37, %v12243_v15 }
 0x4a6   : > { %11090 = vmatmul.mubr.msk.f32.gmra.mrb[44].mxu0 %vm327_vm0, %v12216_v34  ;;  %11117 = vmatmul.mubr.msk.f32.vlgmr.msra.gmra.mrb[36].mxu1 %vm327_vm0, %v4030_v16  ;;  %v3388_v28 = vcombine.high %v3386_v17, %v3386_v17  ;;  %v4066_v23 = vcombine.low %v3379_v10, %v3387_v46  ;;  %v3389_v31 = vcombine.high %v2633_v59, %v2633_v59 }
 0x4a7   : > { %11092 = vmatprep.mubr.msk.f32.mxu0 %vm11472_vm1, %v16347_v0  ;;  %11119 = vmatprep.mubr.msk.f32.mxu1 %vm11472_vm1, %v16347_v0  ;;  %v3396_v34 = vrot.slane %v2633_v59, %v11824_v36  ;;  %v4073_v41 = vrot.slane %v4065_v14, %v11824_v36  ;;  %v3413_v42 = vcombine.high %v2664_v26, %v2664_v26 }
 0x4a8   : > { %v4080_v40 = vrot.slane %v4066_v23, %v11824_v36  ;;  %v3403_v35 = vrot.slane %v3389_v31, %v11824_v36  ;;  %v4082_v18 = vcombine.low %v3386_v17, %v3388_v28  ;;  %v4064_v44 = vcombine.low %v4056_v62, %v4063_v47 }
 0x4a9   : > { %v3404_v43 = vcombine.high %v3396_v34, %v3396_v34  ;;  %v2634_v45 = vpop.trf.xlu1  ;;  %v3420_v48 = vrot.slane %v2664_v26, %v11824_v36  ;;  %v2665_v51 = vpop.trf.xlu0  ;;  %v3427_v55 = vrot.slane %v3413_v42, %v11824_v36  ;;  %v3304_v10 = vrot.slane %v3290_v12, %v11824_v36 }
 0x4aa   : > { %11093 = vmatmul.mubr.msk.f32.gmra.mrb[46].mxu0 %vm327_vm0, %v12218_v20  ;;  %11120 = vmatmul.mubr.msk.f32.gmra.mrb[38].mxu1 %vm327_vm0, %v4047_v22  ;;  %v3405_v52 = vcombine.high %v3403_v35, %v3403_v35  ;;  %v3412_v53 = vrot.slane %v2634_v45, %v11824_v36  ;;  %v4081_v2 = vcombine.low %v4073_v41, %v4080_v40 }
 0x4ab   : > { %v4083_v63 = vcombine.low %v3396_v34, %v3404_v43  ;;  %11095 = vmatprep.mubr.msk.f32.mxu0 %vm11472_vm1, %v16347_v0  ;;  %11122 = vmatprep.mubr.msk.f32.mxu1 %vm11472_vm1, %v16347_v0  ;;  %v3428_v1 = vcombine.high %v3420_v48, %v3420_v48  ;;  %v3430_v4 = vcombine.high %v2665_v51, %v2665_v51 }
 0x4ac   : > { %v4099_v20 = vcombine.low %v3403_v35, %v3405_v52  ;;  %v4100_v39 = vcombine.low %v3412_v53, %v3420_v48  ;;  %v3429_v57 = vcombine.high %v3427_v55, %v3427_v55  ;;  %v3437_v38 = vrot.slane %v2665_v51, %v11824_v36 }
 0x4ad   : > { %v4097_v5 = vrot.slane %v4083_v63, %v11824_v36  ;;  %v2696_v50 = vpop.trf.xlu1  ;;  %v3444_v15 = vrot.slane %v3430_v4, %v11824_v36  ;;  %v4090_v37 = vrot.slane %v4082_v18, %v11824_v36  ;;  %v2666_v7 = vpop.trf.xlu0  ;;  %v3289_v58 = vrot.slane %v12199_v21, %v11824_v36 }
 0x4ae   : > { %11096 = vmatmul.mubr.msk.f32.gmra.mrb[48].mxu0 %vm327_vm0, %v12225_v24  ;;  %11123 = vmatmul.mubr.msk.f32.gmra.mrb[40].mxu1 %vm327_vm0, %v4064_v44  ;;  %v3454_v6 = vcombine.high %v2696_v50, %v2696_v50  ;;  %v3945_v24 = vcombine.low %v3937_v54, %v3944_v13  ;;  %v4116_v3 = vcombine.low %v3428_v1, %v3427_v55 }
 0x4af   : > { %11098 = vmatprep.mubr.msk.f32.mxu0 %vm11472_vm1, %v16347_v0  ;;  %11125 = vmatprep.mubr.msk.f32.mxu1 %vm11472_vm1, %v16347_v0  ;;  %v3461_v9 = vrot.slane %v2696_v50, %v11824_v36  ;;  %v3954_v21 = vrot.slane %v12235_v27, %v11824_v36  ;;  %v3445_v16 = vcombine.high %v3437_v38, %v3437_v38 }
 0x4b0   : > { %v3468_v12 = vrot.slane %v3454_v6, %v11824_v36  ;;  %v4117_v17 = vcombine.low %v3429_v57, %v3437_v38  ;;  %v3446_v46 = vcombine.high %v3444_v15, %v3444_v15  ;;  %v3453_v62 = vrot.slane %v2666_v7, %v11824_v36 }
 0x4b1   : > { %v2697_v14 = vpop.trf.xlu1  ;;  %v4114_v19 = vrot.slane %v4100_v39, %v11824_v36  ;;  %v4098_v60 = vcombine.low %v4090_v37, %v4097_v5  ;;  %v4107_v13 = vrot.slane %v4099_v20, %v11824_v36  ;;  %v3305_v54 = vcombine.high %v12283_v8, %v12283_v8  ;;  %v2728_v35 = vpop.trf.xlu0 }
 0x4b2   : > { %11099 = vmatmul.mubr.msk.f32.gmra.mrb[50].mxu0 %vm327_vm0, %v12231_v29  ;;  %11126 = vmatmul.mubr.msk.f32.gmra.mrb[42].mxu1 %vm327_vm0, %v4081_v2  ;;  %v3981_v27 = vcombine.low %v3282_v33, %v3289_v58  ;;  %v3471_v22 = vcombine.high %v2697_v14, %v2697_v14  ;;  %v3306_v59 = vcombine.high %v3304_v10, %v3304_v10 }
 0x4b3   : > { %11101 = vmatprep.mubr.msk.f32.mxu0 %vm11472_vm1, %v16347_v0  ;;  %11128 = vmatprep.mubr.msk.f32.mxu1 %vm11472_vm1, %v16347_v0  ;;  %v3469_v47 = vcombine.high %v3461_v9, %v3461_v9  ;;  %v3470_v26 = vcombine.high %v3468_v12, %v3468_v12  ;;  %v3962_v29 = vcombine.low %v3954_v21, %v3961_v11 }
 0x4b4   : > { %v4131_v28 = vrot.slane %v4117_v17, %v11824_v36  ;;  %v4133_v23 = vcombine.low %v3445_v16, %v3444_v15  ;;  %v4134_v31 = vcombine.low %v3446_v46, %v3453_v62  ;;  %v3478_v33 = vrot.slane %v2697_v14, %v11824_v36 }
 0x4b5   : > { %v4115_v34 = vcombine.low %v4107_v13, %v4114_v19  ;;  %v3485_v40 = vrot.slane %v3471_v22, %v11824_v36  ;;  %v4124_v41 = vrot.slane %v4116_v3, %v11824_v36  ;;  %v3997_v42 = vcombine.low %v12283_v8, %v3305_v54  ;;  %v2698_v55 = vpop.trf.xlu1 }
 0x4b6   : > { %11102 = vmatmul.mubr.msk.f32.gmra.mrb[52].mxu0 %vm327_vm0, %v3945_v24  ;;  %11129 = vmatmul.mubr.msk.f32.gmra.mrb[44].mxu1 %vm327_vm0, %v4098_v60  ;;  %v3979_v32 = vcombine.low %v3971_v30, %v3978_v56  ;;  %v3988_v11 = vrot.slane %v12307_v61, %v11824_v36  ;;  %v3998_v18 = vcombine.low %v3304_v10, %v3306_v59 }
 0x4b7   : > { %11104 = vmatprep.mubr.msk.f32.mxu0 %vm11472_vm1, %v16347_v0  ;;  %11131 = vmatprep.mubr.msk.f32.mxu1 %vm11472_vm1, %v16347_v0  ;;  %v3995_v43 = vrot.slane %v3981_v27, %v11824_v36  ;;  %v4150_v44 = vcombine.low %v3461_v9, %v3469_v47  ;;  %v4151_v45 = vcombine.low %v3468_v12, %v3470_v26  ;;  %v2729_v12 = vpop.trf.xlu0 }
 0x4b8   : > { %v4148_v8 = vrot.slane %v4134_v31, %v11824_v36  ;;  %v3486_v48 = vcombine.high %v3478_v33, %v3478_v33  ;;  %v4141_v51 = vrot.slane %v4133_v23, %v11824_v36  ;;  %v3495_v52 = vcombine.high %v2728_v35, %v2728_v35 }
 0x4b9   : > { %v3487_v25 = vcombine.high %v3485_v40, %v3485_v40  ;;  %v4132_v30 = vcombine.low %v4124_v41, %v4131_v28  ;;  %v3502_v53 = vrot.slane %v2728_v35, %v11824_v36  ;;  %v4005_v56 = vrot.slane %v3997_v42, %v11824_v36 }
 0x4ba   : > { %11105 = vmatmul.mubr.msk.f32.gmra.mrb[54].mxu0 %vm327_vm0, %v3962_v29  ;;  %11132 = vmatmul.mubr.msk.f32.gmra.mrb[46].mxu1 %vm327_vm0, %v4115_v34  ;;  %v4158_v61 = vrot.slane %v4150_v44, %v11824_v36  ;;  %v3996_v63 = vcombine.low %v3988_v11, %v3995_v43  ;;  %v4012_v20 = vrot.slane %v3998_v18, %v11824_v36 }
 0x4bb   : > { %11107 = vmatprep.mubr.msk.f32.mxu0 %vm11472_vm1, %v16347_v0  ;;  %11134 = vmatprep.mubr.msk.f32.mxu1 %vm11472_vm1, %v16347_v0  ;;  %v4167_v1 = vcombine.low %v3478_v33, %v3486_v48  ;;  %v4149_v2 = vcombine.low %v4141_v51, %v4148_v8  ;;  %v3509_v4 = vrot.slane %v3495_v52, %v11824_v36  ;;  %v2730_v19 = vpop.trf.xlu0 }
 0x4bc   : > { %v3494_v5 = vrot.slane %v2698_v55, %v11824_v36  ;;  %v4168_v39 = vcombine.low %v3485_v40, %v3487_v25  ;;  %v3510_v57 = vcombine.high %v3502_v53, %v3502_v53  ;;  %v4165_v38 = vrot.slane %v4151_v45, %v11824_v36 }
 0x4bd   : > { %v4175_v50 = vrot.slane %v4167_v1, %v11824_v36  ;;  %v4013_v37 = vcombine.low %v4005_v56, %v4012_v20  ;;  %v3512_v21 = vcombine.high %v2729_v12, %v2729_v12  ;;  %v3519_v16 = vrot.slane %v2729_v12, %v11824_v36 }
 0x4be   : > { %11108 = vmatmul.mubr.msk.f32.gmra.mrb[56].mxu0 %vm327_vm0, %v3979_v32  ;;  %11135 = vmatmul.mubr.msk.f32.gmra.mrb[48].mxu1 %vm327_vm0, %v4132_v30  ;;  %v4184_v15 = vcombine.low %v3494_v5, %v3502_v53  ;;  %v4185_v6 = vcombine.low %v3510_v57, %v3509_v4  ;;  %v4166_v7 = vcombine.low %v4158_v61, %v4165_v38 }
 0x4bf   : > { %11110 = vmatprep.mubr.msk.f32.mxu0 %vm11472_vm1, %v16347_v0  ;;  %11137 = vmatprep.mubr.msk.f32.mxu1 %vm11472_vm1, %v16347_v0  ;;  %v4182_v10 = vrot.slane %v4168_v39, %v11824_v36  ;;  %v3511_v17 = vcombine.high %v3509_v4, %v3509_v4  ;;  %v3526_v46 = vrot.slane %v3512_v21, %v11824_v36 }
 0x4c0   : > { %v4192_v58 = vrot.slane %v4184_v15, %v11824_v36  ;;  %v4199_v3 = vrot.slane %v4185_v6, %v11824_v36  ;;  %v3527_v62 = vcombine.high %v3519_v16, %v3519_v16  ;;  %v3535_v27 = vrot.slane %v2730_v19, %v11824_v36 }
 0x4c1   : > { %v4183_v24 = vcombine.low %v4175_v50, %v4182_v10  ;;  %v4201_v14 = vcombine.low %v3511_v17, %v3519_v16  ;;  %v3528_v54 = vcombine.high %v3526_v46, %v3526_v46 }
 0x4c2   : > { %11111 = vmatmul.mubr.msk.f32.gmra.mrb[58].mxu0 %vm327_vm0, %v3996_v63  ;;  %11138 = vmatmul.mubr.msk.f32.gmra.mrb[50].mxu1 %vm327_vm0, %v4149_v2  ;;  %v4200_v9 = vcombine.low %v4192_v58, %v4199_v3  ;;  %v4202_v13 = vcombine.low %v3527_v62, %v3526_v46 }
 0x4c3   : > { %11113 = vmatprep.mubr.msk.f32.mxu0 %vm11472_vm1, %v16347_v0  ;;  %11140 = vmatprep.mubr.msk.f32.mxu1 %vm11472_vm1, %v16347_v0  ;;  %v4209_v26 = vrot.slane %v4201_v14, %v11824_v36  ;;  %v4218_v31 = vcombine.low %v3528_v54, %v3535_v27 }
 0x4c4   : > { %v4216_v33 = vrot.slane %v4202_v13, %v11824_v36 }
 0x4c5   : > { %v4225_v44 = vrot.slane %v4218_v31, %v11824_v36 }
 0x4c6   : > { %11114 = vmatmul.mubr.msk.f32.gmra.mrb[60].mxu0 %vm327_vm0, %v4013_v37  ;;  %11141 = vmatmul.mubr.msk.f32.gmra.mrb[52].mxu1 %vm327_vm0, %v4166_v7  ;;  %v4217_v42 = vcombine.low %v4209_v26, %v4216_v33 }
 0x4c7   : > { %11143 = vmatprep.mubr.msk.f32.mxu1 %vm11472_vm1, %v16347_v0 }
 0x4ca   : > { %11144 = vmatmul.mubr.msk.f32.gmra.mrb[54].mxu1 %vm327_vm0, %v4183_v24 }
 0x4cb   : > { %11146 = vmatprep.mubr.msk.f32.mxu1 %vm11472_vm1, %v16347_v0 }
 0x4ce   : > { %11147 = vmatmul.mubr.msk.f32.gmra.mrb[56].mxu1 %vm327_vm0, %v4200_v9 }
 0x4cf   : > { %11149 = vmatprep.mubr.msk.f32.mxu1 %vm11472_vm1, %v16347_v0 }
 0x4d2   : > { %11150 = vmatmul.mubr.msk.f32.gmra.mrb[58].mxu1 %vm327_vm0, %v4217_v42 }
 0x4d3   : > { %11152 = vmatprep.mubr.msk.f32.mxu1 %vm11472_vm1, %v16347_v0  ;;  %vm5933_vm1 = vcmask 662528  }
 0x4d6   : > { %11153 = vmatmul.mubr.msk.f32.gmra.mrb[60].mxu1 %vm327_vm0, %v4225_v44  ;;  %vm5930_vm0 = vcmask 588800  }
 0x52d   : > { %v4374_v60 = vpop.f32.mrb[6].mxu0 }
 0x52e   : > { %v4619_v22 = vcombine.high %v4374_v60, %v4374_v60  ;;  %v12414_v59 = vrot.slane %v4374_v60, %v11824_v36  ;;  %v11034_v47 = vpop.f32.mrb[7].mxu0 }
 0x530   : > { %v12418_v29 = vrot.slane %v4619_v22, %v11824_v36  ;;  %v12422_v28 = vcombine.high %v12414_v59, %v12414_v59  ;;  %5937 = vrot.lane.b32.xlu1 %v12414_v59, %s11473_s11 }
 0x531   : > { %v4379_v23 = vpop.f32.mrb[8].mxu0 }
 0x532   : > { %v4636_v34 = vcombine.high %v4379_v23, %v4379_v23  ;;  %v12429_v40 = vrot.slane %v4379_v23, %v11824_v36  ;;  %v11037_v41 = vpop.f32.mrb[9].mxu0  ;;  %5939 = vrot.lane.b32.xlu0 %v12422_v28, %s11473_s11  ;;  %v12442_v11 = vcombine.high %v12418_v29, %v12418_v29 }
 0x534   : > { %v4650_v32 = vrot.slane %v4636_v34, %v11824_v36  ;;  %5941 = vrot.lane.b32.xlu1 %v12418_v29, %s11473_s11  ;;  %v4651_v18 = vcombine.high %v12429_v40, %v12429_v40  ;;  %v10807_v25 = vrot.slane %v12429_v40, 9 }
 0x535   : > { %v4384_v43 = vpop.f32.mrb[10].mxu0 }
 0x536   : > { %v4652_v45 = vcombine.high %v4650_v32, %v4650_v32  ;;  %v4653_v8 = vcombine.high %v4384_v43, %v4384_v43  ;;  %v4660_v48 = vrot.slane %v4384_v43, %v11824_v36  ;;  %5943 = vrot.lane.b32.xlu0 %v12442_v11, %s11473_s11  ;;  %v11040_v51 = vpop.f32.mrb[11].mxu0  ;;  %v6617_v30 = vrot.slane %v4651_v18, 7 }
 0x537   : > { %v6620_v53 = vrot.slane %v4650_v32, 7 }
 0x538   : > { %v12461_v55 = vrot.slane %v4653_v8, %v11824_v36  ;;  %v12463_v56 = vcombine.high %v4660_v48, %v4660_v48  ;;  %5945 = vrot.lane.b32.xlu1 %v12429_v40, %s11473_s11  ;;  %v6623_v61 = vrot.slane %v4652_v45, 7  ;;  %v12469_v20 = vsel %vm12453_vm8, %v10807_v25, %v6617_v30 }
 0x539   : > { %v4389_v63 = vpop.f32.mrb[12].mxu0  ;;  %v6619_v57 = vrot.slane %v6617_v30, 2  ;;  %v6622_v50 = vrot.slane %v6620_v53, 2  ;;  %v6626_v6 = vrot.slane %v4660_v48, 7 }
 0x53a   : > { %v5432_v2 = vcombine.low %v12422_v28, %v12461_v55  ;;  %v4670_v4 = vcombine.high %v4389_v63, %v4389_v63  ;;  %v12477_v5 = vrot.slane %v4389_v63, %v11824_v36  ;;  %7322 = vrot.lane.b32.xlu0 %v12469_v20, %s11473_s11  ;;  %v11043_v39 = vpop.f32.mrb[13].mxu0  ;;  %v12483_v38 = vcombine.high %v12461_v55, %v12461_v55 }
 0x53b   : > { %v6625_v24 = vrot.slane %v6623_v61, 2  ;;  %v12503_v17 = vsel %vm12453_vm8, %v6619_v57, %v6620_v53  ;;  %v12513_v19 = vsel %vm12453_vm8, %v6622_v50, %v6623_v61  ;;  %v6628_v18 = vrot.slane %v6626_v6, 2 }
 0x53c   : > { %v4684_v15 = vrot.slane %v4670_v4, %v11824_v36  ;;  %v12488_v37 = vcombine.high %v12477_v5, %v12477_v5  ;;  %5949 = vrot.lane.b32.xlu1 %v12461_v55, %s11473_s11 }
 0x53d   : > { %v4394_v10 = vpop.f32.mrb[14].mxu0  ;;  %v12507_v46 = vsel %vm12453_vm8, %v6625_v24, %v6626_v6 }
 0x53e   : > { %v4686_v3 = vcombine.high %v4684_v15, %v4684_v15  ;;  %v6631_v12 = vrot.slane %v4684_v15, 7  ;;  %5947 = vrot.lane.b32.xlu0 %v12463_v56, %s11473_s11  ;;  %v11046_v21 = vpop.f32.mrb[15].mxu0  ;;  %v4694_v16 = vrot.slane %v4394_v10, %v11824_v36  ;;  %v4687_v60 = vcombine.high %v4394_v10, %v4394_v10 }
 0x53f   : > { %v10808_v22 = vrot.slane %v12488_v37, 9 }
 0x540   : > { %v6633_v62 = vrot.slane %v6631_v12, 2  ;;  %v6634_v14 = vrot.slane %v4686_v3, 7  ;;  %7324 = vrot.lane.b32.xlu1 %v12503_v17, %s11473_s11  ;;  %v4702_v13 = vcombine.high %v4694_v16, %v4694_v16  ;;  %v6637_v54 = vrot.slane %v4694_v16, 7 }
 0x541   : > { %v4399_v27 = vpop.f32.mrb[16].mxu0  ;;  %v12526_v34 = vsel %vm12453_vm8, %v10808_v22, %v6631_v12  ;;  %v12538_v43 = vrot.slane %v4687_v60, %v11824_v36 }
 0x542   : > { %7326 = vrot.lane.b32.xlu0 %v12513_v19, %s11473_s11  ;;  %v4704_v47 = vcombine.high %v4399_v27, %v4399_v27  ;;  %v11049_v26 = vpop.f32.mrb[17].mxu0  ;;  %v12520_v23 = vsel %vm12453_vm8, %v6633_v62, %v6634_v14  ;;  %v6639_v31 = vrot.slane %v6637_v54, 2  ;;  %v12522_v33 = vrot.slane %v4702_v13, 7 }
 0x543   : > { %v6826_v41 = vcombine.low %v12503_v17, %v12520_v23  ;;  %v6781_v42 = vcombine.low %v12469_v20, %v12526_v34  ;;  %v6636_v32 = vrot.slane %v6634_v14, 2  ;;  %v12547_v48 = vrot.slane %v4399_v27, %v11824_v36 }
 0x544   : > { %v12531_v35 = vrot.slane %v4704_v47, %v11824_v36  ;;  %5953 = vrot.lane.b32.xlu1 %v12477_v5, %s11473_s11  ;;  %v6642_v44 = vrot.slane %v12522_v33, 2  ;;  %v12544_v8 = vsel %vm12453_vm8, %v6639_v31, %v12522_v33  ;;  %v4703_v3 = vcombine.high %v12538_v43, %v12538_v43 }
 0x545   : > { %v4404_v45 = vpop.f32.mrb[18].mxu0  ;;  %v12554_v53 = vsel %vm12453_vm8, %v6636_v32, %v6637_v54  ;;  %v6916_v4 = vcombine.low %v12507_v46, %v12544_v8  ;;  %v12576_v21 = vcombine.high %v12547_v48, %v12547_v48  ;;  %v12585_v14 = vrot.slane %v5432_v2, %v11837_v49 }
 0x546   : > { %16578 = vst [vmem:[#allocation13_spill] sm:$0xff] %v12531_v35  ;;  %v4721_v51 = vcombine.high %v4404_v45, %v4404_v45  ;;  %v4728_v25 = vrot.slane %v4404_v45, %v11824_v36  ;;  %5951 = vrot.lane.b32.xlu0 %v12483_v38, %s11473_s11  ;;  %v11052_v30 = vpop.f32.mrb[19].mxu0  ;;  %v12558_v61 = vcombine.low %v6628_v18, %v6642_v44  ;;  %v10809_v32 = vrot.slane %v12531_v35, 9 }
 0x547   : > { %v6871_v63 = vcombine.low %v12513_v19, %v12554_v53  ;;  %v4720_v39 = vcombine.high %v12531_v35, %v12531_v35  ;;  %16580 = vst [vmem:[#allocation15_spill] sm:$0xff] %v12585_v14  ;;  %v12736_v58 = vrot.slane %v6916_v4, %v11837_v49 }
 0x548   : > { %16579 = vst [vmem:[#allocation14_spill] sm:$0xff] %v12558_v61  ;;  %v4735_v57 = vrot.slane %v4721_v51, %v11824_v36  ;;  %v4736_v50 = vcombine.high %v4728_v25, %v4728_v25  ;;  %7328 = vrot.lane.b32.xlu1 %v12507_v46, %s11473_s11  ;;  %v6648_v15 = vrot.slane %v4728_v25, 7 }
 0x549   : > { %v4409_v6 = vpop.f32.mrb[20].mxu0  ;;  %v6645_v10 = vrot.slane %v4720_v39, 7  ;;  %16589 = vst [vmem:[#allocation24_spill] sm:$0xff] %v12736_v58 }
 0x54a   : > { %v12569_v24 = vcombine.high %v4735_v57, %v4735_v57  ;;  %7330 = vrot.lane.b32.xlu0 %v6628_v18, %s11473_s11  ;;  %v11055_v12 = vpop.f32.mrb[21].mxu0  ;;  %v4738_v16 = vcombine.high %v4409_v6, %v4409_v6  ;;  %v12579_v17 = vrot.slane %v4409_v6, %v11824_v36  ;;  %v6651_v13 = vrot.slane %v4736_v50, 7 }
 0x54b   : > { %v6647_v62 = vrot.slane %v6645_v10, 2  ;;  %v6650_v55 = vrot.slane %v6648_v15, 2  ;;  %v6654_v12 = vrot.slane %v4735_v57, 7  ;;  %v12634_v57 = vsel %vm12453_vm8, %v10809_v32, %v6645_v10 }
 0x54c   : > { %7332 = vrot.lane.b32.xlu1 %v12526_v34, %s11473_s11  ;;  %v12592_v54 = vrot.slane %v4738_v16, %v11824_v36  ;;  %v12596_v27 = vcombine.high %v12579_v17, %v12579_v17  ;;  %v5441_v22 = vcombine.low %v4703_v3, %v12579_v17  ;;  %v6653_v6 = vrot.slane %v6651_v13, 2 }
 0x54d   : > { %v4414_v47 = vpop.f32.mrb[22].mxu0  ;;  %v12601_v28 = vsel %vm12453_vm8, %v6647_v62, %v6648_v15  ;;  %v12622_v15 = vrot.slane %v6826_v41, %v11837_v49  ;;  %v12638_v16 = vsel %vm12453_vm8, %v6650_v55, %v6651_v13  ;;  %v12653_v13 = vrot.slane %v6654_v12, 2 }
 0x54e   : > { %v4755_v2 = vcombine.high %v4414_v47, %v4414_v47  ;;  %v4762_v26 = vrot.slane %v4414_v47, %v11824_v36  ;;  %5955 = vrot.lane.b32.xlu0 %v12488_v37, %s11473_s11  ;;  %v11058_v31 = vpop.f32.mrb[23].mxu0  ;;  %v12609_v18 = vcombine.high %v12592_v54, %v12592_v54  ;;  %v12612_v45 = vrot.slane %v5441_v22, %v11837_v49 }
 0x54f   : > { %16583 = vst [vmem:[#allocation18_spill] sm:$0xff] %v12622_v15  ;;  %v12651_v32 = vsel %vm12453_vm8, %v6653_v6, %v6654_v12  ;;  %v12671_v12 = vrot.slane %v6781_v42, %v11837_v49 }
 0x550   : > { %16581 = vst [vmem:[#allocation16_spill] sm:$0xff] %v12609_v18  ;;  %16582 = vst [vmem:[#allocation17_spill] sm:$0xff] %v12612_v45  ;;  %v4769_v30 = vrot.slane %v4755_v2, %v11824_v36  ;;  %v4770_v39 = vcombine.high %v4762_v26, %v4762_v26  ;;  %v6659_v50 = vrot.slane %v4762_v26, 7  ;;  %5957 = vrot.lane.b32.xlu1 %v12538_v43, %s11473_s11  ;;  %v10810_v62 = vrot.slane %v12609_v18, 9 }
 0x551   : > { %v4419_v22 = vpop.f32.mrb[24].mxu0  ;;  %16584 = vst [vmem:[#allocation19_spill] sm:$0xff] %v12671_v12 }
 0x552   : > { %v4771_v2 = vcombine.high %v4769_v30, %v4769_v30  ;;  %v6661_v26 = vrot.slane %v6659_v50, 2  ;;  %v6662_v31 = vrot.slane %v4770_v39, 7  ;;  %7334 = vrot.lane.b32.xlu0 %v12520_v23, %s11473_s11  ;;  %v11061_v41 = vpop.f32.mrb[25].mxu0  ;;  %v6665_v0 = vrot.slane %v4769_v30, 7 }
 0x553   : > { %v4772_v39 = vcombine.high %v4419_v22, %v4419_v22  ;;  %v12657_v55 = vsel %vm12453_vm8, %v10810_v62, %v6659_v50 }
 0x554   : > { %v6664_v25 = vrot.slane %v6662_v31, 2  ;;  %v12641_v47 = vrot.slane %v4771_v2, 7  ;;  %5961 = vrot.lane.b32.xlu1 %v12547_v48, %s11473_s11  ;;  %v12647_v23 = vsel %vm12453_vm8, %v6661_v26, %v6662_v31  ;;  %v6667_v30 = vrot.slane %v6665_v0, 2 }
 0x555   : > { %v4424_v10 = vpop.f32.mrb[26].mxu0  ;;  %v12661_v2 = vrot.slane %v4419_v22, %v11824_v36  ;;  %v6790_v31 = vcombine.low %v12634_v57, %v12657_v55  ;;  %v6835_v6 = vcombine.low %v12601_v28, %v12647_v23  ;;  %v12686_v22 = vrot.slane %v4772_v39, %v11824_v36 }
 0x556   : > { %5959 = vrot.lane.b32.xlu0 %v4703_v3, %s11473_s11  ;;  %v4789_v41 = vcombine.high %v4424_v10, %v4424_v10  ;;  %v11064_v26 = vpop.f32.mrb[27].mxu0  ;;  %v12675_v3 = vsel %vm12453_vm8, %v6664_v25, %v6665_v0  ;;  %v12680_v50 = vsel %vm12453_vm8, %v6667_v30, %v12641_v47  ;;  %v16349_v62 = vrot.slane %v12641_v47, 2 }
 0x557   : > { %v12689_v20 = vrot.slane %v6790_v31, %v11837_v49  ;;  %v12692_v34 = vrot.slane %v6835_v6, %v11837_v49  ;;  %v6880_v0 = vcombine.low %v12638_v16, %v12675_v3  ;;  %v12697_v42 = vrot.slane %v4424_v10, %v11824_v36 }
 0x558   : > { %7336 = vrot.lane.b32.xlu1 %v12554_v53, %s11473_s11  ;;  %v12700_v25 = vrot.slane %v4789_v41, %v11824_v36  ;;  %v6925_v39 = vcombine.low %v12651_v32, %v12680_v50  ;;  %v12707_v26 = vcombine.low %v12653_v13, %v16349_v62  ;;  %v12713_v31 = vrot.slane %v6871_v63, %v11837_v49 }
 0x559   : > { %16585 = vst [vmem:[#allocation20_spill] sm:$0xff] %v12689_v20  ;;  %16586 = vst [vmem:[#allocation21_spill] sm:$0xff] %v12692_v34  ;;  %v4429_v30 = vpop.f32.mrb[28].mxu0  ;;  %v12719_v10 = vcombine.high %v12661_v2, %v12661_v2  ;;  %v12749_v9 = vcombine.high %v12686_v22, %v12686_v22 }
 0x55a   : > { %16587 = vst [vmem:[#allocation22_spill] sm:$0xff] %v12707_v26  ;;  %16588 = vst [vmem:[#allocation23_spill] sm:$0xff] %v12713_v31  ;;  %7338 = vrot.lane.b32.xlu0 %v12544_v8, %s11473_s11  ;;  %v4806_v41 = vcombine.high %v4429_v30, %v4429_v30  ;;  %v12722_v6 = vrot.slane %v4429_v30, %v11824_v36  ;;  %v11067_v51 = vpop.f32.mrb[29].mxu0  ;;  %v4805_v63 = vcombine.high %v12700_v25, %v12700_v25 }
 0x55b   : > { %v12754_v8 = vrot.slane %v6880_v0, %v11837_v49  ;;  %v12757_v4 = vrot.slane %v6925_v39, %v11837_v49 }
 0x55c   : > { %5965 = vrot.lane.b32.xlu1 %v12531_v35, %s11473_s11  ;;  %v12741_v51 = vrot.slane %v4806_v41, %v11824_v36  ;;  %v12745_v30 = vcombine.high %v12722_v6, %v12722_v6  ;;  %v4804_v41 = vcombine.high %v12697_v42, %v12697_v42 }
 0x55d   : > { %v4434_v46 = vpop.f32.mrb[30].mxu0  ;;  %16590 = vst [vmem:[#allocation25_spill] sm:$0xff] %v12754_v8  ;;  %16591 = vst [vmem:[#allocation26_spill] sm:$0xff] %v12757_v4  ;;  %v6679_v8 = vrot.slane %v4805_v63, 7 }
 0x55e   : > { %5963 = vrot.lane.b32.xlu0 %v12576_v21, %s11473_s11  ;;  %v4823_v7 = vcombine.high %v4434_v46, %v4434_v46  ;;  %v12768_v1 = vrot.slane %v4434_v46, %v11824_v36  ;;  %v11070_v0 = vpop.f32.mrb[31].mxu0  ;;  %v6673_v62 = vrot.slane %v4804_v41, 7 }
 0x55f   : > { %v6676_v0 = vrot.slane %v12700_v25, 7  ;;  %v10811_v25 = vrot.slane %v12697_v42, 9  ;;  %v6681_v60 = vrot.slane %v6679_v8, 2 }
 0x560   : > { %7340 = vrot.lane.b32.xlu1 %v6642_v44, %s11473_s11  ;;  %v4837_v53 = vrot.slane %v4823_v7, %v11824_v36  ;;  %v12782_v46 = vcombine.high %v12768_v1, %v12768_v1  ;;  %v6675_v34 = vrot.slane %v6673_v62, 2 }
 0x561   : > { %v4439_v19 = vpop.f32.mrb[32].mxu0  ;;  %v6678_v4 = vrot.slane %v6676_v0, 2 }
 0x562   : > { %7342 = vrot.lane.b32.xlu0 %v12634_v57, %s11473_s11  ;;  %v4839_v33 = vcombine.high %v4837_v53, %v4837_v53  ;;  %v6687_v44 = vrot.slane %v4837_v53, 7  ;;  %v11073_v31 = vpop.f32.mrb[33].mxu0  ;;  %v4840_v63 = vcombine.high %v4439_v19, %v4439_v19  ;;  %v12801_v57 = vcombine.high %v12741_v51, %v12741_v51 }
 0x563   : > { %v12807_v53 = vsel %vm12453_vm8, %v6675_v34, %v6676_v0  ;;  %v10812_v39 = vrot.slane %v12782_v46, 9  ;;  %v16592_v34 = vrot.slane %v12722_v6, 7 }
 0x564   : > { %v6689_v15 = vrot.slane %v6687_v44, 2  ;;  %v6690_v35 = vrot.slane %v4839_v33, 7  ;;  %5969 = vrot.lane.b32.xlu1 %v12579_v17, %s11473_s11  ;;  %v12810_v33 = vrot.slane %v4439_v19, %v11824_v36  ;;  %v12814_v17 = vsel %vm12453_vm8, %v10811_v25, %v6673_v62 }
 0x565   : > { %v12797_v41 = vpop.f32.mrb[34].mxu0  ;;  %v12832_v62 = vrot.slane %v4840_v63, %v11824_v36  ;;  %v12838_v0 = vsel %vm12453_vm8, %v10812_v39, %v6687_v44 }
 0x566   : > { %5967 = vrot.lane.b32.xlu0 %v12569_v24, %s11473_s11  ;;  %v11076_v31 = vpop.f32.mrb[35].mxu0  ;;  %v12829_v19 = vsel %vm12453_vm8, %v6689_v15, %v6690_v35  ;;  %v16363_v7 = vrot.slane %v12810_v33, 7  ;;  %v12851_v39 = vrot.slane %v12797_v41, %v11824_v36 }
 0x567   : > { %v12825_v31 = vsel %vm12453_vm8, %v6681_v60, %v16592_v34  ;;  %v6692_v34 = vrot.slane %v6690_v35, 2  ;;  %v12864_v35 = vcombine.high %v12832_v62, %v12832_v62 }
 0x568   : > { %7344 = vrot.lane.b32.xlu1 %v12601_v28, %s11473_s11 }
 0x569   : > { %v12834_v25 = vpop.f32.mrb[36].mxu0  ;;  %v12870_v28 = vsel %vm12453_vm8, %v6692_v34, %v16363_v7 }
 0x56a   : > { %v4874_v60 = vcombine.high %v12834_v25, %v12834_v25  ;;  %7346 = vrot.lane.b32.xlu0 %v12638_v16, %s11473_s11  ;;  %v11079_v15 = vpop.f32.mrb[37].mxu0  ;;  %v12860_v16 = vsel %vm12453_vm8, %v6678_v4, %v6679_v8  ;;  %v12880_v4 = vcombine.high %v12851_v39, %v12851_v39 }
 0x56c   : > { %v12854_v44 = vrot.slane %v4874_v60, %v11824_v36  ;;  %5973 = vrot.lane.b32.xlu1 %v12592_v54, %s11473_s11 }
 0x56d   : > { %v4454_v15 = vpop.f32.mrb[38].mxu0 }
 0x56e   : > { %v12874_v60 = vcombine.high %v12854_v44, %v12854_v44  ;;  %5971 = vrot.lane.b32.xlu0 %v12596_v27, %s11473_s11  ;;  %v11082_v8 = vpop.f32.mrb[39].mxu0  ;;  %v4891_v63 = vcombine.high %v4454_v15, %v4454_v15  ;;  %v12883_v58 = vrot.slane %v4454_v15, %v11824_v36 }
 0x56f   : > { %v16595_v8 = vcombine.low %v12719_v10, %v12741_v51 }
 0x570   : > { %16593 = vst [vmem:[#allocation27_spill] sm:$0xff] %v12874_v60  ;;  %16594 = vst [vmem:[#allocation28_spill] sm:$0xff] %v12883_v58  ;;  %7348 = vrot.lane.b32.xlu1 %v12651_v32, %s11473_s11  ;;  %v12898_v12 = vrot.slane %v4891_v63, %v11824_v36  ;;  %v12902_v15 = vcombine.high %v12883_v58, %v12883_v58  ;;  %v5459_v34 = vcombine.low %v12864_v35, %v12883_v58 }
 0x571   : > { %v12895_v20 = vrot.slane %v16595_v8, %v11837_v49  ;;  %v12906_v7 = vpop.f32.mrb[40].mxu0 }
 0x572   : > { %16596 = vst [vmem:[#allocation29_spill] sm:$0xff] %v12898_v12  ;;  %16597 = vst [vmem:[#allocation30_spill] sm:$0xff] %v12902_v15  ;;  %7350 = vrot.lane.b32.xlu0 %v12653_v13, %s11473_s11  ;;  %v11085_v32 = vpop.f32.mrb[41].mxu0  ;;  %v12911_v45 = vrot.slane %v5459_v34, %v11837_v49 }
 0x574   : > { %16598 = vst [vmem:[#allocation31_spill] sm:$0xff] %v12911_v45  ;;  %7352 = vrot.lane.b32.xlu1 %v12657_v55, %s11473_s11 }
 0x575   : > { %v12923_v13 = vpop.f32.mrb[42].mxu0 }
 0x576   : > { %5975 = vrot.lane.b32.xlu0 %v12609_v18, %s11473_s11  ;;  %v11088_v34 = vpop.f32.mrb[43].mxu0 }
 0x578   : > { %5977 = vrot.lane.b32.xlu1 %v12661_v2, %s11473_s11 }
 0x579   : > { %v12929_v32 = vpop.f32.mrb[44].mxu0  ;;  %v12931_v8 = vpop.f32.mrb[36].mxu1 }
 0x57a   : > { %16599 = vst [vmem:[#allocation32_spill] sm:$0xff] %v12929_v32  ;;  %7354 = vrot.lane.b32.xlu0 %v12647_v23, %s11473_s11  ;;  %v11091_v55 = vpop.f32.mrb[45].mxu0  ;;  %v11118_v58 = vpop.f32.mrb[37].mxu1 }
 0x57c   : > { %5981 = vrot.lane.b32.xlu1 %v12686_v22, %s11473_s11 }
 0x57d   : > { %v12937_v14 = vpop.f32.mrb[46].mxu0  ;;  %v12939_v63 = vpop.f32.mrb[38].mxu1 }
 0x57e   : > { %16600 = vst [vmem:[#allocation33_spill] sm:$0xff] %v12937_v14  ;;  %5979 = vrot.lane.b32.xlu0 %v12719_v10, %s11473_s11  ;;  %v11094_v34 = vpop.f32.mrb[47].mxu0  ;;  %v11121_v18 = vpop.f32.mrb[39].mxu1 }
 0x57f   : > { %v16603_v34 = vrot.slane %v12641_v47, 2  ;;  %v16606_v47 = vcombine.low %v12538_v43, %v12569_v24  ;;  %v16611_v43 = vrot.slane %v12810_v33, 7 }
 0x580   : > { %7356 = vrot.lane.b32.xlu1 %v12675_v3, %s11473_s11 }
 0x581   : > { %v12945_v45 = vpop.f32.mrb[48].mxu0  ;;  %v12947_v23 = vpop.f32.mrb[40].mxu1  ;;  %v6695_v24 = vrot.slane %v16611_v43, 2 }
 0x582   : > { %16601 = vst [vmem:[#allocation34_spill] sm:$0xff] %v12945_v45  ;;  %7358 = vrot.lane.b32.xlu0 %v12680_v50, %s11473_s11  ;;  %v11097_v58 = vpop.f32.mrb[49].mxu0  ;;  %v11124_v55 = vpop.f32.mrb[41].mxu1  ;;  %v4855_v50 = vcombine.high %v12810_v33, %v12810_v33 }
 0x584   : > { %5985 = vrot.lane.b32.xlu1 %v12697_v42, %s11473_s11 }
 0x585   : > { %v12953_v14 = vpop.f32.mrb[50].mxu0  ;;  %v12955_v10 = vpop.f32.mrb[42].mxu1 }
 0x586   : > { %16602 = vst [vmem:[#allocation35_spill] sm:$0xff] %v12953_v14  ;;  %5983 = vrot.lane.b32.xlu0 %v12749_v9, %s11473_s11  ;;  %v11100_v18 = vpop.f32.mrb[51].mxu0  ;;  %v11127_v3 = vpop.f32.mrb[43].mxu1 }
 0x587   : > { %v4857_v18 = vcombine.high %v12797_v41, %v12797_v41  ;;  %v12978_v3 = vrot.slane %v16606_v47, %v11837_v49 }
 0x588   : > { %7360 = vrot.lane.b32.xlu1 %v16603_v34, %s11473_s11  ;;  %v12980_v34 = vrot.slane %v4855_v50, 7  ;;  %v12998_v50 = vrot.slane %v12834_v25, %v11824_v36  ;;  %v16615_v25 = vcombine.low %v12442_v11, %v12477_v5  ;;  %v5095_v11 = vcombine.high %v12931_v8, %v12931_v8 }
 0x589   : > { %v12964_v58 = vpop.f32.mrb[52].mxu0  ;;  %v12966_v55 = vpop.f32.mrb[44].mxu1  ;;  %16607 = vst [vmem:[#allocation38_spill] sm:$0xff] %v12978_v3  ;;  %v13001_v47 = vrot.slane %v4857_v18, %v11824_v36 }
 0x58a   : > { %16604 = vst [vmem:[#allocation36_spill] sm:$0xff] %v12964_v58  ;;  %16605 = vst [vmem:[#allocation37_spill] sm:$0xff] %v12966_v55  ;;  %7362 = vrot.lane.b32.xlu0 %v12814_v17, %s11473_s11  ;;  %v11103_v14 = vpop.f32.mrb[53].mxu0  ;;  %v11130_v45 = vpop.f32.mrb[45].mxu1  ;;  %v13018_v18 = vrot.slane %v16615_v25, %v11837_v49  ;;  %v13036_v5 = vsel %vm12453_vm8, %v6695_v24, %v12980_v34  ;;  %v16618_v25 = vcombine.low %v12547_v48, %v12596_v27 }
 0x58b   : > { %v4873_v24 = vcombine.high %v13001_v47, %v13001_v47  ;;  %v16628_v48 = vcombine.low %v12697_v42, %v12782_v46 }
 0x58c   : > { %5989 = vrot.lane.b32.xlu1 %v12741_v51, %s11473_s11  ;;  %v16609_v51 = vcombine.low %v12414_v59, %v12463_v56 }
 0x58d   : > { %v12982_v55 = vpop.f32.mrb[54].mxu0  ;;  %v12984_v58 = vpop.f32.mrb[46].mxu1 }
 0x58e   : > { %16608 = vst [vmem:[#allocation39_spill] sm:$0xff] %v12984_v58  ;;  %5987 = vrot.lane.b32.xlu0 %v12745_v30, %s11473_s11  ;;  %v11106_v14 = vpop.f32.mrb[55].mxu0  ;;  %v11133_v45 = vpop.f32.mrb[47].mxu1  ;;  %v12992_v41 = vrot.slane %v16609_v51, %v11837_v49  ;;  %v5027_v42 = vcombine.high %v12982_v55, %v12982_v55 }
 0x58f   : > { %v16612_v14 = vrot.slane %v12722_v6, 7  ;;  %v16616_v6 = vcombine.low %v12418_v29, %v12483_v38  ;;  %v16617_v29 = vcombine.low %v12429_v40, %v12488_v37  ;;  %v16619_v40 = vcombine.low %v12576_v21, %v12592_v54 }
 0x590   : > { %16610 = vst [vmem:[#allocation40_spill] sm:$0xff] %v12992_v41  ;;  %7364 = vrot.lane.b32.xlu1 %v12807_v53, %s11473_s11  ;;  %v10789_v33 = vcombine.high %v12992_v41, %v12978_v3  ;;  %v4889_v41 = vcombine.high %v12998_v50, %v12998_v50  ;;  %v16625_v21 = vcombine.low %v12661_v2, %v12745_v30  ;;  %v16630_v30 = vrot.slane %v12998_v50, 7 }
 0x591   : > { %v6684_v45 = vrot.slane %v16612_v14, 2  ;;  %v13008_v56 = vpop.f32.mrb[56].mxu0  ;;  %v13010_v51 = vpop.f32.mrb[48].mxu1  ;;  %v13024_v43 = vrot.slane %v16616_v6, %v11837_v49  ;;  %v13042_v38 = vrot.slane %v16617_v29, %v11837_v49  ;;  %v13050_v6 = vrot.slane %v16618_v25, %v11837_v49 }
 0x592   : > { %16613 = vst [vmem:[#allocation41_spill] sm:$0xff] %v13008_v56  ;;  %16614 = vst [vmem:[#allocation42_spill] sm:$0xff] %v13010_v51  ;;  %7366 = vrot.lane.b32.xlu0 %v12860_v16, %s11473_s11  ;;  %v11109_v14 = vpop.f32.mrb[57].mxu0  ;;  %v11136_v59 = vpop.f32.mrb[49].mxu1  ;;  %v13060_v37 = vrot.slane %v16619_v40, %v11837_v49  ;;  %v13079_v54 = vrot.slane %v16625_v21, %v11837_v49  ;;  %v16627_v40 = vcombine.low %v12749_v9, %v12768_v1 }
 0x593   : > { %v16620_v14 = vrot.slane %v12980_v34, 2  ;;  %v13073_v59 = vrot.slane %v10789_v33, %v11824_v36  ;;  %v13091_v3 = vrot.slane %v16628_v48, %v11837_v49  ;;  %v6934_v2 = vcombine.low %v12825_v31, %v13036_v5 }
 0x594   : > { %5993 = vrot.lane.b32.xlu1 %v12768_v1, %s11473_s11  ;;  %16626 = vst [vmem:[#allocation47_spill] sm:$0xff] %v13079_v54  ;;  %v6706_v21 = vrot.slane %v16630_v30, 2  ;;  %v13099_v1 = vrot.slane %v4889_v41, 7  ;;  %v13102_v9 = vrot.slane %v5095_v11, %v11824_v36  ;;  %v4908_v48 = vcombine.high %v12906_v7, %v12906_v7 }
 0x595   : > { %v13064_v29 = vcombine.low %v6684_v45, %v16620_v14  ;;  %v13068_v27 = vpop.f32.mrb[58].mxu0  ;;  %v13070_v25 = vpop.f32.mrb[50].mxu1  ;;  %16624 = vst [vmem:[#allocation46_spill] sm:$0xff] %v13073_v59  ;;  %v13085_v14 = vrot.slane %v16627_v40, %v11837_v49  ;;  %16629 = vst [vmem:[#allocation48_spill] sm:$0xff] %v13091_v3  ;;  %v10813_v41 = vrot.slane %v13001_v47, 9  ;;  %v13123_v30 = vrot.slane %v13008_v56, %v11824_v36 }
 0x596   : > { %16622 = vst [vmem:[#allocation44_spill] sm:$0xff] %v13068_v27  ;;  %16623 = vst [vmem:[#allocation45_spill] sm:$0xff] %v13070_v25  ;;  %5991 = vrot.lane.b32.xlu0 %v12801_v57, %s11473_s11  ;;  %v11112_v33 = vpop.f32.mrb[59].mxu0  ;;  %v11139_v59 = vpop.f32.mrb[51].mxu1  ;;  %v13142_v11 = vrot.slane %v12906_v7, %v11824_v36  ;;  %v13159_v7 = vsel %vm12453_vm8, %v6706_v21, %v13099_v1  ;;  %v13206_v56 = vrot.slane %v12931_v8, %v11824_v36 }
 0x597   : > { %16621 = vst [vmem:[#allocation43_spill] sm:$0xff] %v13064_v29  ;;  %v16631_v59 = vcombine.low %v12686_v22, %v12801_v57  ;;  %v13117_v33 = vrot.slane %v4873_v24, 7  ;;  %16632 = vst [vmem:[#allocation49_spill] sm:$0xff] %v13123_v30  ;;  %v16634_v22 = vcombine.low %v12814_v17, %v12838_v0  ;;  %v13148_v29 = vrot.slane %v6934_v2, %v11837_v49 }
 0x598   : > { %7368 = vrot.lane.b32.xlu1 %v12825_v31, %s11473_s11  ;;  %v16635_v31 = vcombine.low %v12807_v53, %v12829_v19  ;;  %v6709_v53 = vrot.slane %v13099_v1, 2  ;;  %v13168_v2 = vrot.slane %v4908_v48, %v11824_v36  ;;  %v13189_v48 = vcombine.high %v13123_v30, %v13123_v30  ;;  %16643 = vst [vmem:[#allocation56_spill] sm:$0xff] %v13206_v56 }
 0x599   : > { %v13112_v40 = vrot.slane %v16631_v59, %v11837_v49  ;;  %v4509_v25 = vpop.f32.mrb[60].mxu0  ;;  %v13125_v27 = vpop.f32.mrb[52].mxu1  ;;  %v13131_v57 = vrot.slane %v16634_v22, %v11837_v49  ;;  %v6710_v59 = vrot.slane %v12854_v44, 7  ;;  %v13154_v44 = vrot.slane %v5027_v42, %v11824_v36 }
 0x59a   : > { %16633 = vst [vmem:[#allocation50_spill] sm:$0xff] %v13125_v27  ;;  %v13137_v24 = vrot.slane %v16635_v31, %v11837_v49  ;;  %v5129_v27 = vcombine.high %v12947_v23, %v12947_v23  ;;  %7370 = vrot.lane.b32.xlu0 %v6684_v45, %s11473_s11  ;;  %v11115_v17 = vpop.f32.mrb[61].mxu0  ;;  %v11142_v22 = vpop.f32.mrb[53].mxu1  ;;  %v5111_v31 = vcombine.high %v13102_v9, %v13102_v9  ;;  %16641 = vst [vmem:[#allocation54_spill] sm:$0xff] %v13189_v48 }
 0x59b   : > { %16636 = vst [vmem:[#allocation51_spill] sm:$0xff] %v13154_v44  ;;  %v16637_v45 = vcombine.low %v12832_v62, %v12874_v60  ;;  %v16639_v42 = vcombine.low %v12860_v16, %v12870_v28  ;;  %v13181_v21 = vsel %vm12453_vm8, %v10813_v41, %v13117_v33  ;;  %v13185_v1 = vcombine.high %v13154_v44, %v13154_v44 }
 0x59c   : > { %7372 = vrot.lane.b32.xlu1 %v12838_v0, %s11473_s11  ;;  %v5078_v0 = vcombine.high %v4509_v25, %v4509_v25  ;;  %v6703_v16 = vrot.slane %v13117_v33, 2  ;;  %v13198_v41 = vrot.slane %v5129_v27, %v11824_v36  ;;  %v13202_v51 = vrot.slane %v6710_v59, 2 }
 0x59d   : > { %v13165_v17 = vrot.slane %v16637_v45, %v11837_v49  ;;  %v13176_v22 = vrot.slane %v16639_v42, %v11837_v49  ;;  %16640 = vst [vmem:[#allocation53_spill] sm:$0xff] %v13185_v1  ;;  %v13191_v45 = vpop.f32.mrb[54].mxu1  ;;  %v4923_v42 = vcombine.high %v13142_v11, %v13142_v11  ;;  %v13211_v33 = vrot.slane %v4509_v25, %v11824_v36 }
 0x59e   : > { %16642 = vst [vmem:[#allocation55_spill] sm:$0xff] %v13191_v45  ;;  %5995 = vrot.lane.b32.xlu0 %v12782_v46, %s11473_s11  ;;  %v11145_v26 = vpop.f32.mrb[55].mxu1  ;;  %v13208_v45 = vrot.slane %v5111_v31, 7  ;;  %v13214_v61 = vrot.slane %v5078_v0, %v11824_v36  ;;  %v16646_v27 = vcombine.low %v12851_v39, %v12902_v15  ;;  %v4924_v31 = vcombine.high %v13168_v2, %v13168_v2 }
 0x59f   : > { %16638 = vst [vmem:[#allocation52_spill] sm:$0xff] %v13165_v17  ;;  %16644 = vst [vmem:[#allocation57_spill] sm:$0xff] %v13211_v33  ;;  %v16647_v26 = vcombine.low %v12880_v4, %v12898_v12  ;;  %v13232_v25 = vrot.slane %v12939_v63, %v11824_v36  ;;  %v5146_v0 = vcombine.high %v12955_v10, %v12955_v10  ;;  %v13248_v58 = vrot.slane %v4923_v42, 7 }
 0x5a0   : > { %16645 = vst [vmem:[#allocation58_spill] sm:$0xff] %v13214_v61  ;;  %v13220_v46 = vrot.slane %v16646_v27, %v11837_v49  ;;  %5997 = vrot.lane.b32.xlu1 %v12832_v62, %s11473_s11  ;;  %v13240_v27 = vcombine.high %v13211_v33, %v13211_v33  ;;  %v13252_v62 = vrot.slane %v12923_v13, %v11824_v36  ;;  %v9257_v61 = vrot.slane %v13208_v45, 2 }
 0x5a1   : > { %v13226_v8 = vrot.slane %v16647_v26, %v11837_v49  ;;  %v13246_v44 = vpop.f32.mrb[56].mxu1  ;;  %v5145_v60 = vcombine.high %v13198_v41, %v13198_v41  ;;  %v13262_v26 = vcombine.high %v12898_v12, %v12898_v12  ;;  %v5110_v1 = vcombine.high %v13206_v56, %v13206_v56 }
 0x5a2   : > { %16648 = vst [vmem:[#allocation59_spill] sm:$0xff] %v13240_v27  ;;  %16649 = vst [vmem:[#allocation60_spill] sm:$0xff] %v13246_v44  ;;  %v13256_v3 = vpop.permute.xlu1 %5937  ;;  %8572 = vrot.lane.b32.xlu0 %v13206_v56, %s11473_s11  ;;  %v11148_v15 = vpop.f32.mrb[57].mxu1  ;;  %v16652_v48 = vrot.slane %v13142_v11, 7  ;;  %v4925_v12 = vcombine.high %v12923_v13, %v12923_v13  ;;  %v16654_v33 = vrot.slane %v12998_v50, 7  ;;  %v4942_v27 = vcombine.high %v12929_v32, %v12929_v32 }
 0x5a3   : > { %16650 = vst [vmem:[#allocation61_spill] sm:$0xff] %v13252_v62  ;;  %16651 = vst [vmem:[#allocation62_spill] sm:$0xff] %v13256_v3  ;;  %v13290_v3 = vrot.slane %v5146_v0, %v11824_v36  ;;  %v6720_v13 = vrot.slane %v13248_v58, 2  ;;  %v13297_v50 = vrot.slane %v5145_v60, 7  ;;  %v13310_v0 = vrot.slane %v13252_v62, %v11837_v49 }
 0x5a4   : > { %v6717_v44 = vrot.slane %v16652_v48, 2  ;;  %6001 = vrot.lane.b32.xlu1 %v12851_v39, %s11473_s11  ;;  %v13277_v15 = vpop.permute.xlu0 %5939  ;;  %v13283_v42 = vsel %vm12453_vm8, %v6703_v16, %v16654_v33  ;;  %v5112_v48 = vcombine.high %v12939_v63, %v12939_v63  ;;  %v13294_v39 = vsel %vm12453_vm8, %v6709_v53, %v6710_v59 }
 0x5a5   : > { %16653 = vst [vmem:[#allocation63_spill] sm:$0xff] %v13277_v15  ;;  %16655 = vst [vmem:[#allocation64_spill] sm:$0xff] %v13290_v3  ;;  %v13301_v16 = vrot.slane %v12955_v10, %v11824_v36  ;;  %v10814_v63 = vrot.slane %v13262_v26, 9  ;;  %v10859_v59 = vrot.slane %v13206_v56, 9  ;;  %v13313_v53 = vrot.slane %v5110_v1, 7 }
 0x5a6   : > { %v13303_v33 = vpop.permute.xlu1 %5941  ;;  %7374 = vrot.lane.b32.xlu0 %v12829_v19, %s11473_s11  ;;  %16657 = vst [vmem:[#allocation66_spill] sm:$0xff] %v13310_v0  ;;  %v16658_v60 = vrot.slane %v13232_v25, 7  ;;  %v13323_v19 = vrot.slane %v4924_v31, 7  ;;  %v13326_v32 = vrot.slane %v4925_v12, %v11824_v36  ;;  %v13334_v56 = vrot.slane %v4942_v27, %v11824_v36 }
 0x5a7   : > { %16656 = vst [vmem:[#allocation65_spill] sm:$0xff] %v13303_v33  ;;  %v16660_v33 = vrot.slane %v13168_v2, 7  ;;  %v13341_v31 = vcombine.high %v13290_v3, %v13290_v3  ;;  %v13346_v12 = vsel %vm12453_vm8, %v6717_v44, %v13248_v58  ;;  %v9268_v27 = vrot.slane %v13297_v50, 2 }
 0x5a8   : > { %v13319_v10 = vsel %vm12453_vm8, %v9257_v61, %v16658_v60  ;;  %16661 = vst [vmem:[#allocation68_spill] sm:$0xff] %v13323_v19  ;;  %16662 = vst [vmem:[#allocation69_spill] sm:$0xff] %v13326_v32  ;;  %7376 = vrot.lane.b32.xlu1 %v12870_v28, %s11473_s11  ;;  %v13331_v1 = vpop.permute.xlu0 %5943  ;;  %v13337_v61 = vrot.slane %v5112_v48, %v11824_v36  ;;  %v13350_v28 = vcombine.high %v13252_v62, %v13252_v62  ;;  %v16670_v44 = vmov 0.0  }
 0x5a9   : > { %16659 = vst [vmem:[#allocation67_spill] sm:$0xff] %v13319_v10  ;;  %v6723_v15 = vrot.slane %v16660_v33, 2  ;;  %16663 = vst [vmem:[#allocation70_spill] sm:$0xff] %v13331_v1  ;;  %v16669_v48 = vrot.slane %v13142_v11, 7  ;;  %v10790_v58 = vcombine.high %v13079_v54, %v13165_v17  ;;  %v13367_v30 = vcombine.high %v13310_v0, %v16670_v44  ;;  %v16674_v0 = vld [vmem:[#allocation15_spill] sm:$0xff] }
 0x5aa   : > { %16664 = vst [vmem:[#allocation71_spill] sm:$0xff] %v13334_v56  ;;  %16665 = vst [vmem:[#allocation72_spill] sm:$0xff] %v13337_v61  ;;  %v13352_v33 = vpop.permute.xlu1 %5945  ;;  %5999 = vrot.lane.b32.xlu0 %v12864_v35, %s11473_s11  ;;  %v16675_v35 = vld [vmem:[#allocation17_spill] sm:$0xff]  ;;  %v16678_v44 = vld [vmem:[#allocation31_spill] sm:$0xff] }
 0x5ab   : > { %16666 = vst [vmem:[#allocation73_spill] sm:$0xff] %v13346_v12  ;;  %16667 = vst [vmem:[#allocation74_spill] sm:$0xff] %v13350_v28  ;;  %v13361_v60 = vsel %vm12453_vm8, %v10814_v63, %v16669_v48  ;;  %v16673_v48 = vrot.slane %v13301_v16, 7  ;;  %v16676_v54 = vcombine.low %v16674_v0, %v16675_v35  ;;  %v16679_v28 = vcombine.low %v12895_v20, %v16678_v44 }
 0x5ac   : > { %16668 = vst [vmem:[#allocation75_spill] sm:$0xff] %v13352_v33  ;;  %16671 = vst [vmem:[#allocation76_spill] sm:$0xff] %v13367_v30  ;;  %v13372_v33 = vsel %vm12453_vm8, %v10859_v59, %v13313_v53  ;;  %v6808_v11 = vcombine.low %v13181_v21, %v13361_v60  ;;  %v13380_v63 = vpop.permute.xlu0 %7322  ;;  %v6853_v59 = vcombine.low %v13283_v42, %v13346_v12 }
 0x5ad   : > { %16672 = vst [vmem:[#allocation77_spill] sm:$0xff] %v13372_v33  ;;  %9942 = vrot.lane.b32.xlu1 %v13372_v33, %s11473_s11  ;;  %v13386_v1 = vsel %vm12453_vm8, %v9268_v27, %v16673_v48  ;;  %v13394_v17 = vrot.slane %v16676_v54, %v11824_v36  ;;  %v13400_v30 = vrot.slane %v16679_v28, %v11824_v36 }
 0x5ae   : > { %v13404_v33 = vrot.slane %v13326_v32, %v11837_v49  ;;  %v4958_v27 = vcombine.high %v13334_v56, %v13334_v56  ;;  %v13409_v48 = vrot.slane %v6808_v11, %v11837_v49  ;;  %v16682_v54 = vcombine.high %v16674_v0, %v16675_v35  ;;  %v13417_v62 = vpop.permute.xlu1 %5949  ;;  %7378 = vrot.lane.b32.xlu0 %v13036_v5, %s11473_s11  ;;  %v16688_v35 = vld [vmem:[#allocation33_spill] sm:$0xff] }
 0x5af   : > { %16677 = vst [vmem:[#allocation15_spill] sm:$0xff] %v13394_v17  ;;  %16680 = vst [vmem:[#allocation17_spill] sm:$0xff] %v13400_v30  ;;  %v13422_v28 = vrot.slane %v6853_v59, %v11837_v49  ;;  %v16685_v11 = vcombine.high %v12895_v20, %v16678_v44  ;;  %v13435_v0 = vsel %vm12453_vm8, %v6723_v15, %v13323_v19  ;;  %v16691_v15 = vrot.slane %v13168_v2, 7 }
 0x5b0   : > { %16681 = vst [vmem:[#allocation31_spill] sm:$0xff] %v13404_v33  ;;  %v13415_v12 = vrot.slane %v16682_v54, %v11824_v36  ;;  %16684 = vst [vmem:[#allocation79_spill] sm:$0xff] %v13417_v62  ;;  %v4959_v5 = vcombine.high %v16688_v35, %v16688_v35  ;;  %v6943_v56 = vcombine.low %v13294_v39, %v13435_v0  ;;  %v13447_v20 = vpop.permute.xlu0 %5947  ;;  %v16689_v54 = vld [vmem:[#allocation34_spill] sm:$0xff]  ;;  %v13471_v17 = vrot.slane %v4958_v27, 7 }
 0x5b1   : > { %v13430_v33 = vrot.slane %v16685_v11, %v11824_v36  ;;  %16687 = vst [vmem:[#allocation81_spill] sm:$0xff] %v13435_v0  ;;  %6005 = vrot.lane.b32.xlu1 %v13001_v47, %s11473_s11  ;;  %v4976_v62 = vcombine.high %v16689_v54, %v16689_v54  ;;  %v13460_v0 = vrot.slane %v10790_v58, %v11824_v36  ;;  %v9252_v11 = vrot.slane %v13102_v9, 7 }
 0x5b2   : > { %16683 = vst [vmem:[#allocation78_spill] sm:$0xff] %v13415_v12  ;;  %v13463_v30 = vrot.slane %v6943_v56, %v11837_v49  ;;  %v13469_v44 = vsel %vm12453_vm8, %v6720_v13, %v16691_v15  ;;  %16693 = vst [vmem:[#allocation82_spill] sm:$0xff] %v13471_v17  ;;  %v13475_v59 = vrot.slane %v16688_v35, %v11824_v36  ;;  %6003 = vrot.lane.b32.xlu0 %v12880_v4, %s11473_s11 }
 0x5b3   : > { %16686 = vst [vmem:[#allocation80_spill] sm:$0xff] %v13430_v33  ;;  %16690 = vst [vmem:[#allocation33_spill] sm:$0xff] %v13460_v0  ;;  %v13478_v33 = vpop.permute.xlu1 %7324  ;;  %v6898_v56 = vcombine.low %v13159_v7, %v13469_v44  ;;  %v13485_v2 = vrot.slane %v4959_v5, %v11824_v36  ;;  %v5740_v9 = vcombine.low %v13024_v43, %v13050_v6  ;;  %v16699_v35 = vrot.slane %v12980_v34, 2 }
 0x5b4   : > { %16692 = vst [vmem:[#allocation34_spill] sm:$0xff] %v13469_v44  ;;  %16694 = vst [vmem:[#allocation83_spill] sm:$0xff] %v13475_v59  ;;  %v13495_v27 = vrot.slane %v16689_v54, %v11824_v36  ;;  %v13499_v4 = vcombine.high %v13232_v25, %v13232_v25  ;;  %v13504_v5 = vpop.permute.xlu0 %7326  ;;  %v5741_v58 = vcombine.low %v13112_v40, %v13220_v46 }
 0x5b5   : > { %16695 = vst [vmem:[#allocation84_spill] sm:$0xff] %v13478_v33  ;;  %16696 = vst [vmem:[#allocation85_spill] sm:$0xff] %v13485_v2  ;;  %7380 = vrot.lane.b32.xlu1 %v16699_v35, %s11473_s11  ;;  %v13507_v15 = vrot.slane %v6898_v56, %v11837_v49  ;;  %v13512_v13 = vrot.slane %v4976_v62, %v11824_v36  ;;  %v13516_v54 = vrot.slane %v12947_v23, %v11824_v36 }
 0x5b6   : > { %16697 = vst [vmem:[#allocation86_spill] sm:$0xff] %v13495_v27  ;;  %16698 = vst [vmem:[#allocation87_spill] sm:$0xff] %v13499_v4  ;;  %v10793_v33 = vcombine.high %v13024_v43, %v13050_v6  ;;  %v10794_v34 = vcombine.high %v13112_v40, %v13220_v46  ;;  %8576 = vrot.lane.b32.xlu0 %v13337_v61, %s11473_s11  ;;  %v13531_v23 = vrot.slane %v5740_v9, %v11824_v36  ;;  %v16705_v43 = vld [vmem:[#allocation35_spill] sm:$0xff] }
 0x5b7   : > { %16700 = vst [vmem:[#allocation88_spill] sm:$0xff] %v13504_v5  ;;  %16701 = vst [vmem:[#allocation89_spill] sm:$0xff] %v13516_v54  ;;  %v13522_v35 = vpop.permute.xlu1 %5953  ;;  %v13534_v5 = vrot.slane %v5741_v58, %v11824_v36  ;;  %v13538_v6 = vrot.slane %v16705_v43, %v11824_v36  ;;  %v9251_v40 = vrot.slane %v13313_v53, 2  ;;  %v5810_v62 = vcombine.low %v13018_v18, %v13060_v37 }
 0x5b8   : > { %16702 = vst [vmem:[#allocation90_spill] sm:$0xff] %v13522_v35  ;;  %16703 = vst [vmem:[#allocation91_spill] sm:$0xff] %v13531_v23  ;;  %v13542_v46 = vrot.slane %v10793_v33, %v11824_v36  ;;  %v13545_v56 = vrot.slane %v10794_v34, %v11824_v36  ;;  %v13549_v9 = vpop.permute.xlu0 %5951  ;;  %v5811_v53 = vcombine.low %v13085_v14, %v13226_v8  ;;  %v9254_v35 = vrot.slane %v9252_v11, 2 }
 0x5b9   : > { %16704 = vst [vmem:[#allocation92_spill] sm:$0xff] %v13534_v5  ;;  %8574 = vrot.lane.b32.xlu1 %v13499_v4, %s11473_s11  ;;  %16708 = vst [vmem:[#allocation94_spill] sm:$0xff] %v13549_v9  ;;  %v10795_v33 = vcombine.high %v13018_v18, %v13060_v37  ;;  %v13562_v4 = vcombine.high %v13485_v2, %v13485_v2  ;;  %v13568_v58 = vcombine.high %v13495_v27, %v13495_v27 }
 0x5ba   : > { %16706 = vst [vmem:[#allocation35_spill] sm:$0xff] %v13542_v46  ;;  %16707 = vst [vmem:[#allocation93_spill] sm:$0xff] %v13545_v56  ;;  %8580 = vrot.lane.b32.xlu0 %v13516_v54, %s11473_s11  ;;  %v13575_v18 = vrot.slane %v5810_v62, %v11824_v36  ;;  %v13578_v37 = vrot.slane %v5811_v53, %v11824_v36  ;;  %v10796_v34 = vcombine.high %v13085_v14, %v13226_v8  ;;  %v16717_v62 = vld [vmem:[#allocation19_spill] sm:$0xff] }
 0x5bb   : > { %16709 = vst [vmem:[#allocation95_spill] sm:$0xff] %v13562_v4  ;;  %v13570_v5 = vpop.permute.xlu1 %7328  ;;  %v4992_v9 = vcombine.high %v13512_v13, %v13512_v13  ;;  %v5008_v56 = vcombine.high %v13538_v6, %v13538_v6  ;;  %v16435_v46 = vrot.slane %v13323_v19, 2  ;;  %v13599_v8 = vrot.slane %v10795_v33, %v11824_v36 }
 0x5bc   : > { %16710 = vst [vmem:[#allocation96_spill] sm:$0xff] %v13570_v5  ;;  %16711 = vst [vmem:[#allocation97_spill] sm:$0xff] %v13575_v18  ;;  %v13588_v5 = vsel %vm12453_vm8, %v9251_v40, %v9252_v11  ;;  %v13594_v53 = vpop.permute.xlu0 %7330  ;;  %v13602_v23 = vrot.slane %v10796_v34, %v11824_v36  ;;  %v4993_v11 = vcombine.high %v16705_v43, %v16705_v43  ;;  %v16723_v43 = vld [vmem:[#allocation36_spill] sm:$0xff]  ;;  %v16726_v2 = vrot.slane %v13232_v25, 7 }
 0x5bd   : > { %16712 = vst [vmem:[#allocation98_spill] sm:$0xff] %v13578_v37  ;;  %16713 = vst [vmem:[#allocation99_spill] sm:$0xff] %v13588_v5  ;;  %9944 = vrot.lane.b32.xlu1 %v13588_v5, %s11473_s11  ;;  %v13609_v40 = vcombine.low %v13202_v51, %v16435_v46  ;;  %v16721_v33 = vcombine.high %v13131_v57, %v13409_v48  ;;  %v13626_v19 = vrot.slane %v16723_v43, %v11824_v36 }
 0x5be   : > { %16714 = vst [vmem:[#allocation100_spill] sm:$0xff] %v13594_v53  ;;  %16715 = vst [vmem:[#allocation101_spill] sm:$0xff] %v13599_v8  ;;  %v16718_v53 = vld [vmem:[#allocation20_spill] sm:$0xff]  ;;  %9948 = vrot.lane.b32.xlu0 %v13319_v10, %s11473_s11  ;;  %v13635_v18 = vrot.slane %v5008_v56, 7  ;;  %v13642_v14 = vsel %vm12453_vm8, %v9254_v35, %v13208_v45  ;;  %v13648_v5 = vrot.slane %v16726_v2, 2  ;;  %v5161_v56 = vcombine.high %v13301_v16, %v13301_v16 }
 0x5bf   : > { %16716 = vst [vmem:[#allocation102_spill] sm:$0xff] %v13602_v23  ;;  %v16719_v44 = vcombine.high %v16717_v62, %v16718_v53  ;;  %v13621_v34 = vrot.slane %v16721_v33, %v11824_v36  ;;  %16724 = vst [vmem:[#allocation36_spill] sm:$0xff] %v13626_v19  ;;  %v13629_v37 = vpop.permute.xlu1 %7332  ;;  %v5010_v33 = vcombine.high %v16723_v43, %v16723_v43  ;;  %v16730_v25 = vrot.slane %v13512_v13, 7 }
 0x5c0   : > { %16725 = vst [vmem:[#allocation103_spill] sm:$0xff] %v13642_v14  ;;  %16727 = vst [vmem:[#allocation104_spill] sm:$0xff] %v13648_v5  ;;  %v13658_v43 = vcombine.high %v13337_v61, %v13337_v61  ;;  %v13662_v45 = vpop.permute.xlu0 %5955  ;;  %v13668_v35 = vrot.slane %v4992_v9, 7  ;;  %v13671_v46 = vrot.slane %v4993_v11, %v11824_v36  ;;  %v16735_v8 = vrot.slane %v13198_v41, 7  ;;  %v16736_v11 = vld [vmem:[#allocation13_spill] sm:$0xff] }
 0x5c1   : > { %v13615_v12 = vrot.slane %v16719_v44, %v11824_v36  ;;  %16722 = vst [vmem:[#allocation20_spill] sm:$0xff] %v13621_v34  ;;  %v13652_v44 = vcombine.high %v13626_v19, %v13626_v19  ;;  %9946 = vrot.lane.b32.xlu1 %v13642_v14, %s11473_s11  ;;  %16729 = vst [vmem:[#allocation106_spill] sm:$0xff] %v13662_v45  ;;  %v13666_v2 = vrot.slane %v16730_v25, 2  ;;  %v16737_v14 = vld [vmem:[#allocation16_spill] sm:$0xff]  ;;  %v16741_v61 = vrot.slane %v13301_v16, 7  ;;  %v16746_v16 = vld [vmem:[#allocation21_spill] sm:$0xff] }
 0x5c2   : > { %16731 = vst [vmem:[#allocation107_spill] sm:$0xff] %v13671_v46  ;;  %v13675_v34 = vcombine.high %v13516_v54, %v13516_v54  ;;  %v13683_v45 = vrot.slane %v16735_v8, 2  ;;  %v13687_v25 = vrot.slane %v12982_v55, %v11824_v36  ;;  %7382 = vrot.lane.b32.xlu0 %v13181_v21, %s11473_s11  ;;  %v16738_v10 = vcombine.low %v16736_v11, %v16737_v14  ;;  %v16817_v54 = vld [vmem:[#allocation62_spill] sm:$0xff] }
 0x5c3   : > { %16720 = vst [vmem:[#allocation19_spill] sm:$0xff] %v13615_v12  ;;  %16728 = vst [vmem:[#allocation105_spill] sm:$0xff] %v13652_v44  ;;  %v16733_v12 = vrot.slane %v13538_v6, 7  ;;  %v13689_v9 = vpop.permute.xlu1 %5957  ;;  %v13699_v32 = vrot.slane %v5010_v33, %v11824_v36  ;;  %v8083_v8 = vcombine.low %v13562_v4, %v13626_v19  ;;  %v16740_v55 = vcombine.low %v13001_v47, %v13262_v26 }
 0x5c4   : > { %16732 = vst [vmem:[#allocation108_spill] sm:$0xff] %v13675_v34  ;;  %v5582_v46 = vrot.slane %v16738_v10, %v11837_v49  ;;  %v8128_v21 = vcombine.low %v13495_v27, %v13652_v44  ;;  %v13711_v14 = vrot.slane %v16741_v61, 2  ;;  %v13713_v10 = vrot.slane %v5161_v56, 7  ;;  %v13717_v33 = vpop.permute.xlu0 %7334  ;;  %v16745_v44 = vld [vmem:[#allocation18_spill] sm:$0xff] }
 0x5c5   : > { %v13679_v23 = vrot.slane %v16733_v12, 2  ;;  %16739 = vst [vmem:[#allocation13_spill] sm:$0xff] %v13699_v32  ;;  %v5598_v0 = vrot.slane %v16740_v55, %v11837_v49  ;;  %8578 = vrot.lane.b32.xlu1 %v13658_v43, %s11473_s11  ;;  %16742 = vst [vmem:[#allocation16_spill] sm:$0xff] %v13717_v33  ;;  %v16743_v12 = vld [vmem:[#allocation37_spill] sm:$0xff]  ;;  %v16744_v55 = vld [vmem:[#allocation48_spill] sm:$0xff]  ;;  %v16747_v61 = vcombine.low %v16745_v44, %v16746_v16 }
 0x5c6   : > { %v5879_v11 = vcombine.low %v13042_v38, %v5582_v46  ;;  %v13722_v47 = vrot.slane %v16743_v12, %v11824_v36  ;;  %v16749_v56 = vcombine.low %v13137_v24, %v13422_v28  ;;  %v5163_v46 = vcombine.high %v16743_v12, %v16743_v12 }
 0x5c7   : > { %16734 = vst [vmem:[#allocation109_spill] sm:$0xff] %v13679_v23  ;;  %v5880_v19 = vcombine.low %v16744_v55, %v5598_v0  ;;  %v13729_v4 = vrot.slane %v16747_v61, %v11824_v36  ;;  %v13740_v33 = vpop.permute.xlu1 %5961  ;;  %v16752_v0 = vld [vmem:[#allocation27_spill] sm:$0xff]  ;;  %v16753_v55 = vcombine.high %v16745_v44, %v16746_v16  ;;  %v5042_v12 = vcombine.high %v13687_v25, %v13687_v25 }
 0x5c8   : > { %v13735_v27 = vrot.slane %v16749_v56, %v11824_v36  ;;  %16751 = vst [vmem:[#allocation18_spill] sm:$0xff] %v13740_v33  ;;  %6007 = vrot.lane.b32.xlu0 %v16752_v0, %s11473_s11  ;;  %v16755_v56 = vcombine.high %v13137_v24, %v13422_v28  ;;  %v13759_v38 = vrot.slane %v5879_v11, %v11824_v36  ;;  %v16762_v24 = vrot.slane %v13687_v25, 7 }
 0x5c9   : > { %16748 = vst [vmem:[#allocation37_spill] sm:$0xff] %v13729_v4  ;;  %v13748_v61 = vrot.slane %v16753_v55, %v11824_v36  ;;  %v13762_v0 = vrot.slane %v5880_v19, %v11824_v36  ;;  %v13767_v16 = vrot.slane %v8083_v8, %v11837_v49  ;;  %9950 = vrot.lane.b32.xlu1 %v13648_v5, %s11473_s11  ;;  %v13774_v55 = vpop.permute.xlu0 %5959  ;;  %v13803_v44 = vrot.slane %v5042_v12, 7  ;;  %v16782_v5 = vld [vmem:[#allocation42_spill] sm:$0xff] }
 0x5ca   : > { %16750 = vst [vmem:[#allocation48_spill] sm:$0xff] %v13735_v27  ;;  %v13754_v23 = vrot.slane %v16755_v56, %v11824_v36  ;;  %16757 = vst [vmem:[#allocation110_spill] sm:$0xff] %v13759_v38  ;;  %v13779_v11 = vrot.slane %v8128_v21, %v11837_v49  ;;  %v8101_v8 = vcombine.low %v13658_v43, %v13722_v47  ;;  %v10860_v56 = vrot.slane %v13675_v34, 9  ;;  %v16765_v21 = vld [vmem:[#allocation39_spill] sm:$0xff] }
 0x5cb   : > { %16754 = vst [vmem:[#allocation21_spill] sm:$0xff] %v13748_v61  ;;  %16758 = vst [vmem:[#allocation111_spill] sm:$0xff] %v13762_v0  ;;  %v13788_v28 = vrot.slane %v16762_v24, 2  ;;  %v13791_v33 = vrot.slane %v5163_v46, %v11824_v36  ;;  %v13795_v19 = vcombine.high %v13722_v47, %v13722_v47  ;;  %v13799_v43 = vpop.permute.xlu1 %7336  ;;  %v16769_v61 = vld [vmem:[#allocation23_spill] sm:$0xff]  ;;  %v16770_v46 = vld [vmem:[#allocation25_spill] sm:$0xff]  ;;  %v16773_v0 = vcombine.low %v13176_v22, %v13507_v15 }
 0x5cc   : > { %16756 = vst [vmem:[#allocation27_spill] sm:$0xff] %v13754_v23  ;;  %16759 = vst [vmem:[#allocation112_spill] sm:$0xff] %v13767_v16  ;;  %7386 = vrot.lane.b32.xlu0 %v13159_v7, %s11473_s11  ;;  %v16768_v23 = vld [vmem:[#allocation51_spill] sm:$0xff]  ;;  %v16771_v27 = vcombine.low %v16769_v61, %v16770_v46  ;;  %v6737_v12 = vrot.slane %v13471_v17, 2  ;;  %v16783_v17 = vrot.slane %v13198_v41, 7  ;;  %v16786_v41 = vrot.slane %v13475_v59, 7 }
 0x5cd   : > { %16760 = vst [vmem:[#allocation113_spill] sm:$0xff] %v13774_v55  ;;  %16761 = vst [vmem:[#allocation114_spill] sm:$0xff] %v13779_v11  ;;  %v5180_v55 = vcombine.high %v16765_v21, %v16765_v21  ;;  %v13816_v38 = vrot.slane %v16773_v0, %v11824_v36  ;;  %8582 = vrot.lane.b32.xlu1 %v13675_v34, %s11473_s11  ;;  %v13822_v7 = vpop.permute.xlu0 %7338  ;;  %v16779_v0 = vcombine.high %v13176_v22, %v13507_v15  ;;  %v16807_v59 = vld [vmem:[#allocation43_spill] sm:$0xff] }
 0x5ce   : > { %16763 = vst [vmem:[#allocation115_spill] sm:$0xff] %v13788_v28  ;;  %16764 = vst [vmem:[#allocation116_spill] sm:$0xff] %v13795_v19  ;;  %v13810_v4 = vrot.slane %v16771_v27, %v11824_v36  ;;  %v16777_v27 = vcombine.high %v16769_v61, %v16770_v46  ;;  %v13846_v28 = vsel %vm12453_vm8, %v10860_v56, %v16783_v17  ;;  %v16784_v46 = vld [vmem:[#allocation55_spill] sm:$0xff]  ;;  %v16788_v61 = vld [vmem:[#allocation24_spill] sm:$0xff] }
 0x5cf   : > { %16766 = vst [vmem:[#allocation39_spill] sm:$0xff] %v13799_v43  ;;  %16767 = vst [vmem:[#allocation117_spill] sm:$0xff] %v13803_v44  ;;  %v16775_v43 = vld [vmem:[#allocation41_spill] sm:$0xff]  ;;  %v13835_v16 = vrot.slane %v16779_v0, %v11824_v36  ;;  %v5248_v22 = vcombine.high %v16784_v46, %v16784_v46  ;;  %v13852_v15 = vpop.permute.xlu1 %5965  ;;  %v13862_v17 = vsel %vm12453_vm8, %v6737_v12, %v16786_v41 }
 0x5d0   : > { %16772 = vst [vmem:[#allocation51_spill] sm:$0xff] %v13810_v4  ;;  %16774 = vst [vmem:[#allocation23_spill] sm:$0xff] %v13816_v38  ;;  %v5044_v11 = vcombine.high %v16775_v43, %v16775_v43  ;;  %v13829_v24 = vrot.slane %v16777_v27, %v11824_v36  ;;  %v13838_v43 = vrot.slane %v8101_v8, %v11837_v49  ;;  %9952 = vrot.lane.b32.xlu0 %v13846_v28, %s11473_s11  ;;  %v16794_v27 = vld [vmem:[#allocation28_spill] sm:$0xff] }
 0x5d1   : > { %16776 = vst [vmem:[#allocation25_spill] sm:$0xff] %v13822_v7  ;;  %16780 = vst [vmem:[#allocation118_spill] sm:$0xff] %v13835_v16  ;;  %v5197_v7 = vcombine.high %v16782_v5, %v16782_v5  ;;  %v6992_v8 = vrot.slane %v13609_v40, %v11837_v49  ;;  %v13870_v0 = vrot.slane %v16765_v21, %v11824_v36  ;;  %6009 = vrot.lane.b32.xlu1 %v16794_v27, %s11473_s11  ;;  %v13887_v16 = vpop.permute.xlu0 %5963  ;;  %v16805_v27 = vld [vmem:[#allocation14_spill] sm:$0xff] }
 0x5d2   : > { %16778 = vst [vmem:[#allocation41_spill] sm:$0xff] %v13829_v24  ;;  %16781 = vst [vmem:[#allocation119_spill] sm:$0xff] %v13838_v43  ;;  %v16792_v12 = vcombine.low %v13148_v29, %v13463_v30  ;;  %v5179_v21 = vcombine.high %v13791_v33, %v13791_v33  ;;  %v13906_v56 = vrot.slane %v5180_v55, %v11824_v36 }
 0x5d3   : > { %16785 = vst [vmem:[#allocation42_spill] sm:$0xff] %v13852_v15  ;;  %16787 = vst [vmem:[#allocation55_spill] sm:$0xff] %v13862_v17  ;;  %v16789_v15 = vld [vmem:[#allocation26_spill] sm:$0xff]  ;;  %v6067_v43 = vcombine.low %v16817_v54, %v13447_v20 }
 0x5d4   : > { %v16790_v40 = vcombine.low %v16788_v61, %v16789_v15  ;;  %v13882_v41 = vrot.slane %v16792_v12, %v11824_v36  ;;  %16795 = vst [vmem:[#allocation28_spill] sm:$0xff] %v13887_v16  ;;  %v16798_v12 = vcombine.high %v13148_v29, %v13463_v30  ;;  %v13909_v16 = vrot.slane %v5197_v7, %v11824_v36  ;;  %v16802_v29 = vld [vmem:[#allocation30_spill] sm:$0xff]  ;;  %v16809_v30 = vld [vmem:[#allocation44_spill] sm:$0xff] }
 0x5d5   : > { %6011 = vrot.lane.b32.xlu0 %v16802_v29, %s11473_s11  ;;  %v16806_v7 = vrot.slane %v16805_v27, %v11837_v49  ;;  %v5195_v29 = vcombine.high %v13870_v0, %v13870_v0  ;;  %7384 = vrot.lane.b32.xlu1 %v13283_v42, %s11473_s11  ;;  %v13941_v27 = vpop.permute.xlu0 %7342  ;;  %v16811_v42 = vld [vmem:[#allocation45_spill] sm:$0xff] }
 0x5d6   : > { %v13876_v38 = vrot.slane %v16790_v40, %v11824_v36  ;;  %16793 = vst [vmem:[#allocation26_spill] sm:$0xff] %v13882_v41  ;;  %v16796_v40 = vcombine.high %v16788_v61, %v16789_v15  ;;  %v13901_v17 = vrot.slane %v16798_v12, %v11824_v36  ;;  %16800 = vst [vmem:[#allocation122_spill] sm:$0xff] %v13909_v16  ;;  %v16803_v12 = vld [vmem:[#allocation22_spill] sm:$0xff] }
 0x5d7   : > { %v13914_v15 = vrot.slane %v5248_v22, %v11824_v36  ;;  %v16804_v55 = vrot.slane %v16803_v12, %v11837_v49  ;;  %v16808_v61 = vrot.slane %v16807_v59, %v11837_v49  ;;  %v13932_v41 = vrot.slane %v5044_v11, %v11824_v36 }
 0x5d8   : > { %16791 = vst [vmem:[#allocation24_spill] sm:$0xff] %v13876_v38  ;;  %v13895_v24 = vrot.slane %v16796_v40, %v11824_v36  ;;  %16799 = vst [vmem:[#allocation121_spill] sm:$0xff] %v13901_v17  ;;  %v13916_v40 = vpop.permute.xlu1 %7340  ;;  %v5061_v17 = vcombine.high %v16809_v30, %v16809_v30  ;;  %v10861_v12 = vrot.slane %v13791_v33, 9  ;;  %v13944_v59 = vrot.slane %v5179_v21, 7 }
 0x5d9   : > { %16801 = vst [vmem:[#allocation123_spill] sm:$0xff] %v13916_v40  ;;  %v7273_v4 = vcombine.low %v16806_v7, %v16804_v55  ;;  %v7274_v22 = vcombine.low %v16808_v61, %v6992_v8  ;;  %v13951_v55 = vrot.slane %v16809_v30, %v11824_v36  ;;  %v13955_v7 = vrot.slane %v16782_v5, %v11824_v36 }
 0x5da   : > { %16797 = vst [vmem:[#allocation120_spill] sm:$0xff] %v13895_v24  ;;  %v13959_v40 = vrot.slane %v16811_v42, %v11824_v36  ;;  %v13963_v21 = vcombine.high %v13909_v16, %v13909_v16  ;;  %v5264_v30 = vcombine.high %v13914_v15, %v13914_v15  ;;  %7390 = vrot.lane.b32.xlu0 %v13202_v51, %s11473_s11  ;;  %v16816_v61 = vrot.slane %v13870_v0, 7  ;;  %v16818_v51 = vld [vmem:[#allocation29_spill] sm:$0xff] }
 0x5db   : > { %v7281_v11 = vrot.slane %v7273_v4, %v11824_v36  ;;  %v7288_v8 = vrot.slane %v7274_v22, %v11824_v36  ;;  %16810 = vst [vmem:[#allocation30_spill] sm:$0xff] %v13955_v7  ;;  %v13967_v4 = vrot.slane %v16784_v46, %v11824_v36  ;;  %v13981_v38 = vrot.slane %v5195_v29, 7  ;;  %6013 = vrot.lane.b32.xlu1 %v16818_v51, %s11473_s11  ;;  %v16820_v51 = vld [vmem:[#allocation60_spill] sm:$0xff] }
 0x5dc   : > { %16812 = vst [vmem:[#allocation22_spill] sm:$0xff] %v13963_v21  ;;  %v13971_v22 = vpop.permute.xlu1 %5969  ;;  %v13979_v24 = vrot.slane %v16816_v61, 2  ;;  %v5214_v46 = vcombine.high %v16811_v42, %v16811_v42  ;;  %v13988_v16 = vrot.slane %v5061_v17, %v11824_v36  ;;  %v13996_v29 = vsel %vm12453_vm8, %v10861_v12, %v13944_v59 }
 0x5dd   : > { %16813 = vst [vmem:[#allocation14_spill] sm:$0xff] %v13967_v4  ;;  %16814 = vst [vmem:[#allocation43_spill] sm:$0xff] %v13971_v22  ;;  %v13975_v5 = vcombine.low %v7281_v11, %v7288_v8  ;;  %v5968_v11 = vpop.permute.xlu0 %5967  ;;  %v10862_v8 = vrot.slane %v13963_v21, 9  ;;  %v5076_v61 = vcombine.high %v13951_v55, %v13951_v55  ;;  %v5229_v20 = vcombine.high %v13959_v40, %v13959_v40 }
 0x5de   : > { %16819 = vst [vmem:[#allocation45_spill] sm:$0xff] %v13996_v29  ;;  %v6076_v54 = vcombine.low %v13689_v9, %v5968_v11  ;;  %v9212_v17 = vrot.slane %v13668_v35, 2  ;;  %v14005_v42 = vrot.slane %v5264_v30, 7  ;;  %v14009_v22 = vrot.slane %v16820_v51, %v11824_v36  ;;  %8584 = vrot.lane.b32.xlu0 %v13290_v3, %s11473_s11 }
 0x5df   : > { %16815 = vst [vmem:[#allocation44_spill] sm:$0xff] %v13975_v5  ;;  %v5263_v5 = vcombine.high %v13967_v4, %v13967_v4  ;;  %v10863_v34 = vrot.slane %v13967_v4, 9  ;;  %v14019_v9 = vrot.slane %v6067_v43, %v11837_v49  ;;  %v9389_v11 = vcombine.low %v13846_v28, %v13996_v29  ;;  %7388 = vrot.lane.b32.xlu1 %v13294_v39, %s11473_s11 }
 0x5e0   : > { %16821 = vst [vmem:[#allocation62_spill] sm:$0xff] %v14009_v22  ;;  %v14011_v12 = vpop.permute.xlu1 %7344  ;;  %v14022_v30 = vrot.slane %v6076_v54, %v11837_v49  ;;  %v16825_v51 = vrot.slane %v13538_v6, 7  ;;  %v16828_v43 = vrot.slane %v13959_v40, 7  ;;  %v16830_v6 = vcombine.low %v16717_v62, %v16718_v53 }
 0x5e1   : > { %16822 = vst [vmem:[#allocation29_spill] sm:$0xff] %v14011_v12  ;;  %16823 = vst [vmem:[#allocation124_spill] sm:$0xff] %v14019_v9  ;;  %v14034_v3 = vpop.permute.xlu0 %7346  ;;  %v14042_v44 = vrot.slane %v5263_v5, 7  ;;  %v16832_v39 = vcombine.low %v13131_v57, %v13409_v48  ;;  %v14068_v62 = vsel %vm12453_vm8, %v13683_v45, %v13297_v50  ;;  %v16484_v57 = vrot.slane %v14009_v22, 7 }
 0x5e2   : > { %16824 = vst [vmem:[#allocation125_spill] sm:$0xff] %v14022_v30  ;;  %v14030_v12 = vsel %vm12453_vm8, %v9212_v17, %v16825_v51  ;;  %16827 = vst [vmem:[#allocation127_spill] sm:$0xff] %v14034_v3  ;;  %v14040_v54 = vsel %vm12453_vm8, %v10862_v8, %v16828_v43  ;;  %v14048_v28 = vrot.slane %v16830_v6, %v11824_v36  ;;  %v16834_v51 = vld [vmem:[#allocation50_spill] sm:$0xff]  ;;  %9954 = vrot.lane.b32.xlu0 %v14068_v62, %s11473_s11 }
 0x5e3   : > { %16826 = vst [vmem:[#allocation126_spill] sm:$0xff] %v14030_v12  ;;  %16829 = vst [vmem:[#allocation128_spill] sm:$0xff] %v14040_v54  ;;  %v14054_v17 = vrot.slane %v16832_v39, %v11824_v36  ;;  %v5231_v3 = vcombine.high %v16834_v51, %v16834_v51  ;;  %v14060_v8 = vrot.slane %v16834_v51, %v11824_v36  ;;  %v9313_v6 = vrot.slane %v14005_v42, 2 }
 0x5e4   : > { %16831 = vst [vmem:[#allocation129_spill] sm:$0xff] %v14048_v28  ;;  %v14071_v48 = vpop.permute.xlu1 %5973  ;;  %v14078_v53 = vsel %vm12453_vm8, %v10863_v34, %v14042_v44  ;;  %v14085_v45 = vrot.slane %v5214_v46, %v11824_v36  ;;  %v14088_v39 = vrot.slane %v9389_v11, %v11837_v49  ;;  %v14092_v5 = vrot.slane %v5076_v61, 7  ;;  %8586 = vrot.lane.b32.xlu1 %v13341_v31, %s11473_s11 }
 0x5e5   : > { %16833 = vst [vmem:[#allocation130_spill] sm:$0xff] %v14054_v17  ;;  %16835 = vst [vmem:[#allocation50_spill] sm:$0xff] %v14060_v8  ;;  %v9398_v51 = vcombine.low %v14040_v54, %v14078_v53  ;;  %v14097_v43 = vpop.permute.xlu0 %5971  ;;  %v14103_v46 = vsel %vm12453_vm8, %v9313_v6, %v16484_v57  ;;  %v5026_v11 = vcombine.high %v13699_v32, %v13699_v32  ;;  %v14120_v6 = vrot.slane %v5229_v20, 7 }
 0x5e6   : > { %16836 = vst [vmem:[#allocation131_spill] sm:$0xff] %v14071_v48  ;;  %16837 = vst [vmem:[#allocation132_spill] sm:$0xff] %v14078_v53  ;;  %v5077_v61 = vcombine.high %v13988_v16, %v13988_v16  ;;  %v14111_v34 = vcombine.high %v13955_v7, %v13955_v7  ;;  %v14114_v50 = vrot.slane %v5231_v3, %v11824_v36  ;;  %6015 = vrot.lane.b32.xlu0 %v13262_v26, %s11473_s11 }
 0x5e7   : > { %16838 = vst [vmem:[#allocation133_spill] sm:$0xff] %v14088_v39  ;;  %16839 = vst [vmem:[#allocation134_spill] sm:$0xff] %v14097_v43  ;;  %v14117_v48 = vrot.slane %v9398_v51, %v11837_v49  ;;  %v9285_v43 = vrot.slane %v13981_v38, 2  ;;  %v14125_v17 = vcombine.high %v14060_v8, %v14060_v8  ;;  %v16845_v3 = vrot.slane %v13951_v55, 7 }
 0x5e8   : > { %16840 = vst [vmem:[#allocation135_spill] sm:$0xff] %v14103_v46  ;;  %16841 = vst [vmem:[#allocation136_spill] sm:$0xff] %v14111_v34  ;;  %v14127_v28 = vpop.permute.xlu1 %7348  ;;  %v5230_v51 = vcombine.high %v14085_v45, %v14085_v45  ;;  %v14141_v20 = vsel %vm12453_vm8, %v13711_v14, %v13713_v10  ;;  %v16846_v26 = vrot.slane %v13988_v16, 7  ;;  %v9221_v30 = vrot.slane %v5026_v11, 7 }
 0x5e9   : > { %16842 = vst [vmem:[#allocation137_spill] sm:$0xff] %v14114_v50  ;;  %16843 = vst [vmem:[#allocation138_spill] sm:$0xff] %v14125_v17  ;;  %v14133_v53 = vrot.slane %v16845_v3, 2  ;;  %v8197_v3 = vcombine.low %v13963_v21, %v13967_v4  ;;  %9958 = vrot.lane.b32.xlu1 %v14141_v20, %s11473_s11  ;;  %v14154_v54 = vpop.permute.xlu0 %7350  ;;  %v14156_v14 = vrot.slane %v5077_v61, 7  ;;  %v16849_v9 = vrot.slane %v13959_v40, 7 }
 0x5ea   : > { %16844 = vst [vmem:[#allocation139_spill] sm:$0xff] %v14127_v28  ;;  %v14148_v8 = vrot.slane %v16846_v26, 2  ;;  %16847 = vst [vmem:[#allocation140_spill] sm:$0xff] %v14154_v54  ;;  %v8110_v28 = vcombine.low %v14111_v34, %v14114_v50  ;;  %v7452_v26 = vcombine.low %v13380_v63, %v13629_v37  ;;  %v9296_v29 = vrot.slane %v14120_v6, 2  ;;  %8588 = vrot.lane.b32.xlu0 %v13722_v47, %s11473_s11  ;;  %v16852_v63 = vld [vmem:[#allocation58_spill] sm:$0xff] }
 0x5eb   : > { %16848 = vst [vmem:[#allocation141_spill] sm:$0xff] %v14156_v14  ;;  %v9293_v57 = vrot.slane %v16849_v9, 2  ;;  %v16850_v4 = vrot.slane %v14085_v45, 7  ;;  %v8065_v11 = vcombine.low %v13955_v7, %v14125_v17  ;;  %v14174_v40 = vrot.slane %v5230_v51, 7  ;;  %v16851_v9 = vld [vmem:[#allocation54_spill] sm:$0xff] }
 0x5ec   : > { %v7353_v54 = vpop.permute.xlu1 %7352  ;;  %v16853_v37 = vcombine.low %v16851_v9, %v16852_v63  ;;  %v9279_v12 = vrot.slane %v13944_v59, 2  ;;  %v14185_v17 = vrot.slane %v8197_v3, %v11837_v49  ;;  %v10856_v47 = vrot.slane %v13568_v58, 9  ;;  %v16858_v9 = vld [vmem:[#allocation59_spill] sm:$0xff] }
 0x5ed   : > { %v14167_v21 = vrot.slane %v16850_v4, 2  ;;  %v7461_v4 = vcombine.low %v13941_v27, %v7353_v54  ;;  %8590 = vrot.lane.b32.xlu1 %v13795_v19, %s11473_s11  ;;  %v14189_v61 = vpop.permute.xlu0 %5975  ;;  %v10857_v51 = vrot.slane %v13699_v32, 9  ;;  %v9223_v7 = vrot.slane %v9221_v30, 2 }
 0x5ee   : > { %v14180_v34 = vrot.slane %v16853_v37, %v11837_v49  ;;  %16855 = vst [vmem:[#allocation143_spill] sm:$0xff] %v14185_v17  ;;  %16856 = vst [vmem:[#allocation144_spill] sm:$0xff] %v14189_v61  ;;  %v16857_v37 = vld [vmem:[#allocation49_spill] sm:$0xff]  ;;  %v14200_v59 = vrot.slane %v8110_v28, %v11837_v49  ;;  %v14203_v54 = vrot.slane %v7452_v26, %v11837_v49  ;;  %v16862_v19 = vrot.slane %v13914_v15, 7 }
 0x5ef   : > { %v14206_v3 = vrot.slane %v7461_v4, %v11837_v49  ;;  %v14209_v61 = vrot.slane %v8065_v11, %v11837_v49  ;;  %9956 = vrot.lane.b32.xlu0 %v13386_v1, %s11473_s11  ;;  %v14221_v28 = vsel %vm12453_vm8, %v13666_v2, %v13668_v35  ;;  %v16866_v11 = vrot.slane %v13906_v56, 7 }
 0x5f0   : > { %16854 = vst [vmem:[#allocation142_spill] sm:$0xff] %v14180_v34  ;;  %v16859_v34 = vcombine.low %v16857_v37, %v16858_v9  ;;  %16860 = vst [vmem:[#allocation145_spill] sm:$0xff] %v14203_v54  ;;  %v9310_v17 = vrot.slane %v16862_v19, 2  ;;  %v14213_v39 = vpop.permute.xlu1 %5977  ;;  %v16867_v9 = vrot.slane %v13870_v0, 7  ;;  %v14247_v35 = vsel %vm12453_vm8, %v13979_v24, %v13981_v38  ;;  %v16881_v19 = vld [vmem:[#allocation69_spill] sm:$0xff] }
 0x5f1   : > { %16861 = vst [vmem:[#allocation146_spill] sm:$0xff] %v14206_v3  ;;  %16863 = vst [vmem:[#allocation147_spill] sm:$0xff] %v14221_v28  ;;  %v14235_v4 = vsel %vm12453_vm8, %v9285_v43, %v16866_v11  ;;  %7392 = vrot.lane.b32.xlu1 %v13361_v60, %s11473_s11  ;;  %v14267_v38 = vsel %vm12453_vm8, %v10857_v51, %v9221_v30  ;;  %v14271_v60 = vcombine.high %v13932_v41, %v13932_v41  ;;  %v16878_v11 = vld [vmem:[#allocation33_spill] sm:$0xff] }
 0x5f2   : > { %v14197_v27 = vrot.slane %v16859_v34, %v11837_v49  ;;  %v16864_v34 = vrot.slane %v13687_v25, 7  ;;  %v14241_v2 = vsel %vm12453_vm8, %v9279_v12, %v16867_v9  ;;  %v14251_v25 = vpop.permute.xlu0 %7354  ;;  %v16871_v12 = vld [vmem:[#allocation109_spill] sm:$0xff]  ;;  %16873 = vst [vmem:[#allocation151_spill] sm:$0xff] %v14267_v38  ;;  %v16876_v9 = vld [vmem:[#allocation72_spill] sm:$0xff]  ;;  %v9307_v37 = vrot.slane %v14042_v44, 2 }
 0x5f3   : > { %16868 = vst [vmem:[#allocation149_spill] sm:$0xff] %v14251_v25  ;;  %v14263_v43 = vsel %vm12453_vm8, %v16871_v12, %v13635_v18  ;;  %16874 = vst [vmem:[#allocation152_spill] sm:$0xff] %v14271_v60  ;;  %8592 = vrot.lane.b32.xlu0 %v13791_v33, %s11473_s11  ;;  %v14329_v44 = vsel %vm12453_vm8, %v14148_v8, %v14156_v14 }
 0x5f4   : > { %v14227_v26 = vsel %vm12453_vm8, %v9223_v7, %v16864_v34  ;;  %v16869_v7 = vrot.slane %v13512_v13, 7  ;;  %16872 = vst [vmem:[#allocation109_spill] sm:$0xff] %v14263_v43  ;;  %v16875_v13 = vrot.slane %v14009_v22, 7  ;;  %v14287_v51 = vpop.permute.xlu1 %5981 }
 0x5f5   : > { %16865 = vst [vmem:[#allocation148_spill] sm:$0xff] %v14227_v26  ;;  %v9416_v30 = vcombine.low %v14221_v28, %v14227_v26  ;;  %16880 = vst [vmem:[#allocation72_spill] sm:$0xff] %v14287_v51  ;;  %v9479_v51 = vcombine.low %v13386_v1, %v14247_v35  ;;  %v10858_v28 = vrot.slane %v14271_v60, 9  ;;  %v14323_v1 = vsel %vm12453_vm8, %v14133_v53, %v14092_v5 }
 0x5f6   : > { %v14257_v0 = vsel %vm12453_vm8, %v10856_v47, %v16869_v7  ;;  %v14275_v24 = vrot.slane %v16875_v13, 2  ;;  %v16877_v47 = vcombine.low %v16876_v9, %v13341_v31  ;;  %v16879_v7 = vld [vmem:[#allocation46_spill] sm:$0xff]  ;;  %v14293_v13 = vcombine.high %v16881_v19, %v16881_v19  ;;  %v14316_v22 = vpop.permute.xlu0 %5979  ;;  %16888 = vst [vmem:[#allocation69_spill] sm:$0xff] %v14323_v1 }
 0x5f7   : > { %16870 = vst [vmem:[#allocation150_spill] sm:$0xff] %v14257_v0  ;;  %v5651_v12 = vcombine.low %v16879_v7, %v16878_v11  ;;  %v9524_v31 = vcombine.low %v14141_v20, %v14235_v4  ;;  %v9434_v9 = vcombine.low %v14068_v62, %v14241_v2  ;;  %v16883_v11 = vld [vmem:[#allocation117_spill] sm:$0xff]  ;;  %v9371_v26 = vcombine.low %v14257_v0, %v14267_v38  ;;  %v16926_v0 = vld [vmem:[#allocation115_spill] sm:$0xff] }
 0x5f8   : > { %v14281_v34 = vrot.slane %v16877_v47, %v11837_v49  ;;  %v16882_v47 = vrot.slane %v16768_v23, 7  ;;  %v16884_v7 = vrot.slane %v16883_v11, 2  ;;  %v16886_v62 = vld [vmem:[#allocation61_spill] sm:$0xff]  ;;  %16887 = vst [vmem:[#allocation46_spill] sm:$0xff] %v14316_v22  ;;  %16889 = vst [vmem:[#allocation117_spill] sm:$0xff] %v14329_v44  ;;  %v16892_v22 = vld [vmem:[#allocation107_spill] sm:$0xff]  ;;  %v14351_v8 = vrot.slane %v9416_v30, %v11837_v49 }
 0x5f9   : > { %6017 = vrot.lane.b32.xlu1 %v16886_v62, %s11473_s11  ;;  %v16890_v62 = vrot.slane %v14085_v45, 7  ;;  %v16895_v38 = vrot.slane %v13713_v10, 2 }
 0x5fa   : > { %v14305_v25 = vsel %vm12453_vm8, %v16884_v7, %v16882_v47  ;;  %v14333_v47 = vcombine.high %v16852_v63, %v16852_v63  ;;  %v14338_v7 = vsel %vm12453_vm8, %v9293_v57, %v14120_v6  ;;  %v14353_v63 = vpop.permute.xlu1 %7356  ;;  %v16896_v57 = vrot.slane %v13951_v55, 7 }
 0x5fb   : > { %16885 = vst [vmem:[#allocation33_spill] sm:$0xff] %v14305_v25  ;;  %v9506_v20 = vcombine.low %v14263_v43, %v14305_v25  ;;  %v14344_v53 = vsel %vm12453_vm8, %v9296_v29, %v16890_v62  ;;  %v14348_v25 = vcombine.high %v16892_v22, %v16892_v22  ;;  %16894 = vst [vmem:[#allocation154_spill] sm:$0xff] %v14353_v63  ;;  %9960 = vrot.lane.b32.xlu0 %v16895_v38, %s11473_s11  ;;  %v16898_v29 = vld [vmem:[#allocation99_spill] sm:$0xff]  ;;  %v16903_v22 = vld [vmem:[#allocation77_spill] sm:$0xff] }
 0x5fc   : > { %16891 = vst [vmem:[#allocation61_spill] sm:$0xff] %v14344_v53  ;;  %v14362_v45 = vsel %vm12453_vm8, %v10858_v28, %v16896_v57  ;;  %v9425_v6 = vcombine.low %v14323_v1, %v16898_v29  ;;  %v16899_v62 = vld [vmem:[#allocation67_spill] sm:$0xff]  ;;  %v16900_v63 = vrot.slane %v13914_v15, 7  ;;  %v14377_v55 = vrot.slane %v9371_v26, %v11837_v49  ;;  %v16902_v28 = vld [vmem:[#allocation56_spill] sm:$0xff] }
 0x5fd   : > { %16893 = vst [vmem:[#allocation153_spill] sm:$0xff] %v14348_v25  ;;  %16897 = vst [vmem:[#allocation155_spill] sm:$0xff] %v14362_v45  ;;  %v9515_v43 = vcombine.low %v14329_v44, %v16899_v62  ;;  %v8181_v57 = vcombine.low %v14271_v60, %v16902_v28  ;;  %v9380_v29 = vcombine.low %v14362_v45, %v16903_v22  ;;  %5659 = vrot.lane.b32.xlu1 %v5651_v12, %s11474_s13  ;;  %v14384_v62 = vpop.permute.xlu0 %7358 }
 0x5fe   : > { %v14374_v38 = vsel %vm12453_vm8, %v9307_v37, %v16900_v63  ;;  %16904 = vst [vmem:[#allocation67_spill] sm:$0xff] %v14384_v62  ;;  %v14387_v15 = vrot.slane %v9506_v20, %v11837_v49  ;;  %v14390_v63 = vrot.slane %v9425_v6, %v11837_v49  ;;  %v16905_v26 = vrot.slane %v13988_v16, 7  ;;  %v16910_v16 = vld [vmem:[#allocation103_spill] sm:$0xff]  ;;  %v14419_v6 = vpop.permute.xlu1 %5985 }
 0x5ff   : > { %16901 = vst [vmem:[#allocation99_spill] sm:$0xff] %v14374_v38  ;;  %v14393_v37 = vrot.slane %v9515_v43, %v11837_v49  ;;  %v16906_v28 = vrot.slane %v14092_v5, 2  ;;  %v14407_v12 = vsel %vm12453_vm8, %v14167_v21, %v14174_v40  ;;  %v14412_v20 = vsel %vm12453_vm8, %v9310_v17, %v14005_v42  ;;  %16911 = vst [vmem:[#allocation103_spill] sm:$0xff] %v14419_v6  ;;  %v16915_v42 = vld [vmem:[#allocation17_spill] sm:$0xff]  ;;  %v16918_v6 = vld [vmem:[#allocation76_spill] sm:$0xff] }
 0x600   : > { %16908 = vst [vmem:[#allocation77_spill] sm:$0xff] %v14407_v12  ;;  %16909 = vst [vmem:[#allocation156_spill] sm:$0xff] %v14412_v20  ;;  %v14415_v43 = vrot.slane %v9380_v29, %v11837_v49  ;;  %v14433_v29 = vcombine.high %v14114_v50, %v14114_v50  ;;  %v14450_v44 = vrot.slane %v9524_v31, %v11837_v49  ;;  %v16938_v50 = vrot.slane %v14156_v14, 2  ;;  %v16947_v14 = vld [vmem:[#allocation119_spill] sm:$0xff] }
 0x601   : > { %v14401_v22 = vsel %vm12453_vm8, %v16906_v28, %v16905_v26  ;;  %v16912_v26 = vld [vmem:[#allocation73_spill] sm:$0xff]  ;;  %v16914_v28 = vld [vmem:[#allocation15_spill] sm:$0xff]  ;;  %v14445_v17 = vpop.permute.xlu0 %5983  ;;  %v16919_v1 = vcombine.low %v13568_v58, %v13699_v32  ;;  %v8188_v21 = vrot.slane %v8181_v57, %v11837_v49  ;;  %v14458_v60 = vrot.slane %v9434_v9, %v11837_v49  ;;  %v16925_v32 = vld [vmem:[#allocation122_spill] sm:$0xff] }
 0x602   : > { %16907 = vst [vmem:[#allocation56_spill] sm:$0xff] %v14401_v22  ;;  %v9470_v5 = vcombine.low %v14401_v22, %v16910_v16  ;;  %7394 = vrot.lane.b32.xlu0 %v16912_v26, %s11473_s11  ;;  %v16913_v16 = vld [vmem:[#allocation85_spill] sm:$0xff]  ;;  %v9443_v26 = vcombine.low %v14338_v7, %v14374_v38  ;;  %v16916_v62 = vcombine.low %v16914_v28, %v16915_v42  ;;  %16917 = vst [vmem:[#allocation73_spill] sm:$0xff] %v14445_v17  ;;  %v14467_v42 = vpop.permute.xlu1 %7360  ;;  %v16921_v22 = vld [vmem:[#allocation74_spill] sm:$0xff] }
 0x603   : > { %v8038_v30 = vcombine.low %v16913_v16, %v14348_v25  ;;  %v8180_v45 = vrot.slane %v16919_v1, %v11837_v49  ;;  %v9533_v28 = vcombine.low %v14407_v12, %v14103_v46  ;;  %v9488_v31 = vcombine.low %v14344_v53, %v14412_v20  ;;  %16920 = vst [vmem:[#allocation85_spill] sm:$0xff] %v14467_v42  ;;  %v16928_v9 = vld [vmem:[#allocation78_spill] sm:$0xff]  ;;  %v16929_v12 = vld [vmem:[#allocation80_spill] sm:$0xff]  ;;  %v16934_v53 = vld [vmem:[#allocation81_spill] sm:$0xff] }
 0x604   : > { %5694 = vrot.lane.b32.xlu1 %v16916_v62, %s11475_s27  ;;  %v14461_v62 = vrot.slane %v9479_v51, %v11837_v49  ;;  %v16922_v1 = vrot.slane %v13906_v56, 7  ;;  %v16923_v51 = vld [vmem:[#allocation108_spill] sm:$0xff]  ;;  %v9450_v25 = vrot.slane %v9443_v26, %v11837_v49  ;;  %v16932_v26 = vld [vmem:[#allocation143_spill] sm:$0xff] }
 0x605   : > { %v16924_v17 = vcombine.low %v16923_v51, %v13791_v33  ;;  %v8485_v46 = vcombine.low %v8180_v45, %v8188_v21  ;;  %v8045_v42 = vrot.slane %v8038_v30, %v11837_v49  ;;  %v16930_v33 = vcombine.low %v16928_v9, %v16929_v12  ;;  %v14494_v45 = vpop.permute.xlu0 %7362  ;;  %v16931_v21 = vld [vmem:[#allocation133_spill] sm:$0xff] }
 0x606   : > { %6019 = vrot.lane.b32.xlu0 %v16921_v22, %s11473_s11  ;;  %v14473_v57 = vrot.slane %v16922_v1, 2  ;;  %v14488_v1 = vsel %vm12453_vm8, %v16926_v0, %v16883_v11  ;;  %v10865_v30 = vcombine.high %v14377_v55, %v14415_v43  ;;  %v14503_v0 = vrot.slane %v9533_v28, %v11837_v49 }
 0x607   : > { %v8196_v38 = vrot.slane %v16924_v17, %v11837_v49  ;;  %16927 = vst [vmem:[#allocation15_spill] sm:$0xff] %v14488_v1  ;;  %v10866_v17 = vcombine.high %v16931_v21, %v14117_v48  ;;  %v14506_v11 = vrot.slane %v9488_v31, %v11837_v49  ;;  %v8276_v12 = vcombine.low %v8045_v42, %v14197_v27  ;;  %v16937_v31 = vld [vmem:[#allocation104_spill] sm:$0xff] }
 0x608   : > { %5729 = vrot.lane.b32.xlu1 %v16930_v33, %s11476_s14  ;;  %v8277_v9 = vcombine.low %v14281_v34, %v14209_v61  ;;  %v14511_v33 = vpop.permute.xlu1 %5989  ;;  %v14518_v20 = vrot.slane %v8485_v46, %v11824_v36  ;;  %v14526_v3 = vcombine.low %v16938_v50, %v16937_v31  ;;  %v9655_v54 = vcombine.low %v14458_v60, %v9450_v25 }
 0x609   : > { %v8486_v51 = vcombine.low %v8196_v38, %v16932_v26  ;;  %16933 = vst [vmem:[#allocation17_spill] sm:$0xff] %v14511_v33  ;;  %v16935_v38 = vld [vmem:[#allocation126_spill] sm:$0xff]  ;;  %v10868_v33 = vcombine.high %v14458_v60, %v9450_v25  ;;  %v14538_v46 = vpop.permute.xlu0 %5987  ;;  %v14544_v31 = vrot.slane %v10865_v30, %v11824_v36  ;;  %v14547_v25 = vrot.slane %v10866_v17, %v11824_v36 }
 0x60a   : > { %7398 = vrot.lane.b32.xlu0 %v16934_v53, %s11473_s11  ;;  %v9461_v26 = vcombine.low %v16935_v38, %v14488_v1  ;;  %v14531_v53 = vrot.slane %v8276_v12, %v11824_v36  ;;  %v14534_v1 = vrot.slane %v8277_v9, %v11824_v36  ;;  %v9795_v60 = vcombine.low %v14450_v44, %v14503_v0 }
 0x60b   : > { %v14521_v28 = vrot.slane %v8486_v51, %v11824_v36  ;;  %v9477_v51 = vrot.slane %v9470_v5, %v11837_v49  ;;  %16941 = vst [vmem:[#allocation122_spill] sm:$0xff] %v14544_v31  ;;  %16942 = vst [vmem:[#allocation115_spill] sm:$0xff] %v14547_v25  ;;  %v10872_v12 = vcombine.high %v14450_v44, %v14503_v0 }
 0x60c   : > { %16939 = vst [vmem:[#allocation74_spill] sm:$0xff] %v14531_v53  ;;  %16940 = vst [vmem:[#allocation108_spill] sm:$0xff] %v14534_v1  ;;  %6021 = vrot.lane.b32.xlu1 %v16881_v19, %s11473_s11  ;;  %v9725_v19 = vcombine.low %v14461_v62, %v14506_v11  ;;  %v14557_v9 = vpop.permute.xlu1 %7364  ;;  %v9468_v17 = vrot.slane %v9461_v26, %v11837_v49  ;;  %v10838_v50 = vcombine.high %v8045_v42, %v14197_v27  ;;  %v16945_v1 = vld [vmem:[#allocation142_spill] sm:$0xff]  ;;  %v16946_v53 = vld [vmem:[#allocation112_spill] sm:$0xff] }
 0x60d   : > { %16936 = vst [vmem:[#allocation76_spill] sm:$0xff] %v14521_v28  ;;  %16943 = vst [vmem:[#allocation78_spill] sm:$0xff] %v14557_v9  ;;  %v10839_v44 = vcombine.high %v14281_v34, %v14209_v61  ;;  %v16944_v0 = vcombine.low %v14351_v8, %v14390_v63  ;;  %v14574_v9 = vrot.slane %v9655_v54, %v11824_v36  ;;  %v16948_v27 = vld [vmem:[#allocation34_spill] sm:$0xff]  ;;  %v14582_v42 = vpop.permute.xlu0 %7366 }
 0x60e   : > { %6023 = vrot.lane.b32.xlu0 %v14293_v13, %s11473_s11  ;;  %v8346_v26 = vcombine.low %v16946_v53, %v16945_v1  ;;  %v8347_v30 = vcombine.low %v16947_v14, %v14200_v59  ;;  %16949 = vst [vmem:[#allocation80_spill] sm:$0xff] %v14582_v42  ;;  %v9724_v61 = vcombine.low %v9468_v17, %v9477_v51  ;;  %v16953_v28 = vld [vmem:[#allocation30_spill] sm:$0xff] }
 0x60f   : > { %v14571_v5 = vrot.slane %v16944_v0, %v11824_v36  ;;  %v14585_v34 = vrot.slane %v10838_v50, %v11824_v36  ;;  %v14588_v0 = vrot.slane %v10839_v44, %v11824_v36  ;;  %v16950_v54 = vcombine.high %v14351_v8, %v14390_v63 }
 0x610   : > { %7396 = vrot.lane.b32.xlu1 %v16948_v27, %s11473_s11  ;;  %v14599_v27 = vrot.slane %v8346_v26, %v11824_v36  ;;  %v14602_v42 = vrot.slane %v8347_v30, %v11824_v36  ;;  %v14605_v50 = vrot.slane %v10868_v33, %v11824_v36  ;;  %v14607_v44 = vpop.permute.xlu1 %5993  ;;  %v16954_v8 = vrot.slane %v16768_v23, 7 }
 0x611   : > { %v14594_v25 = vrot.slane %v16950_v54, %v11824_v36  ;;  %16952 = vst [vmem:[#allocation143_spill] sm:$0xff] %v14607_v44  ;;  %v10840_v26 = vcombine.high %v16946_v53, %v16945_v1  ;;  %v10841_v30 = vcombine.high %v16947_v14, %v14200_v59  ;;  %v10869_v33 = vcombine.high %v9468_v17, %v9477_v51  ;;  %v14630_v54 = vpop.permute.xlu0 %5991  ;;  %v14632_v44 = vpop.f32.mrb[58].mxu1  ;;  %v16961_v51 = vld [vmem:[#allocation89_spill] sm:$0xff] }
 0x612   : > { %16951 = vst [vmem:[#allocation133_spill] sm:$0xff] %v14605_v50  ;;  %8596 = vrot.lane.b32.xlu0 %v16953_v28, %s11473_s11  ;;  %v14613_v63 = vrot.slane %v16954_v8, 2  ;;  %v14626_v23 = vrot.slane %v9725_v19, %v11824_v36  ;;  %v16956_v8 = vld [vmem:[#allocation45_spill] sm:$0xff]  ;;  %16957 = vst [vmem:[#allocation126_spill] sm:$0xff] %v14630_v54  ;;  %v10870_v14 = vcombine.high %v14461_v62, %v14506_v11  ;;  %v16962_v19 = vld [vmem:[#allocation116_spill] sm:$0xff] }
 0x613   : > { %v14637_v59 = vrot.slane %v10840_v26, %v11824_v36  ;;  %v14640_v1 = vrot.slane %v10841_v30, %v11824_v36  ;;  %v14643_v53 = vrot.slane %v9724_v61, %v11824_v36  ;;  %v16963_v17 = vcombine.low %v16961_v51, %v16962_v19  ;;  %v16964_v28 = vld [vmem:[#allocation31_spill] sm:$0xff]  ;;  %v11151_v26 = vpop.f32.mrb[59].mxu1 }
 0x614   : > { %16955 = vst [vmem:[#allocation81_spill] sm:$0xff] %v14626_v23  ;;  %9962 = vrot.lane.b32.xlu1 %v16956_v8, %s11473_s11  ;;  %v5763_v31 = vrot.slane %v16964_v28, %v11824_v36  ;;  %v16965_v62 = vcombine.low %v16925_v32, %v14433_v29  ;;  %v16966_v30 = vcombine.low %v13932_v41, %v14333_v47  ;;  %v14659_v54 = vpop.permute.xlu1 %7368 }
 0x615   : > { %16958 = vst [vmem:[#allocation104_spill] sm:$0xff] %v14637_v59  ;;  %16959 = vst [vmem:[#allocation142_spill] sm:$0xff] %v14640_v1  ;;  %v8153_v8 = vrot.slane %v16963_v17, %v11837_v49  ;;  %v16968_v51 = vrot.slane %v16918_v6, %v11824_v36  ;;  %v16974_v17 = vrot.slane %v13635_v18, 2  ;;  %v14694_v59 = vpop.permute.xlu0 %7370  ;;  %v14710_v50 = vrot.slane %v10872_v12, %v11824_v36  ;;  %v16985_v12 = vld [vmem:[#allocation114_spill] sm:$0xff] }
 0x616   : > { %16960 = vst [vmem:[#allocation112_spill] sm:$0xff] %v14643_v53  ;;  %v8162_v11 = vrot.slane %v16965_v62, %v11837_v49  ;;  %v8144_v61 = vrot.slane %v16966_v30, %v11837_v49  ;;  %16967 = vst [vmem:[#allocation119_spill] sm:$0xff] %v14659_v54  ;;  %v16969_v62 = vcombine.low %v14387_v15, %v14393_v37  ;;  %v16972_v54 = vrot.slane %v13713_v10, 2  ;;  %v14696_v10 = vpop.f32.mrb[60].mxu1 }
 0x617   : > { %5661 = vrot.lane.b32.xlu0 %v16968_v51, %s11474_s13  ;;  %v14676_v30 = vrot.slane %v9795_v60, %v11824_v36  ;;  %v16973_v51 = vrot.slane %v14174_v40, 2  ;;  %v9551_v23 = vcombine.low %v16974_v17, %v14613_v63  ;;  %v14688_v53 = vrot.slane %v10869_v33, %v11824_v36  ;;  %v16977_v60 = vld [vmem:[#allocation92_spill] sm:$0xff]  ;;  %16979 = vst [vmem:[#allocation89_spill] sm:$0xff] %v14694_v59 }
 0x618   : > { %v14673_v26 = vrot.slane %v16969_v62, %v11824_v36  ;;  %v9567_v6 = vcombine.low %v16972_v54, %v14473_v57  ;;  %v16976_v62 = vld [vmem:[#allocation91_spill] sm:$0xff]  ;;  %v16981_v33 = vcombine.high %v14387_v15, %v14393_v37  ;;  %v9566_v54 = vrot.slane %v14526_v3, %v11837_v49  ;;  %v14718_v59 = vpop.permute.xlu1 %7372 }
 0x619   : > { %16971 = vst [vmem:[#allocation30_spill] sm:$0xff] %v14676_v30  ;;  %v9575_v19 = vcombine.low %v16973_v51, %v14275_v24  ;;  %16975 = vst [vmem:[#allocation45_spill] sm:$0xff] %v14688_v53  ;;  %v16978_v1 = vcombine.low %v16976_v62, %v16977_v60  ;;  %v14701_v51 = vrot.slane %v10870_v14, %v11824_v36  ;;  %v11154_v60 = vpop.f32.mrb[61].mxu1  ;;  %v16986_v30 = vld [vmem:[#allocation35_spill] sm:$0xff]  ;;  %v14734_v15 = vpop.permute.xlu0 %5995 }
 0x61a   : > { %16970 = vst [vmem:[#allocation34_spill] sm:$0xff] %v14673_v26  ;;  %v14707_v17 = vrot.slane %v16981_v33, %v11824_v36  ;;  %16983 = vst [vmem:[#allocation91_spill] sm:$0xff] %v14710_v50  ;;  %v8416_v14 = vcombine.low %v16985_v12, %v8144_v61  ;;  %v8417_v33 = vcombine.low %v8153_v8, %v8162_v11 }
 0x61b   : > { %5764 = vrot.lane.b32.xlu1 %v16978_v1, %s11477_s25  ;;  %16980 = vst [vmem:[#allocation116_spill] sm:$0xff] %v14701_v51  ;;  %v16984_v1 = vld [vmem:[#allocation32_spill] sm:$0xff]  ;;  %5766 = vrot.lane.b32.xlu0 %v5763_v31, %s11477_s25  ;;  %v9574_v60 = vrot.slane %v9567_v6, %v11837_v49  ;;  %v9582_v3 = vrot.slane %v9575_v19, %v11837_v49  ;;  %v16987_v31 = vld [vmem:[#allocation93_spill] sm:$0xff]  ;;  %16989 = vst [vmem:[#allocation92_spill] sm:$0xff] %v14734_v15 }
 0x61c   : > { %16982 = vst [vmem:[#allocation31_spill] sm:$0xff] %v14707_v17  ;;  %v14714_v62 = vrot.slane %v16984_v1, %v11824_v36  ;;  %v16988_v26 = vcombine.low %v16986_v30, %v16987_v31  ;;  %v9558_v37 = vrot.slane %v9551_v23, %v11837_v49  ;;  %v14738_v50 = vrot.slane %v8416_v14, %v11824_v36  ;;  %v14744_v19 = vpop.permute.xlu1 %5997  ;;  %v17017_v31 = vld [vmem:[#allocation20_spill] sm:$0xff]  ;;  %v17061_v15 = vld [vmem:[#allocation55_spill] sm:$0xff] }
 0x61d   : > { %v14741_v17 = vrot.slane %v8417_v33, %v11824_v36  ;;  %v10842_v6 = vcombine.high %v16985_v12, %v8144_v61  ;;  %v10843_v51 = vcombine.high %v8153_v8, %v8162_v11  ;;  %v9864_v33 = vcombine.low %v9574_v60, %v9582_v3  ;;  %v16994_v61 = vld [vmem:[#allocation97_spill] sm:$0xff]  ;;  %v16995_v8 = vld [vmem:[#allocation98_spill] sm:$0xff]  ;;  %v14759_v12 = vpop.permute.xlu0 %8572 }
 0x61e   : > { %v5902_v1 = vrot.slane %v14714_v62, %v11824_v36  ;;  %16990 = vst [vmem:[#allocation32_spill] sm:$0xff] %v14738_v50  ;;  %v9863_v23 = vcombine.low %v9558_v37, %v9566_v54  ;;  %v16996_v11 = vcombine.low %v16994_v61, %v16995_v8  ;;  %16997 = vst [vmem:[#allocation97_spill] sm:$0xff] %v14759_v12 }
 0x61f   : > { %5799 = vrot.lane.b32.xlu1 %v16988_v26, %s11478_s28  ;;  %16991 = vst [vmem:[#allocation114_spill] sm:$0xff] %v14741_v17  ;;  %v14750_v30 = vrot.slane %v10842_v6, %v11824_v36  ;;  %v14753_v14 = vrot.slane %v10843_v51, %v11824_v36  ;;  %v9878_v6 = vrot.slane %v9864_v33, %v11824_v36  ;;  %v17016_v33 = vld [vmem:[#allocation19_spill] sm:$0xff] }
 0x620   : > { %5905 = vrot.lane.b32.xlu0 %v5902_v1, %s11479_s15  ;;  %v9871_v1 = vrot.slane %v9863_v23, %v11824_v36  ;;  %v16998_v54 = vcombine.low %v14377_v55, %v14415_v43  ;;  %v17000_v37 = vcombine.low %v16931_v21, %v14117_v48  ;;  %v14777_v3 = vpop.permute.xlu1 %6001  ;;  %v17003_v55 = vld [vmem:[#allocation101_spill] sm:$0xff]  ;;  %v17004_v43 = vld [vmem:[#allocation102_spill] sm:$0xff]  ;;  %v17007_v48 = vmov 0.0  }
 0x621   : > { %16992 = vst [vmem:[#allocation35_spill] sm:$0xff] %v14750_v30  ;;  %16993 = vst [vmem:[#allocation93_spill] sm:$0xff] %v14753_v14  ;;  %v17005_v61 = vcombine.low %v17003_v55, %v17004_v43  ;;  %v14789_v8 = vpop.permute.xlu0 %7374  ;;  %v5521_v21 = vcombine.high %v16964_v28, %v17007_v48  ;;  %v17010_v28 = vld [vmem:[#allocation68_spill] sm:$0xff]  ;;  %v4957_v43 = vcombine.high %v14714_v62, %v14714_v62 }
 0x622   : > { %v14769_v51 = vrot.slane %v16998_v54, %v11824_v36  ;;  %v14775_v60 = vrot.slane %v17000_v37, %v11824_v36  ;;  %v14781_v23 = vcombine.low %v9871_v1, %v9878_v6  ;;  %17006 = vst [vmem:[#allocation101_spill] sm:$0xff] %v14789_v8  ;;  %v5565_v6 = vrot.slane %v14293_v13, %v11837_v49 }
 0x623   : > { %5834 = vrot.lane.b32.xlu1 %v16996_v11, %s11480_s21  ;;  %v5798_v1 = vrot.slane %v5521_v21, %v11824_v36  ;;  %v17011_v37 = vrot.slane %v17010_v28, 2  ;;  %v14827_v28 = vrot.slane %v4957_v43, 7  ;;  %v5475_v43 = vrot.slane %v16921_v22, %v11837_v49 }
 0x624   : > { %16999 = vst [vmem:[#allocation98_spill] sm:$0xff] %v14769_v51  ;;  %17001 = vst [vmem:[#allocation157_spill] sm:$0xff] %v14775_v60  ;;  %8600 = vrot.lane.b32.xlu0 %v16925_v32, %s11473_s11  ;;  %v14793_v11 = vpop.permute.xlu1 %7376  ;;  %v5566_v26 = vcombine.high %v5565_v6, %v17007_v48 }
 0x625   : > { %17002 = vst [vmem:[#allocation158_spill] sm:$0xff] %v14781_v23  ;;  %17008 = vst [vmem:[#allocation102_spill] sm:$0xff] %v14793_v11  ;;  %v14799_v32 = vpop.permute.xlu0 %5999 }
 0x627   : > { %5869 = vrot.lane.b32.xlu1 %v17005_v61, %s11481_s9  ;;  %v14817_v61 = vcombine.high %v13906_v56, %v13906_v56  ;;  %v17018_v56 = vcombine.low %v17016_v33, %v17017_v31  ;;  %v5868_v31 = vrot.slane %v5566_v26, %v11824_v36 }
 0x628   : > { %9968 = vrot.lane.b32.xlu0 %v14235_v4, %s11473_s11  ;;  %v14804_v54 = vpop.permute.xlu1 %9942  ;;  %v5833_v4 = vrot.slane %v5565_v6, %v11824_v36  ;;  %v5693_v6 = vrot.slane %v5475_v43, %v11824_v36 }
 0x629   : > { %17009 = vst [vmem:[#allocation159_spill] sm:$0xff] %v14804_v54  ;;  %v14810_v55 = vpop.permute.xlu0 %7378 }
 0x62a   : > { %17012 = vst [vmem:[#allocation68_spill] sm:$0xff] %v14810_v55 }
 0x62b   : > { %6025 = vrot.lane.b32.xlu1 %v14714_v62, %s11473_s11 }
 0x62c   : > { %5801 = vrot.lane.b32.xlu0 %v5798_v1, %s11478_s28  ;;  %v14819_v13 = vpop.permute.xlu1 %6005  ;;  %v10815_v1 = vrot.slane %v14714_v62, 9 }
 0x62d   : > { %17013 = vst [vmem:[#allocation160_spill] sm:$0xff] %v14819_v13  ;;  %v14824_v21 = vpop.permute.xlu0 %6003  ;;  %v17065_v13 = vld [vmem:[#allocation118_spill] sm:$0xff] }
 0x62e   : > { %17014 = vst [vmem:[#allocation161_spill] sm:$0xff] %v14824_v21  ;;  %v14843_v62 = vsel %vm12453_vm8, %v10815_v1, %v14827_v28  ;;  %v17119_v21 = vld [vmem:[#allocation40_spill] sm:$0xff] }
 0x62f   : > { %7400 = vrot.lane.b32.xlu1 %v17011_v37, %s11473_s11 }
 0x630   : > { %5836 = vrot.lane.b32.xlu0 %v5833_v4, %s11480_s21  ;;  %v14829_v37 = vpop.permute.xlu1 %7380 }
 0x631   : > { %17015 = vst [vmem:[#allocation162_spill] sm:$0xff] %v14829_v37  ;;  %v14837_v4 = vpop.permute.xlu0 %8576  ;;  %v17052_v37 = vld [vmem:[#allocation86_spill] sm:$0xff] }
 0x632   : > { %17019 = vst [vmem:[#allocation19_spill] sm:$0xff] %v14837_v4  ;;  %v17030_v4 = vld [vmem:[#allocation48_spill] sm:$0xff] }
 0x633   : > { %8594 = vrot.lane.b32.xlu1 %v14817_v61, %s11473_s11 }
 0x634   : > { %7053 = vrot.lane.b32.xlu0 %v17018_v56, %s11474_s13  ;;  %v14847_v60 = vpop.permute.xlu1 %8574  ;;  %v17025_v56 = vld [vmem:[#allocation111_spill] sm:$0xff] }
 0x637   : > { %9964 = vrot.lane.b32.xlu1 %v14241_v2, %s11473_s11  ;;  %v14853_v2 = vpop.permute.xlu0 %8580 }
 0x638   : > { %7402 = vrot.lane.b32.xlu0 %v14843_v62, %s11473_s11  ;;  %17020 = vst [vmem:[#allocation20_spill] sm:$0xff] %v14853_v2  ;;  %v14856_v33 = vpop.permute.xlu1 %9944  ;;  %v17027_v2 = vld [vmem:[#allocation71_spill] sm:$0xff] }
 0x639   : > { %17021 = vst [vmem:[#allocation163_spill] sm:$0xff] %v14856_v33 }
 0x63b   : > { %9966 = vrot.lane.b32.xlu1 %v14247_v35, %s11473_s11  ;;  %v14861_v22 = vpop.permute.xlu0 %9948  ;;  %v17024_v35 = vld [vmem:[#allocation110_spill] sm:$0xff] }
 0x63c   : > { %5871 = vrot.lane.b32.xlu0 %v5868_v31, %s11481_s9  ;;  %17022 = vst [vmem:[#allocation164_spill] sm:$0xff] %v14861_v22  ;;  %v14863_v1 = vpop.permute.xlu1 %9946  ;;  %v17026_v51 = vcombine.low %v17024_v35, %v17025_v56  ;;  %v6732_v31 = vrot.slane %v17027_v2, 7  ;;  %v17034_v2 = vld [vmem:[#allocation21_spill] sm:$0xff] }
 0x63d   : > { %17023 = vst [vmem:[#allocation165_spill] sm:$0xff] %v14863_v1  ;;  %v6085_v1 = vcombine.low %v14213_v39, %v14538_v46 }
 0x63e   : > { %v6734_v35 = vrot.slane %v6732_v31, 2 }
 0x63f   : > { %5696 = vrot.lane.b32.xlu1 %v5693_v6, %s11475_s27  ;;  %v14871_v26 = vpop.permute.xlu0 %7382  ;;  %v17029_v6 = vld [vmem:[#allocation37_spill] sm:$0xff] }
 0x640   : > { %8536 = vrot.lane.b32.xlu0 %v16913_v16, %s11473_s11  ;;  %v14874_v33 = vpop.permute.xlu1 %8578  ;;  %v17031_v22 = vcombine.low %v17029_v6, %v17030_v4  ;;  %v17032_v16 = vld [vmem:[#allocation136_spill] sm:$0xff]  ;;  %v5476_v4 = vcombine.high %v5475_v43, %v17007_v48 }
 0x641   : > { %17028 = vst [vmem:[#allocation110_spill] sm:$0xff] %v14874_v33  ;;  %v17035_v33 = vld [vmem:[#allocation27_spill] sm:$0xff]  ;;  %v17041_v6 = vld [vmem:[#allocation124_spill] sm:$0xff] }
 0x642   : > { %v17036_v54 = vcombine.low %v17034_v2, %v17035_v33  ;;  %v5728_v33 = vrot.slane %v5476_v4, %v11824_v36 }
 0x643   : > { %5903 = vrot.lane.b32.xlu1 %v17026_v51, %s11479_s15  ;;  %v6008_v12 = vpop.permute.xlu0 %6007 }
 0x644   : > { %7088 = vrot.lane.b32.xlu0 %v17031_v22, %s11475_s27  ;;  %v6094_v51 = vcombine.low %v14744_v19, %v6008_v12  ;;  %v14885_v56 = vpop.permute.xlu1 %9950  ;;  %v14893_v22 = vrot.slane %v6085_v1, %v11837_v49  ;;  %v17038_v12 = vld [vmem:[#allocation82_spill] sm:$0xff] }
 0x645   : > { %17033 = vst [vmem:[#allocation111_spill] sm:$0xff] %v14885_v56  ;;  %v17046_v56 = vld [vmem:[#allocation83_spill] sm:$0xff] }
 0x646   : > { %v14896_v39 = vrot.slane %v6094_v51, %v11837_v49  ;;  %v17047_v4 = vrot.slane %v17046_v56, 7 }
 0x647   : > { %8598 = vrot.lane.b32.xlu1 %v17032_v16, %s11473_s11  ;;  %v14900_v46 = vpop.permute.xlu0 %7386  ;;  %v17042_v16 = vld [vmem:[#allocation125_spill] sm:$0xff] }
 0x648   : > { %7123 = vrot.lane.b32.xlu0 %v17036_v54, %s11476_s14  ;;  %17037 = vst [vmem:[#allocation71_spill] sm:$0xff] %v14900_v46  ;;  %v6285_v19 = vcombine.low %v14893_v22, %v14896_v39  ;;  %v14907_v54 = vsel %vm12453_vm8, %v6734_v35, %v17038_v12  ;;  %v14909_v43 = vpop.permute.xlu1 %8582  ;;  %v17043_v51 = vcombine.low %v17041_v6, %v17042_v16  ;;  %v17045_v12 = vld [vmem:[#allocation128_spill] sm:$0xff]  ;;  %v17055_v46 = vld [vmem:[#allocation95_spill] sm:$0xff] }
 0x649   : > { %17039 = vst [vmem:[#allocation37_spill] sm:$0xff] %v14909_v43  ;;  %v6740_v43 = vrot.slane %v17047_v4, 2 }
 0x64a   : > { %v14915_v1 = vrot.slane %v6285_v19, %v11824_v36  ;;  %v14924_v35 = vrot.slane %v17043_v51, %v11824_v36  ;;  %v17048_v19 = vld [vmem:[#allocation22_spill] sm:$0xff]  ;;  %v14940_v51 = vcombine.high %v17046_v56, %v17046_v56 }
 0x64b   : > { %9970 = vrot.lane.b32.xlu1 %v14473_v57, %s11473_s11  ;;  %v14918_v57 = vpop.permute.xlu0 %9952 }
 0x64c   : > { %7406 = vrot.lane.b32.xlu0 %v14907_v54, %s11473_s11  ;;  %17040 = vst [vmem:[#allocation48_spill] sm:$0xff] %v14915_v1  ;;  %17044 = vst [vmem:[#allocation136_spill] sm:$0xff] %v14924_v35  ;;  %v14926_v2 = vpop.permute.xlu1 %6009 }
 0x64f   : > { %5731 = vrot.lane.b32.xlu1 %v5728_v33, %s11476_s14  ;;  %v14934_v33 = vpop.permute.xlu0 %6011 }
 0x650   : > { %9972 = vrot.lane.b32.xlu0 %v17045_v12, %s11473_s11  ;;  %v14942_v55 = vpop.permute.xlu1 %7384  ;;  %v6731_v12 = vrot.slane %v14827_v28, 2 }
 0x651   : > { %17049 = vst [vmem:[#allocation21_spill] sm:$0xff] %v14942_v55  ;;  %v17059_v55 = vld [vmem:[#allocation23_spill] sm:$0xff] }
 0x652   : > { %v6733_v56 = vsel %vm12453_vm8, %v6731_v12, %v6732_v31  ;;  %v17058_v12 = vld [vmem:[#allocation51_spill] sm:$0xff] }
 0x653   : > { %8602 = vrot.lane.b32.xlu1 %v17048_v19, %s11473_s11  ;;  %v14948_v4 = vpop.permute.xlu0 %7390  ;;  %v5282_v19 = vcombine.high %v14632_v44, %v14632_v44 }
 0x654   : > { %7410 = vrot.lane.b32.xlu0 %v6740_v43, %s11473_s11  ;;  %17050 = vst [vmem:[#allocation27_spill] sm:$0xff] %v14948_v4  ;;  %v14952_v11 = vpop.permute.xlu1 %6013  ;;  %v17054_v4 = vld [vmem:[#allocation50_spill] sm:$0xff] }
 0x655   : > { %17051 = vst [vmem:[#allocation82_spill] sm:$0xff] %v14952_v11  ;;  %v14962_v28 = vrot.slane %v5282_v19, %v11824_v36  ;;  %v17060_v19 = vcombine.low %v17058_v12, %v17059_v55  ;;  %v7296_v55 = vrot.slane %v6740_v43, %v11824_v36 }
 0x657   : > { %8534 = vrot.lane.b32.xlu1 %v14940_v51, %s11473_s11  ;;  %v14959_v1 = vpop.permute.xlu0 %8584 }
 0x658   : > { %8540 = vrot.lane.b32.xlu0 %v17052_v37, %s11473_s11  ;;  %v14964_v35 = vpop.permute.xlu1 %7388  ;;  %v5298_v37 = vcombine.high %v14962_v28, %v14962_v28 }
 0x659   : > { %17053 = vst [vmem:[#allocation124_spill] sm:$0xff] %v14964_v35  ;;  %v14982_v35 = vrot.slane %v14696_v10, %v11824_v36 }
 0x65b   : > { %7404 = vrot.lane.b32.xlu1 %v6733_v56, %s11473_s11  ;;  %v14970_v8 = vpop.permute.xlu0 %9954  ;;  %v16553_v12 = vrot.slane %v14982_v35, 7 }
 0x65c   : > { %8604 = vrot.lane.b32.xlu0 %v17054_v4, %s11473_s11  ;;  %17056 = vst [vmem:[#allocation125_spill] sm:$0xff] %v14970_v8  ;;  %v14974_v31 = vpop.permute.xlu1 %8586  ;;  %v14988_v8 = vrot.slane %v5298_v37, 7  ;;  %v15004_v37 = vrot.slane %v14843_v62, %v11837_v49  ;;  %v7470_v62 = vcombine.low %v14494_v45, %v14718_v59  ;;  %v6869_v59 = vrot.slane %v6733_v56, %v11837_v49 }
 0x65d   : > { %17057 = vst [vmem:[#allocation128_spill] sm:$0xff] %v14974_v31  ;;  %v17064_v31 = vld [vmem:[#allocation41_spill] sm:$0xff] }
 0x65e   : > { %v17066_v14 = vcombine.low %v17064_v31, %v17065_v13  ;;  %v17070_v13 = vld [vmem:[#allocation26_spill] sm:$0xff] }
 0x65f   : > { %8538 = vrot.lane.b32.xlu1 %v17055_v46, %s11473_s11  ;;  %v14986_v46 = vpop.permute.xlu0 %6015 }
 0x660   : > { %7158 = vrot.lane.b32.xlu0 %v17060_v19, %s11477_s25  ;;  %17062 = vst [vmem:[#allocation83_spill] sm:$0xff] %v14986_v46  ;;  %v14990_v23 = vpop.permute.xlu1 %9958  ;;  %v9324_v19 = vrot.slane %v14988_v8, 2  ;;  %v17069_v46 = vld [vmem:[#allocation24_spill] sm:$0xff] }
 0x661   : > { %17063 = vst [vmem:[#allocation22_spill] sm:$0xff] %v14990_v23 }
 0x662   : > { %v15016_v43 = vsel %vm12453_vm8, %v9324_v19, %v16553_v12  ;;  %v17076_v12 = vld [vmem:[#allocation138_spill] sm:$0xff] }
 0x663   : > { %7408 = vrot.lane.b32.xlu1 %v17061_v15, %s11473_s11  ;;  %v14999_v10 = vpop.permute.xlu0 %8588 }
 0x664   : > { %7193 = vrot.lane.b32.xlu0 %v17066_v14, %s11478_s28  ;;  %17067 = vst [vmem:[#allocation86_spill] sm:$0xff] %v14999_v10  ;;  %v15006_v23 = vpop.permute.xlu1 %8590  ;;  %v17071_v14 = vcombine.low %v17069_v46, %v17070_v13  ;;  %v17073_v46 = vld [vmem:[#allocation120_spill] sm:$0xff]  ;;  %v17074_v13 = vld [vmem:[#allocation121_spill] sm:$0xff] }
 0x665   : > { %17068 = vst [vmem:[#allocation50_spill] sm:$0xff] %v15006_v23 }
 0x667   : > { %7299 = vrot.lane.b32.xlu1 %v7296_v55, %s11479_s15  ;;  %v15020_v31 = vpop.permute.xlu0 %9956  ;;  %v6825_v55 = vcombine.high %v15004_v37, %v17007_v48 }
 0x668   : > { %7228 = vrot.lane.b32.xlu0 %v17071_v14, %s11480_s21  ;;  %17072 = vst [vmem:[#allocation95_spill] sm:$0xff] %v15020_v31  ;;  %v7393_v23 = vpop.permute.xlu1 %7392  ;;  %v17075_v14 = vcombine.low %v17073_v46, %v17074_v13  ;;  %v15036_v31 = vrot.slane %v7470_v62, %v11837_v49  ;;  %v6914_v62 = vrot.slane %v14907_v54, %v11837_v49 }
 0x669   : > { %v7479_v19 = vcombine.low %v14871_v26, %v7393_v23  ;;  %v7052_v23 = vrot.slane %v6825_v55, %v11824_v36  ;;  %v7087_v46 = vrot.slane %v6869_v59, %v11824_v36  ;;  %v17084_v55 = vld [vmem:[#allocation145_spill] sm:$0xff] }
 0x66a   : > { %17078 = vst [vmem:[#allocation23_spill] sm:$0xff] %v15036_v31  ;;  %v7157_v54 = vrot.slane %v6914_v62, %v11824_v36 }
 0x66b   : > { %8542 = vrot.lane.b32.xlu1 %v13568_v58, %s11473_s11  ;;  %v15033_v58 = vpop.permute.xlu0 %8592  ;;  %v15039_v45 = vrot.slane %v7479_v19, %v11837_v49 }
 0x66c   : > { %7263 = vrot.lane.b32.xlu0 %v17075_v14, %s11481_s9  ;;  %17077 = vst [vmem:[#allocation51_spill] sm:$0xff] %v15033_v58  ;;  %v15042_v10 = vpop.permute.xlu1 %6017  ;;  %v17085_v14 = vld [vmem:[#allocation146_spill] sm:$0xff] }
 0x66d   : > { %17079 = vst [vmem:[#allocation55_spill] sm:$0xff] %v15039_v45  ;;  %17080 = vst [vmem:[#allocation41_spill] sm:$0xff] %v15042_v10  ;;  %v7670_v26 = vcombine.low %v15036_v31, %v15039_v45  ;;  %v17086_v19 = vcombine.low %v17084_v55, %v17085_v14  ;;  %v17092_v55 = vld [vmem:[#allocation77_spill] sm:$0xff] }
 0x66f   : > { %8606 = vrot.lane.b32.xlu1 %v17076_v12, %s11473_s11  ;;  %v15050_v12 = vpop.permute.xlu0 %9960  ;;  %v15056_v56 = vrot.slane %v7670_v26, %v11824_v36  ;;  %v17089_v26 = vld [vmem:[#allocation137_spill] sm:$0xff] }
 0x670   : > { %9974 = vrot.lane.b32.xlu0 %v14338_v7, %s11473_s11  ;;  %17081 = vst [vmem:[#allocation118_spill] sm:$0xff] %v15050_v12  ;;  %v15058_v13 = vpop.permute.xlu1 %5659  ;;  %v17083_v7 = vld [vmem:[#allocation44_spill] sm:$0xff] }
 0x671   : > { %17082 = vst [vmem:[#allocation24_spill] sm:$0xff] %v15056_v56  ;;  %v6915_v56 = vcombine.high %v6914_v62, %v17007_v48 }
 0x673   : > { %7055 = vrot.lane.b32.xlu1 %v7052_v23, %s11474_s13  ;;  %v15066_v23 = vrot.slane %v17086_v19, %v11824_v36  ;;  %v7192_v62 = vrot.slane %v6915_v56, %v11824_v36  ;;  %v17102_v56 = vld [vmem:[#allocation147_spill] sm:$0xff] }
 0x674   : > { %7297 = vrot.lane.b32.xlu0 %v17083_v7, %s11479_s15  ;;  %v15069_v12 = vpop.permute.xlu0 %7394  ;;  %v17095_v7 = vld [vmem:[#allocation14_spill] sm:$0xff] }
 0x675   : > { %17087 = vst [vmem:[#allocation26_spill] sm:$0xff] %v15066_v23  ;;  %17088 = vst [vmem:[#allocation120_spill] sm:$0xff] %v15069_v12  ;;  %v6870_v12 = vcombine.high %v6869_v59, %v17007_v48 }
 0x676   : > { %v15072_v58 = vpop.permute.xlu1 %5694 }
 0x677   : > { %7090 = vrot.lane.b32.xlu1 %v7087_v46, %s11475_s27  ;;  %v17091_v46 = vld [vmem:[#allocation61_spill] sm:$0xff]  ;;  %v7122_v59 = vrot.slane %v6870_v12, %v11824_v36 }
 0x678   : > { %8608 = vrot.lane.b32.xlu0 %v17089_v26, %s11473_s11  ;;  %v15079_v31 = vpop.permute.xlu0 %6019 }
 0x679   : > { %17090 = vst [vmem:[#allocation121_spill] sm:$0xff] %v15079_v31 }
 0x67a   : > { %v15081_v19 = vpop.permute.xlu1 %5729 }
 0x67b   : > { %7160 = vrot.lane.b32.xlu1 %v7157_v54, %s11477_s25 }
 0x67c   : > { %9976 = vrot.lane.b32.xlu0 %v17091_v46, %s11473_s11  ;;  %v15087_v14 = vpop.permute.xlu0 %7398 }
 0x67d   : > { %17093 = vst [vmem:[#allocation138_spill] sm:$0xff] %v15087_v14  ;;  %v17100_v14 = vld [vmem:[#allocation150_spill] sm:$0xff] }
 0x67e   : > { %v15090_v26 = vpop.permute.xlu1 %6021 }
 0x67f   : > { %9978 = vrot.lane.b32.xlu1 %v17092_v55, %s11473_s11  ;;  %17094 = vst [vmem:[#allocation44_spill] sm:$0xff] %v15090_v26  ;;  %v17098_v55 = vrot.slane %v14174_v40, 2 }
 0x680   : > { %8612 = vrot.lane.b32.xlu0 %v17095_v7, %s11473_s11  ;;  %v15096_v54 = vpop.permute.xlu0 %6023  ;;  %v6959_v7 = vrot.slane %v17061_v15, %v11837_v49 }
 0x681   : > { %17096 = vst [vmem:[#allocation137_spill] sm:$0xff] %v15096_v54  ;;  %v17103_v54 = vld [vmem:[#allocation36_spill] sm:$0xff] }
 0x682   : > { %v15099_v46 = vpop.permute.xlu1 %7396  ;;  %v6960_v12 = vcombine.high %v6959_v7, %v17007_v48 }
 0x683   : > { %8610 = vrot.lane.b32.xlu1 %v14433_v29, %s11473_s11  ;;  %17097 = vst [vmem:[#allocation61_spill] sm:$0xff] %v15099_v46 }
 0x684   : > { %9980 = vrot.lane.b32.xlu0 %v17098_v55, %s11473_s11  ;;  %v15106_v23 = vpop.permute.xlu0 %8596  ;;  %v7227_v55 = vrot.slane %v6959_v7, %v11824_v36 }
 0x685   : > { %17099 = vst [vmem:[#allocation77_spill] sm:$0xff] %v15106_v23  ;;  %v17101_v23 = vld [vmem:[#allocation107_spill] sm:$0xff] }
 0x686   : > { %v15110_v29 = vpop.permute.xlu1 %9962 }
 0x687   : > { %7125 = vrot.lane.b32.xlu1 %v7122_v59, %s11476_s14 }
 0x688   : > { %9912 = vrot.lane.b32.xlu0 %v17100_v14, %s11473_s11 }
 0x689   : > { %v15116_v40 = vpop.permute.xlu0 %5661 }
 0x68b   : > { %7195 = vrot.lane.b32.xlu1 %v7192_v62, %s11478_s28  ;;  %v7262_v62 = vrot.slane %v6960_v12, %v11824_v36  ;;  %v17106_v12 = vld [vmem:[#allocation60_spill] sm:$0xff] }
 0x68c   : > { %8544 = vrot.lane.b32.xlu0 %v17101_v23, %s11473_s11 }
 0x68d   : > { %v15120_v59 = vpop.permute.xlu1 %5764  ;;  %v15125_v15 = vpop.permute.xlu0 %5766 }
 0x68f   : > { %7230 = vrot.lane.b32.xlu1 %v7227_v55, %s11480_s21  ;;  %v17104_v55 = vld [vmem:[#allocation153_spill] sm:$0xff] }
 0x690   : > { %9914 = vrot.lane.b32.xlu0 %v17102_v56, %s11473_s11  ;;  %v5265_v56 = vcombine.high %v17106_v12, %v17106_v12  ;;  %v17113_v12 = vld [vmem:[#allocation105_spill] sm:$0xff] }
 0x691   : > { %v15127_v14 = vpop.permute.xlu1 %5799 }
 0x692   : > { %v15133_v46 = vpop.permute.xlu0 %5905 }
 0x693   : > { %7265 = vrot.lane.b32.xlu1 %v7262_v62, %s11481_s9  ;;  %v17107_v62 = vld [vmem:[#allocation132_spill] sm:$0xff] }
 0x694   : > { %8548 = vrot.lane.b32.xlu0 %v17103_v54, %s11473_s11  ;;  %v17110_v54 = vld [vmem:[#allocation13_spill] sm:$0xff] }
 0x695   : > { %v15135_v7 = vpop.permute.xlu1 %5834 }
 0x696   : > { %v15141_v45 = vpop.permute.xlu0 %8600 }
 0x697   : > { %8546 = vrot.lane.b32.xlu1 %v17104_v55, %s11473_s11  ;;  %17105 = vst [vmem:[#allocation14_spill] sm:$0xff] %v15141_v45  ;;  %v5279_v55 = vrot.slane %v5265_v56, %v11824_v36  ;;  %v17111_v45 = vld [vmem:[#allocation109_spill] sm:$0xff]  ;;  %v17116_v56 = vld [vmem:[#allocation47_spill] sm:$0xff] }
 0x698   : > { %9916 = vrot.lane.b32.xlu0 %v16935_v38, %s11473_s11 }
 0x699   : > { %v15143_v26 = vpop.permute.xlu1 %5869 }
 0x69a   : > { %v15151_v31 = vpop.permute.xlu0 %9968 }
 0x69b   : > { %9982 = vrot.lane.b32.xlu1 %v17107_v62, %s11473_s11  ;;  %17108 = vst [vmem:[#allocation150_spill] sm:$0xff] %v15151_v31  ;;  %v17114_v31 = vld [vmem:[#allocation62_spill] sm:$0xff] }
 0x69c   : > { %8552 = vrot.lane.b32.xlu0 %v17110_v54, %s11473_s11  ;;  %v5280_v54 = vcombine.high %v17114_v31, %v17114_v31 }
 0x69d   : > { %v15153_v30 = vpop.permute.xlu1 %6025 }
 0x69e   : > { %17109 = vst [vmem:[#allocation107_spill] sm:$0xff] %v15153_v30  ;;  %v15160_v10 = vpop.permute.xlu0 %5801  ;;  %v17115_v30 = vld [vmem:[#allocation52_spill] sm:$0xff] }
 0x69f   : > { %9918 = vrot.lane.b32.xlu1 %v17111_v45, %s11473_s11  ;;  %v5605_v17 = vcombine.low %v17116_v56, %v17115_v30  ;;  %v17117_v45 = vrot.slane %v13635_v18, 2  ;;  %v15191_v18 = vrot.slane %v5280_v54, %v11837_v49 }
 0x6a0   : > { %8616 = vrot.lane.b32.xlu0 %v5279_v55, %s11473_s11 }
 0x6a1   : > { %v15162_v38 = vpop.permute.xlu1 %7400  ;;  %v5619_v31 = vrot.slane %v5605_v17, %v11824_v36  ;;  %17121 = vst [vmem:[#allocation153_spill] sm:$0xff] %v15191_v18 }
 0x6a2   : > { %17112 = vst [vmem:[#allocation147_spill] sm:$0xff] %v15162_v38  ;;  %v15167_v62 = vpop.permute.xlu0 %5836  ;;  %v17118_v38 = vld [vmem:[#allocation38_spill] sm:$0xff] }
 0x6a3   : > { %8550 = vrot.lane.b32.xlu1 %v17113_v12, %s11473_s11  ;;  %v5604_v11 = vcombine.low %v17119_v21, %v17118_v38  ;;  %v5289_v12 = vrot.slane %v14632_v44, %v11824_v36  ;;  %v8081_v21 = vrot.slane %v5279_v55, %v11837_v49  ;;  %v17122_v44 = vld [vmem:[#allocation99_spill] sm:$0xff] }
 0x6a4   : > { %9920 = vrot.lane.b32.xlu0 %v17117_v45, %s11473_s11 }
 0x6a5   : > { %v15173_v50 = vpop.permute.xlu1 %8594  ;;  %v5612_v38 = vrot.slane %v5604_v11, %v11824_v36 }
 0x6a6   : > { %v15183_v53 = vpop.permute.xlu0 %7053 }
 0x6a7   : > { %8614 = vrot.lane.b32.xlu1 %v5280_v54, %s11473_s11  ;;  %v5620_v45 = vcombine.low %v5612_v38, %v5619_v31  ;;  %v8037_v54 = vcombine.high %v15191_v18, %v17007_v48  ;;  %v8299_v31 = vrot.slane %v8081_v21, %v11824_v36  ;;  %v5281_v18 = vcombine.high %v5279_v55, %v5279_v55 }
 0x6a8   : > { %8620 = vrot.lane.b32.xlu0 %v5289_v12, %s11473_s11 }
 0x6a9   : > { %v15186_v30 = vpop.permute.xlu1 %9964  ;;  %v5910_v11 = vsel %vm5909_vm9, %v5620_v45, %v15058_v13 }
 0x6aa   : > { %17120 = vst [vmem:[#allocation36_spill] sm:$0xff] %v15186_v30  ;;  %v15197_v56 = vpop.permute.xlu0 %7402  ;;  %v17125_v30 = vld [vmem:[#allocation135_spill] sm:$0xff]  ;;  %v5913_v38 = vsel %vm5912_vm10, %v5910_v11, %v15072_v58  ;;  %v8082_v11 = vcombine.high %v8081_v21, %v17007_v48 }
 0x6ab   : > { %9984 = vrot.lane.b32.xlu1 %v17122_v44, %s11473_s11  ;;  %17123 = vst [vmem:[#allocation60_spill] sm:$0xff] %v15197_v56  ;;  %v17126_v44 = vld [vmem:[#allocation156_spill] sm:$0xff] }
 0x6ac   : > { %9988 = vrot.lane.b32.xlu0 %v17125_v30, %s11473_s11  ;;  %v5916_v30 = vsel %vm5915_vm11, %v5913_v38, %v15081_v19  ;;  %v8264_v19 = vrot.slane %v8037_v54, %v11824_v36  ;;  %v8334_v21 = vrot.slane %v8082_v11, %v11824_v36 }
 0x6ad   : > { %v15199_v17 = vpop.permute.xlu1 %9966  ;;  %v5919_v13 = vsel %vm5918_vm12, %v5916_v30, %v15120_v59 }
 0x6ae   : > { %17124 = vst [vmem:[#allocation132_spill] sm:$0xff] %v15199_v17  ;;  %v5872_v56 = vpop.permute.xlu0 %5871  ;;  %v5922_v45 = vsel %vm5921_vm13, %v5919_v13, %v15127_v14 }
 0x6af   : > { %9986 = vrot.lane.b32.xlu1 %v17126_v44, %s11473_s11  ;;  %v5925_v55 = vsel %vm5924_vm14, %v5922_v45, %v15135_v7  ;;  %v8126_v44 = vrot.slane %v5281_v18, %v11837_v49  ;;  %v17129_v45 = vld [vmem:[#allocation66_spill] sm:$0xff] }
 0x6b0   : > { %8302 = vrot.lane.b32.xlu0 %v8299_v31, %s11475_s27  ;;  %v5928_v59 = vsel %vm5927_vm15, %v5925_v55, %v15143_v26  ;;  %v5297_v31 = vcombine.high %v5289_v12, %v5289_v12  ;;  %v8171_v26 = vrot.slane %v5289_v12, %v11837_v49 }
 0x6b1   : > { %v5697_v17 = vpop.permute.xlu1 %5696  ;;  %v8369_v13 = vrot.slane %v8126_v44, %v11824_v36 }
 0x6b2   : > { %v15221_v58 = vpop.permute.xlu0 %8536  ;;  %v8439_v12 = vrot.slane %v8171_v26, %v11824_v36 }
 0x6b3   : > { %8618 = vrot.lane.b32.xlu1 %v5281_v18, %s11473_s11  ;;  %v5627_v18 = vrot.slane %v17129_v45, %v11824_v36 }
 0x6b4   : > { %8267 = vrot.lane.b32.xlu0 %v8264_v19, %s11474_s13  ;;  %v17130_v19 = vld [vmem:[#allocation151_spill] sm:$0xff] }
 0x6b5   : > { %v5904_v14 = vpop.permute.xlu1 %5903  ;;  %v5911_v55 = vsel %vm5909_vm9, %v5627_v18, %v15116_v40 }
 0x6b6   : > { %v5931_v54 = vsel %vm5930_vm0, %v5928_v59, %v5904_v14  ;;  %v15240_v7 = vpop.permute.xlu0 %7088  ;;  %v5914_v59 = vsel %vm5912_vm10, %v5911_v55, %v5697_v17  ;;  %v17132_v55 = vld [vmem:[#allocation148_spill] sm:$0xff] }
 0x6b7   : > { %5934 = vst.msk [vmem:[%s15230_s12] sm:$0xff] %vm5933_vm1, %v5931_v54  ;;  %9990 = vrot.lane.b32.xlu1 %v14275_v24, %s11473_s11 }
 0x6b8   : > { %8337 = vrot.lane.b32.xlu0 %v8334_v21, %s11476_s14 }
 0x6b9   : > { %v15244_v38 = vpop.permute.xlu1 %8598 }
 0x6ba   : > { %17127 = vst [vmem:[#allocation13_spill] sm:$0xff] %v15244_v38  ;;  %v15249_v30 = vpop.permute.xlu0 %7123 }
 0x6bb   : > { %8622 = vrot.lane.b32.xlu1 %v5297_v31, %s11473_s11 }
 0x6bc   : > { %8372 = vrot.lane.b32.xlu0 %v8369_v13, %s11477_s25  ;;  %v17131_v13 = vld [vmem:[#allocation53_spill] sm:$0xff] }
 0x6bd   : > { %v15252_v24 = vpop.permute.xlu1 %9970 }
 0x6be   : > { %17128 = vst [vmem:[#allocation109_spill] sm:$0xff] %v15252_v24  ;;  %v15259_v11 = vpop.permute.xlu0 %7406 }
 0x6bf   : > { %9922 = vrot.lane.b32.xlu1 %v17130_v19, %s11473_s11  ;;  %v8508_v19 = vrot.slane %v5297_v31, %v11824_v36 }
 0x6c0   : > { %8442 = vrot.lane.b32.xlu0 %v8439_v12, %s11480_s21 }
 0x6c1   : > { %v5732_v14 = vpop.permute.xlu1 %5731 }
 0x6c2   : > { %v5917_v54 = vsel %vm5915_vm11, %v5914_v59, %v5732_v14  ;;  %v15271_v45 = vpop.permute.xlu0 %9972  ;;  %v10864_v14 = vrot.slane %v5297_v31, 9  ;;  %v8172_v31 = vcombine.high %v8171_v26, %v17007_v48 }
 0x6c3   : > { %v5920_v21 = vsel %vm5918_vm12, %v5917_v54, %v15125_v15  ;;  %8554 = vrot.lane.b32.xlu1 %v17131_v13, %s11473_s11  ;;  %v17133_v54 = vld [vmem:[#allocation49_spill] sm:$0xff] }
 0x6c4   : > { %v5923_v40 = vsel %vm5921_vm13, %v5920_v21, %v15160_v10  ;;  %8511 = vrot.lane.b32.xlu0 %v8508_v19, %s11479_s15  ;;  %v9319_v10 = vrot.slane %v14962_v28, 7  ;;  %v8682_v28 = vcombine.low %v14847_v60, %v14959_v1  ;;  %v8474_v26 = vrot.slane %v8172_v31, %v11824_v36 }
 0x6c5   : > { %v5926_v17 = vsel %vm5924_vm14, %v5923_v40, %v15167_v62  ;;  %v15278_v18 = vpop.permute.xlu1 %8602 }
 0x6c6   : > { %v5929_v15 = vsel %vm5927_vm15, %v5926_v17, %v5872_v56  ;;  %v15286_v59 = vpop.permute.xlu0 %7410  ;;  %v17134_v56 = vld [vmem:[#allocation15_spill] sm:$0xff]  ;;  %v9320_v19 = vsel %vm12453_vm8, %v10864_v14, %v9319_v10  ;;  %v17136_v17 = vld [vmem:[#allocation54_spill] sm:$0xff]  ;;  %v15316_v14 = vrot.slane %v8682_v28, %v11837_v49 }
 0x6c7   : > { %v5932_v12 = vsel %vm5930_vm0, %v5929_v15, %v15133_v46  ;;  %9924 = vrot.lane.b32.xlu1 %v17132_v55, %s11473_s11  ;;  %v8127_v46 = vcombine.high %v8126_v44, %v17007_v48  ;;  %v15336_v28 = vrot.slane %v9320_v19, %v11837_v49 }
 0x6c8   : > { %5936 = vst.msk [vmem:[%s15230_s12 + $0x8] sm:$0x1] %vm5935_vm2, %v5932_v12  ;;  %8556 = vrot.lane.b32.xlu0 %v17133_v54, %s11473_s11  ;;  %v9321_v54 = vrot.slane %v9319_v10, 2 }
 0x6c9   : > { %v15291_v62 = vpop.permute.xlu1 %8534  ;;  %v8404_v12 = vrot.slane %v8127_v46, %v11824_v36  ;;  %v5306_v46 = vcombine.high %v14982_v35, %v14982_v35 }
 0x6ca   : > { %v15297_v21 = vpop.permute.xlu0 %8540  ;;  %v9323_v10 = vsel %vm12453_vm8, %v9321_v54, %v14988_v8  ;;  %v9415_v8 = vcombine.high %v15336_v28, %v17007_v48 }
 0x6cb   : > { %9926 = vrot.lane.b32.xlu1 %v17134_v56, %s11473_s11  ;;  %17135 = vst [vmem:[#allocation105_spill] sm:$0xff] %v15297_v21  ;;  %v9459_v24 = vrot.slane %v9323_v10, %v11837_v49 }
 0x6cc   : > { %9992 = vrot.lane.b32.xlu0 %v9320_v19, %s11473_s11  ;;  %v17140_v19 = vld [vmem:[#allocation33_spill] sm:$0xff] }
 0x6cd   : > { %v15302_v40 = vpop.permute.xlu1 %7404 }
 0x6ce   : > { %v8605_v15 = vpop.permute.xlu0 %8604 }
 0x6cf   : > { %8558 = vrot.lane.b32.xlu1 %v17136_v17, %s11473_s11  ;;  %v8691_v44 = vcombine.low %v15173_v50, %v8605_v15  ;;  %v17138_v17 = vrot.slane %v14982_v35, 7  ;;  %v17141_v35 = vld [vmem:[#allocation129_spill] sm:$0xff] }
 0x6d0   : > { %8407 = vrot.lane.b32.xlu0 %v8404_v12, %s11478_s28  ;;  %v9328_v12 = vrot.slane %v5306_v46, 7  ;;  %v17142_v46 = vld [vmem:[#allocation130_spill] sm:$0xff] }
 0x6d1   : > { %v15312_v55 = vpop.permute.xlu1 %8538  ;;  %v15319_v60 = vrot.slane %v8691_v44, %v11837_v49  ;;  %v9327_v15 = vrot.slane %v17138_v17, 2  ;;  %v17139_v44 = vld [vmem:[#allocation152_spill] sm:$0xff]  ;;  %v17143_v17 = vcombine.low %v17141_v35, %v17142_v46  ;;  %v9460_v35 = vcombine.high %v9459_v24, %v17007_v48 }
 0x6d2   : > { %17137 = vst [vmem:[#allocation62_spill] sm:$0xff] %v15312_v55  ;;  %v7159_v1 = vpop.permute.xlu0 %7158  ;;  %v9677_v46 = vrot.slane %v9459_v24, %v11824_v36 }
 0x6d3   : > { %9930 = vrot.lane.b32.xlu1 %v14613_v63, %s11473_s11  ;;  %v9329_v50 = vsel %vm12453_vm8, %v9327_v15, %v9328_v12  ;;  %v9330_v15 = vrot.slane %v9328_v12, 2 }
 0x6d4   : > { %8477 = vrot.lane.b32.xlu0 %v8474_v26, %s11481_s9 }
 0x6d5   : > { %v15326_v56 = vpop.permute.xlu1 %7408 }
 0x6d6   : > { %v7194_v63 = vpop.permute.xlu0 %7193 }
 0x6d7   : > { %9994 = vrot.lane.b32.xlu1 %v9323_v10, %s11473_s11 }
 0x6d8   : > { %8560 = vrot.lane.b32.xlu0 %v13932_v41, %s11473_s11 }
 0x6d9   : > { %v15338_v31 = vpop.permute.xlu1 %7299 }
 0x6da   : > { %v7229_v26 = vpop.permute.xlu0 %7228 }
 0x6db   : > { %8562 = vrot.lane.b32.xlu1 %v17139_v44, %s11473_s11  ;;  %v7303_v44 = vsel %vm5909_vm9, %v17143_v17, %v15183_v53 }
 0x6dc   : > { %9928 = vrot.lane.b32.xlu0 %v17140_v19, %s11473_s11  ;;  %v9642_v19 = vrot.slane %v9415_v8, %v11824_v36  ;;  %v7305_v52 = vsel %vm5912_vm10, %v7303_v44, %v15240_v7 }
 0x6dd   : > { %v15348_v54 = vpop.permute.xlu1 %8542  ;;  %v7307_v55 = vsel %vm5915_vm11, %v7305_v52, %v15249_v30  ;;  %v17146_v52 = vld [vmem:[#allocation57_spill] sm:$0xff] }
 0x6de   : > { %v7264_v41 = vpop.permute.xlu0 %7263  ;;  %v7309_v10 = vsel %vm5918_vm12, %v7307_v55, %v7159_v1  ;;  %v9504_v55 = vrot.slane %v15016_v43, %v11837_v49  ;;  %v17145_v1 = vld [vmem:[#allocation155_spill] sm:$0xff] }
 0x6df   : > { %9998 = vrot.lane.b32.xlu1 %v9329_v50, %s11473_s11  ;;  %v7311_v8 = vsel %vm5921_vm13, %v7309_v10, %v7194_v63  ;;  %v9712_v63 = vrot.slane %v9460_v35, %v11824_v36  ;;  %v9549_v35 = vrot.slane %v9329_v50, %v11837_v49  ;;  %v7993_v50 = vcombine.low %v14940_v51, %v17101_v23  ;;  %v17156_v23 = vld [vmem:[#allocation117_spill] sm:$0xff] }
 0x6e0   : > { %9996 = vrot.lane.b32.xlu0 %v15016_v43, %s11473_s11  ;;  %v7313_v7 = vsel %vm5924_vm14, %v7311_v8, %v7229_v26  ;;  %v9886_v43 = vrot.slane %v9330_v15, %v11824_v36 }
 0x6e1   : > { %v15361_v21 = vpop.permute.xlu1 %8606  ;;  %v7315_v12 = vsel %vm5927_vm15, %v7313_v7, %v7264_v41  ;;  %v9747_v41 = vrot.slane %v9504_v55, %v11824_v36  ;;  %v17149_v7 = vld [vmem:[#allocation59_spill] sm:$0xff]  ;;  %v15437_v51 = vrot.slane %v7993_v50, %v11837_v49 }
 0x6e2   : > { %v15371_v53 = vpop.permute.xlu0 %9974 }
 0x6e3   : > { %9645 = vrot.lane.b32.xlu1 %v9642_v19, %s11474_s13  ;;  %17144 = vst [vmem:[#allocation52_spill] sm:$0xff] %v15371_v53 }
 0x6e4   : > { %10000 = vrot.lane.b32.xlu0 %v9330_v15, %s11473_s11 }
 0x6e5   : > { %v7056_v17 = vpop.permute.xlu1 %7055 }
 0x6e6   : > { %v7298_v30 = vpop.permute.xlu0 %7297 }
 0x6e7   : > { %9680 = vrot.lane.b32.xlu1 %v9677_v46, %s11475_s27  ;;  %v7317_v44 = vsel %vm5930_vm0, %v7315_v12, %v7298_v30  ;;  %v9505_v46 = vcombine.high %v9504_v55, %v17007_v48  ;;  %v17150_v30 = vld [vmem:[#allocation64_spill] sm:$0xff]  ;;  %v17153_v55 = vld [vmem:[#allocation69_spill] sm:$0xff] }
 0x6e8   : > { %10824 = vst.msk [vmem:[%s15230_s12 + $0x20] sm:$0xff] %vm5933_vm1, %v7317_v44  ;;  %9932 = vrot.lane.b32.xlu0 %v17145_v1, %s11473_s11  ;;  %v17151_v44 = vld [vmem:[#allocation87_spill] sm:$0xff]  ;;  %v8020_v1 = vcombine.low %v14817_v61, %v17054_v4  ;;  %v17155_v61 = vcombine.low %v17131_v13, %v17146_v52 }
 0x6e9   : > { %v7091_v24 = vpop.permute.xlu1 %7090  ;;  %v8011_v15 = vcombine.low %v17151_v44, %v17150_v30 }
 0x6ea   : > { %v15390_v26 = vpop.permute.xlu0 %8608  ;;  %v15430_v4 = vrot.slane %v17155_v61, %v11837_v49 }
 0x6eb   : > { %9715 = vrot.lane.b32.xlu1 %v9712_v63, %s11476_s14  ;;  %v15424_v30 = vrot.slane %v8011_v15, %v11837_v49 }
 0x6ec   : > { %8564 = vrot.lane.b32.xlu0 %v17146_v52, %s11473_s11  ;;  %v10836_v13 = vcombine.high %v15437_v51, %v15430_v4 }
 0x6ed   : > { %v7161_v19 = vpop.permute.xlu1 %7160 }
 0x6ee   : > { %v15397_v10 = vpop.permute.xlu0 %9976 }
 0x6ef   : > { %9750 = vrot.lane.b32.xlu1 %v9747_v41, %s11477_s25  ;;  %17147 = vst [vmem:[#allocation47_spill] sm:$0xff] %v15397_v10  ;;  %v9782_v41 = vrot.slane %v9505_v46, %v11824_v36  ;;  %v15433_v46 = vrot.slane %v8020_v1, %v11837_v49  ;;  %v17219_v10 = vld [vmem:[#allocation41_spill] sm:$0xff] }
 0x6f0   : > { %9889 = vrot.lane.b32.xlu0 %v9886_v43, %s11479_s15  ;;  %v9817_v43 = vrot.slane %v9549_v35, %v11824_v36 }
 0x6f1   : > { %v15400_v8 = vpop.permute.xlu1 %9978  ;;  %v10837_v52 = vcombine.high %v15424_v30, %v15433_v46 }
 0x6f2   : > { %17148 = vst [vmem:[#allocation38_spill] sm:$0xff] %v15400_v8  ;;  %v15406_v12 = vpop.permute.xlu0 %8612  ;;  %v17158_v8 = vld [vmem:[#allocation56_spill] sm:$0xff] }
 0x6f3   : > { %8566 = vrot.lane.b32.xlu1 %v17149_v7, %s11473_s11 }
 0x6f4   : > { %9934 = vrot.lane.b32.xlu0 %v17153_v55, %s11473_s11  ;;  %v7021_v55 = vrot.slane %v15004_v37, %v11824_v36 }
 0x6f5   : > { %v15412_v63 = vpop.permute.xlu1 %8610 }
 0x6f6   : > { %17152 = vst [vmem:[#allocation40_spill] sm:$0xff] %v15412_v63  ;;  %v15421_v7 = vpop.permute.xlu0 %9980  ;;  %v7304_v50 = vsel %vm5909_vm9, %v7021_v55, %v7056_v17  ;;  %v8256_v17 = vrot.slane %v10837_v52, %v11824_v36  ;;  %v17234_v63 = vld [vmem:[#allocation121_spill] sm:$0xff] }
 0x6f7   : > { %9785 = vrot.lane.b32.xlu1 %v9782_v41, %s11478_s28  ;;  %17154 = vst [vmem:[#allocation99_spill] sm:$0xff] %v15421_v7  ;;  %v17157_v41 = vld [vmem:[#allocation58_spill] sm:$0xff]  ;;  %v7306_v61 = vsel %vm5912_vm10, %v7304_v50, %v7091_v24  ;;  %v17159_v24 = vld [vmem:[#allocation76_spill] sm:$0xff] }
 0x6f8   : > { %9820 = vrot.lane.b32.xlu0 %v9817_v43, %s11480_s21  ;;  %v9550_v43 = vcombine.high %v9549_v35, %v17007_v48  ;;  %v17160_v55 = vcombine.low %v14518_v20, %v17159_v24 }
 0x6f9   : > { %v7126_v44 = vpop.permute.xlu1 %7125 }
 0x6fa   : > { %v15441_v15 = vpop.permute.xlu0 %9912 }
 0x6fb   : > { %9938 = vrot.lane.b32.xlu1 %v17156_v23, %s11473_s11  ;;  %v7308_v23 = vsel %vm5915_vm11, %v7306_v61, %v7126_v44  ;;  %v9852_v44 = vrot.slane %v9550_v43, %v11824_v36 }
 0x6fc   : > { %8568 = vrot.lane.b32.xlu0 %v17157_v41, %s11473_s11  ;;  %v8249_v41 = vrot.slane %v10836_v13, %v11824_v36  ;;  %v7310_v35 = vsel %vm5918_vm12, %v7308_v23, %v7161_v19  ;;  %v17165_v23 = vld [vmem:[#allocation74_spill] sm:$0xff] }
 0x6fd   : > { %v7196_v1 = vpop.permute.xlu1 %7195 }
 0x6fe   : > { %v15456_v37 = vpop.permute.xlu0 %8544  ;;  %v7312_v50 = vsel %vm5921_vm13, %v7310_v35, %v7196_v1  ;;  %v8257_v13 = vcombine.low %v8249_v41, %v8256_v17  ;;  %v17163_v1 = vld [vmem:[#allocation141_spill] sm:$0xff]  ;;  %v17166_v41 = vld [vmem:[#allocation108_spill] sm:$0xff] }
 0x6ff   : > { %8570 = vrot.lane.b32.xlu1 %v14333_v47, %s11473_s11  ;;  %v17167_v17 = vcombine.low %v17165_v23, %v17166_v41  ;;  %v17177_v23 = vld [vmem:[#allocation113_spill] sm:$0xff] }
 0x700   : > { %9936 = vrot.lane.b32.xlu0 %v17158_v8, %s11473_s11 }
 0x701   : > { %v7231_v7 = vpop.permute.xlu1 %7230 }
 0x702   : > { %v15468_v47 = vpop.permute.xlu0 %9914  ;;  %v7314_v8 = vsel %vm5924_vm14, %v7312_v50, %v7231_v7  ;;  %v17164_v7 = vrot.slane %v17163_v1, 2 }
 0x703   : > { %8509 = vrot.lane.b32.xlu1 %v17160_v55, %s11479_s15  ;;  %17161 = vst [vmem:[#allocation135_spill] sm:$0xff] %v15468_v47  ;;  %v17169_v55 = vld [vmem:[#allocation122_spill] sm:$0xff] }
 0x704   : > { %9855 = vrot.lane.b32.xlu0 %v9852_v44, %s11481_s9  ;;  %v17170_v44 = vld [vmem:[#allocation115_spill] sm:$0xff] }
 0x705   : > { %v7266_v61 = vpop.permute.xlu1 %7265  ;;  %v17171_v50 = vcombine.low %v17169_v55, %v17170_v44 }
 0x706   : > { %v7316_v52 = vsel %vm5927_vm15, %v7314_v8, %v7266_v61  ;;  %v15478_v20 = vpop.permute.xlu0 %8548  ;;  %v17172_v61 = vcombine.low %v14585_v34, %v14588_v0  ;;  %v6139_v34 = vcombine.low %v14799_v32, %v14926_v2  ;;  %v17175_v0 = vcombine.low %v14599_v27, %v14602_v42  ;;  %v17183_v32 = vld [vmem:[#allocation79_spill] sm:$0xff] }
 0x707   : > { %v7318_v19 = vsel %vm5930_vm0, %v7316_v52, %v15338_v31  ;;  %8265 = vrot.lane.b32.xlu1 %v8257_v13, %s11474_s13  ;;  %17162 = vst [vmem:[#allocation156_spill] sm:$0xff] %v15478_v20  ;;  %v10060_v31 = vcombine.low %v14918_v57, %v15110_v29  ;;  %v17184_v2 = vld [vmem:[#allocation63_spill] sm:$0xff]  ;;  %v10798_v42 = vcombine.high %v14893_v22, %v14896_v39  ;;  %v17189_v22 = vld [vmem:[#allocation112_spill] sm:$0xff]  ;;  %v17190_v39 = vld [vmem:[#allocation81_spill] sm:$0xff] }
 0x708   : > { %10825 = vst.msk [vmem:[%s15230_s12 + $0x28] sm:$0x1] %vm5935_vm2, %v7318_v19  ;;  %9940 = vrot.lane.b32.xlu0 %v17164_v7, %s11473_s11  ;;  %v17174_v19 = vcombine.low %v14571_v5, %v14574_v9  ;;  %v17176_v7 = vld [vmem:[#allocation43_spill] sm:$0xff]  ;;  %v6112_v44 = vcombine.low %v17184_v2, %v17183_v32  ;;  %v6146_v27 = vrot.slane %v6139_v34, %v11837_v49 }
 0x709   : > { %v15482_v43 = vpop.permute.xlu1 %8546  ;;  %v15507_v52 = vrot.slane %v10060_v31, %v11837_v49  ;;  %v6121_v41 = vcombine.low %v17177_v23, %v17176_v7  ;;  %v17179_v31 = vld [vmem:[#allocation46_spill] sm:$0xff]  ;;  %v17191_v34 = vcombine.low %v17189_v22, %v17190_v39  ;;  %v17198_v22 = vld [vmem:[#allocation72_spill] sm:$0xff] }
 0x70a   : > { %v15491_v35 = vpop.permute.xlu0 %9916 }
 0x70b   : > { %8300 = vrot.lane.b32.xlu1 %v17167_v17, %s11475_s27  ;;  %17168 = vst [vmem:[#allocation66_spill] sm:$0xff] %v15491_v35  ;;  %v17178_v17 = vld [vmem:[#allocation17_spill] sm:$0xff] }
 0x70c   : > { %9643 = vrot.lane.b32.xlu0 %v17171_v50, %s11474_s13  ;;  %v6130_v5 = vcombine.low %v17179_v31, %v17178_v17  ;;  %v17185_v50 = vld [vmem:[#allocation104_spill] sm:$0xff]  ;;  %v6119_v17 = vrot.slane %v6112_v44, %v11837_v49  ;;  %v6330_v31 = vrot.slane %v10798_v42, %v11824_v36  ;;  %v17197_v44 = vld [vmem:[#allocation126_spill] sm:$0xff] }
 0x70d   : > { %v9983_v24 = vpop.permute.xlu1 %9982  ;;  %v6175_v42 = vcombine.low %v17198_v22, %v17197_v44 }
 0x70e   : > { %v10069_v8 = vcombine.low %v15271_v45, %v9983_v24  ;;  %v15504_v13 = vpop.permute.xlu0 %8552  ;;  %v17181_v24 = vld [vmem:[#allocation133_spill] sm:$0xff]  ;;  %v6137_v7 = vrot.slane %v6130_v5, %v11837_v49 }
 0x70f   : > { %8335 = vrot.lane.b32.xlu1 %v17172_v61, %s11476_s14  ;;  %v17182_v55 = vcombine.low %v14594_v25, %v17181_v24  ;;  %v10797_v25 = vcombine.high %v17041_v6, %v17042_v16  ;;  %v17193_v6 = vld [vmem:[#allocation30_spill] sm:$0xff] }
 0x710   : > { %v15510_v57 = vrot.slane %v10069_v8, %v11837_v49  ;;  %9678 = vrot.lane.b32.xlu0 %v17174_v19, %s11475_s27  ;;  %v17186_v8 = vld [vmem:[#allocation142_spill] sm:$0xff]  ;;  %v6351_v24 = vcombine.low %v6137_v7, %v6146_v27 }
 0x711   : > { %v15512_v29 = vpop.permute.xlu1 %9918  ;;  %v17187_v61 = vcombine.low %v17185_v50, %v17186_v8  ;;  %v6323_v2 = vrot.slane %v10797_v25, %v11824_v36  ;;  %v17195_v50 = vld [vmem:[#allocation134_spill] sm:$0xff] }
 0x712   : > { %17173 = vst [vmem:[#allocation151_spill] sm:$0xff] %v15512_v29  ;;  %v15526_v1 = vpop.permute.xlu0 %8616  ;;  %v17196_v8 = vld [vmem:[#allocation18_spill] sm:$0xff]  ;;  %v6365_v45 = vrot.slane %v6351_v24, %v11824_v36 }
 0x713   : > { %8370 = vrot.lane.b32.xlu1 %v17175_v0, %s11477_s25  ;;  %v6128_v0 = vrot.slane %v6121_v41, %v11837_v49  ;;  %v6184_v41 = vcombine.low %v14777_v3, %v14934_v33  ;;  %v17200_v3 = vld [vmem:[#allocation45_spill] sm:$0xff]  ;;  %v17201_v33 = vld [vmem:[#allocation116_spill] sm:$0xff]  ;;  %v6331_v22 = vcombine.low %v6323_v2, %v6330_v31 }
 0x714   : > { %9713 = vrot.lane.b32.xlu0 %v17182_v55, %s11476_s14  ;;  %v17192_v55 = vld [vmem:[#allocation34_spill] sm:$0xff]  ;;  %v17212_v31 = vld [vmem:[#allocation32_spill] sm:$0xff] }
 0x715   : > { %v15532_v9 = vpop.permute.xlu1 %8550  ;;  %v17194_v16 = vcombine.low %v17192_v55, %v17193_v6  ;;  %v6350_v32 = vcombine.low %v6119_v17, %v6128_v0  ;;  %v17203_v55 = vld [vmem:[#allocation94_spill] sm:$0xff]  ;;  %v17204_v6 = vld [vmem:[#allocation65_spill] sm:$0xff]  ;;  %v6191_v25 = vrot.slane %v6184_v41, %v11837_v49 }
 0x716   : > { %17180 = vst [vmem:[#allocation53_spill] sm:$0xff] %v15532_v9  ;;  %v15547_v19 = vpop.permute.xlu0 %9920  ;;  %v17211_v41 = vld [vmem:[#allocation161_spill] sm:$0xff] }
 0x717   : > { %8405 = vrot.lane.b32.xlu1 %v17187_v61, %s11478_s28  ;;  %17188 = vst [vmem:[#allocation148_spill] sm:$0xff] %v15547_v19  ;;  %v6166_v61 = vcombine.low %v17196_v8, %v17195_v50  ;;  %v10800_v19 = vcombine.high %v6137_v7, %v6146_v27  ;;  %v17205_v50 = vld [vmem:[#allocation31_spill] sm:$0xff]  ;;  %v6358_v35 = vrot.slane %v6350_v32, %v11824_v36  ;;  %v17213_v32 = vld [vmem:[#allocation114_spill] sm:$0xff] }
 0x718   : > { %9748 = vrot.lane.b32.xlu0 %v17191_v34, %s11477_s25  ;;  %v17202_v34 = vcombine.low %v17200_v3, %v17201_v33  ;;  %v17206_v8 = vld [vmem:[#allocation91_spill] sm:$0xff]  ;;  %v10799_v3 = vcombine.high %v6119_v17, %v6128_v0  ;;  %v17214_v0 = vcombine.low %v17212_v31, %v17213_v32  ;;  %v17221_v31 = vld [vmem:[#allocation90_spill] sm:$0xff] }
 0x719   : > { %v15553_v23 = vpop.permute.xlu1 %8614  ;;  %v17207_v29 = vcombine.low %v17205_v50, %v17206_v8  ;;  %v6173_v33 = vrot.slane %v6166_v61, %v11837_v49  ;;  %v6400_v7 = vrot.slane %v10800_v19, %v11824_v36  ;;  %v6366_v2 = vcombine.low %v6358_v35, %v6365_v45  ;;  %v17215_v61 = vld [vmem:[#allocation131_spill] sm:$0xff]  ;;  %v17218_v19 = vld [vmem:[#allocation73_spill] sm:$0xff]  ;;  %v17222_v32 = vld [vmem:[#allocation70_spill] sm:$0xff] }
 0x71a   : > { %v15567_v5 = vpop.permute.xlu0 %8620  ;;  %v6393_v8 = vrot.slane %v10799_v3, %v11824_v36  ;;  %v6202_v35 = vcombine.low %v17222_v32, %v17221_v31 }
 0x71b   : > { %9818 = vrot.lane.b32.xlu1 %v17194_v16, %s11480_s21  ;;  %v6157_v16 = vcombine.low %v17204_v6, %v17203_v55 }
 0x71c   : > { %9783 = vrot.lane.b32.xlu0 %v17202_v34, %s11478_s28  ;;  %v6182_v34 = vrot.slane %v6175_v42, %v11837_v49  ;;  %v17216_v42 = vld [vmem:[#allocation28_spill] sm:$0xff] }
 0x71d   : > { %v15574_v39 = vpop.permute.xlu1 %9984  ;;  %v6164_v27 = vrot.slane %v6157_v16, %v11837_v49  ;;  %v6211_v50 = vcombine.low %v17216_v42, %v17215_v61  ;;  %v17223_v61 = vld [vmem:[#allocation35_spill] sm:$0xff]  ;;  %v17224_v42 = vld [vmem:[#allocation93_spill] sm:$0xff] }
 0x71e   : > { %17199 = vst [vmem:[#allocation49_spill] sm:$0xff] %v15574_v39  ;;  %v15588_v44 = vpop.permute.xlu0 %9988  ;;  %v6421_v24 = vcombine.low %v6182_v34, %v6191_v25 }
 0x71f   : > { %9853 = vrot.lane.b32.xlu1 %v17207_v29, %s11481_s9  ;;  %17208 = vst [vmem:[#allocation15_spill] sm:$0xff] %v15588_v44  ;;  %v17210_v29 = vld [vmem:[#allocation82_spill] sm:$0xff]  ;;  %v6420_v16 = vcombine.low %v6164_v27, %v6173_v33  ;;  %v10801_v9 = vcombine.high %v6164_v27, %v6173_v33 }
 0x720   : > { %6339 = vrot.lane.b32.xlu0 %v6331_v22, %s11474_s13  ;;  %v6229_v6 = vcombine.low %v17211_v41, %v17210_v29  ;;  %v17217_v22 = vld [vmem:[#allocation143_spill] sm:$0xff]  ;;  %v15613_v29 = vrot.slane %v17219_v10, %v11837_v49  ;;  %v6435_v45 = vrot.slane %v6421_v24, %v11824_v36  ;;  %v6401_v10 = vcombine.low %v6393_v8, %v6400_v7  ;;  %v17228_v8 = vld [vmem:[#allocation160_spill] sm:$0xff]  ;;  %v17229_v33 = vld [vmem:[#allocation158_spill] sm:$0xff] }
 0x721   : > { %v15593_v55 = vpop.permute.xlu1 %9986  ;;  %v6220_v44 = vcombine.low %v17218_v19, %v17217_v22  ;;  %v17225_v22 = vcombine.low %v17223_v61, %v17224_v42  ;;  %v6209_v24 = vrot.slane %v6202_v35, %v11837_v49  ;;  %v17227_v7 = vld [vmem:[#allocation83_spill] sm:$0xff]  ;;  %v6463_v61 = vrot.slane %v10801_v9, %v11824_v36  ;;  %v17230_v42 = vld [vmem:[#allocation144_spill] sm:$0xff] }
 0x722   : > { %17209 = vst [vmem:[#allocation54_spill] sm:$0xff] %v15593_v55  ;;  %v15604_v17 = vpop.permute.xlu0 %8302  ;;  %17220 = vst [vmem:[#allocation152_spill] sm:$0xff] %v15613_v29  ;;  %v6236_v3 = vrot.slane %v6229_v6, %v11837_v49  ;;  %v6218_v55 = vrot.slane %v6211_v50, %v11837_v49  ;;  %v6271_v50 = vcombine.low %v17228_v8, %v17227_v7  ;;  %v17233_v35 = vld [vmem:[#allocation103_spill] sm:$0xff] }
 0x723   : > { %8440 = vrot.lane.b32.xlu1 %v17214_v0, %s11480_s21  ;;  %v10802_v0 = vcombine.high %v6182_v34, %v6191_v25  ;;  %v6227_v31 = vrot.slane %v6220_v44, %v11837_v49  ;;  %v6111_v25 = vcombine.high %v15613_v29, %v17007_v48  ;;  %v17232_v29 = vld [vmem:[#allocation92_spill] sm:$0xff]  ;;  %v6155_v7 = vrot.slane %v17234_v63, %v11837_v49 }
 0x724   : > { %6374 = vrot.lane.b32.xlu0 %v6366_v2, %s11475_s27  ;;  %v6428_v2 = vrot.slane %v6420_v16, %v11824_v36  ;;  %v6490_v16 = vcombine.low %v6209_v24, %v6218_v55 }
 0x725   : > { %v15615_v41 = vpop.permute.xlu1 %8618  ;;  %v6470_v6 = vrot.slane %v10802_v0, %v11824_v36  ;;  %v6491_v32 = vcombine.low %v6227_v31, %v6236_v3  ;;  %v6338_v0 = vrot.slane %v6111_v25, %v11824_v36  ;;  %v10804_v47 = vcombine.high %v6227_v31, %v6236_v3 }
 0x726   : > { %v15626_v19 = vpop.permute.xlu0 %8267  ;;  %v6436_v44 = vcombine.low %v6428_v2, %v6435_v45  ;;  %v17237_v45 = vld [vmem:[#allocation75_spill] sm:$0xff]  ;;  %v6498_v25 = vrot.slane %v6490_v16, %v11824_v36 }
 0x727   : > { %8475 = vrot.lane.b32.xlu1 %v17225_v22, %s11481_s9  ;;  %v17231_v22 = vld [vmem:[#allocation42_spill] sm:$0xff]  ;;  %v6505_v9 = vrot.slane %v6491_v32, %v11824_v36  ;;  %v6540_v31 = vrot.slane %v10804_v47, %v11824_v36 }
 0x728   : > { %6409 = vrot.lane.b32.xlu0 %v6401_v10, %s11476_s14  ;;  %v6255_v10 = vcombine.low %v17231_v22, %v17230_v42  ;;  %v6278_v42 = vrot.slane %v6271_v50, %v11837_v49  ;;  %v6471_v22 = vcombine.low %v6463_v61, %v6470_v6 }
 0x729   : > { %v15633_v34 = vpop.permute.xlu1 %9990 }
 0x72a   : > { %17226 = vst [vmem:[#allocation33_spill] sm:$0xff] %v15633_v34  ;;  %v15642_v27 = vpop.permute.xlu0 %8337  ;;  %v6263_v34 = vcombine.low %v17233_v35, %v17232_v29  ;;  %v10803_v35 = vcombine.high %v6209_v24, %v6218_v55  ;;  %v6262_v63 = vrot.slane %v6255_v10, %v11837_v49  ;;  %v6506_v24 = vcombine.low %v6498_v25, %v6505_v9  ;;  %v17239_v9 = vld [vmem:[#allocation107_spill] sm:$0xff]  ;;  %v17241_v25 = vld [vmem:[#allocation60_spill] sm:$0xff] }
 0x72b   : > { %9887 = vrot.lane.b32.xlu1 %v17229_v33, %s11479_s15  ;;  %v17236_v33 = vld [vmem:[#allocation106_spill] sm:$0xff] }
 0x72c   : > { %6444 = vrot.lane.b32.xlu0 %v6436_v44, %s11477_s25  ;;  %v6247_v2 = vcombine.low %v17237_v45, %v17236_v33  ;;  %v6270_v53 = vrot.slane %v6263_v34, %v11837_v49  ;;  %v6373_v44 = vrot.slane %v6155_v7, %v11824_v36  ;;  %v17238_v33 = vld [vmem:[#allocation44_spill] sm:$0xff]  ;;  %v6533_v34 = vrot.slane %v10803_v35, %v11824_v36 }
 0x72d   : > { %v15652_v8 = vpop.permute.xlu1 %8622  ;;  %v6200_v45 = vrot.slane %v17238_v33, %v11837_v49  ;;  %v15688_v35 = vrot.slane %v17241_v25, %v11837_v49  ;;  %v17243_v33 = vld [vmem:[#allocation153_spill] sm:$0xff] }
 0x72e   : > { %17235 = vst [vmem:[#allocation129_spill] sm:$0xff] %v15652_v8  ;;  %v8373_v29 = vpop.permute.xlu0 %8372  ;;  %v6254_v3 = vrot.slane %v6247_v2, %v11837_v49  ;;  %v6560_v6 = vcombine.low %v6270_v53, %v6278_v42  ;;  %v6541_v47 = vcombine.low %v6533_v34, %v6540_v31  ;;  %v6156_v2 = vcombine.high %v6155_v7, %v17007_v48 }
 0x72f   : > { %6341 = vrot.lane.b32.xlu1 %v6338_v0, %s11474_s13  ;;  %v6443_v16 = vrot.slane %v6200_v45, %v11824_v36  ;;  %v6582_v42 = vrot.slane %v17239_v9, %v11824_v36  ;;  %17242 = vst [vmem:[#allocation155_spill] sm:$0xff] %v15688_v35  ;;  %v6201_v31 = vcombine.high %v6200_v45, %v17007_v48 }
 0x730   : > { %6479 = vrot.lane.b32.xlu0 %v6471_v22, %s11478_s28  ;;  %v6559_v50 = vcombine.low %v6254_v3, %v6262_v63  ;;  %v6574_v10 = vrot.slane %v6560_v6, %v11824_v36  ;;  %v8233_v3 = vrot.slane %v17243_v33, %v11824_v36  ;;  %v6408_v7 = vrot.slane %v6156_v2, %v11824_v36  ;;  %v17248_v2 = vld [vmem:[#allocation21_spill] sm:$0xff] }
 0x731   : > { %v15666_v32 = vpop.permute.xlu1 %9922  ;;  %v7496_v34 = vcombine.high %v15688_v35, %v17007_v48  ;;  %v17252_v35 = vld [vmem:[#allocation149_spill] sm:$0xff] }
 0x732   : > { %v8443_v55 = vpop.permute.xlu0 %8442  ;;  %v6567_v53 = vrot.slane %v6559_v50, %v11824_v36  ;;  %v7967_v50 = vrot.slane %v15286_v59, %v11824_v36  ;;  %v17250_v59 = vld [vmem:[#allocation146_spill] sm:$0xff] }
 0x733   : > { %6376 = vrot.lane.b32.xlu1 %v6373_v44, %s11475_s27 }
 0x734   : > { %6514 = vrot.lane.b32.xlu0 %v6506_v24, %s11480_s21  ;;  %v6575_v44 = vcombine.low %v6567_v53, %v6574_v10  ;;  %v8516_v24 = vsel %vm5909_vm9, %v8233_v3, %v15626_v19  ;;  %v17245_v10 = vld [vmem:[#allocation55_spill] sm:$0xff]  ;;  %v17247_v53 = vld [vmem:[#allocation120_spill] sm:$0xff]  ;;  %v17249_v19 = vld [vmem:[#allocation137_spill] sm:$0xff] }
 0x735   : > { %v15674_v61 = vpop.permute.xlu1 %8554  ;;  %v7524_v9 = vcombine.low %v17248_v2, %v17247_v53  ;;  %v6245_v25 = vrot.slane %v17249_v19, %v11837_v49  ;;  %v17251_v3 = vld [vmem:[#allocation145_spill] sm:$0xff]  ;;  %v17255_v2 = vld [vmem:[#allocation78_spill] sm:$0xff]  ;;  %v7723_v19 = vrot.slane %v7496_v34, %v11824_v36 }
 0x736   : > { %v8512_v0 = vpop.permute.xlu0 %8511 }
 0x737   : > { %6446 = vrot.lane.b32.xlu1 %v6443_v16, %s11477_s25 }
 0x738   : > { %6549 = vrot.lane.b32.xlu0 %v6541_v47, %s11481_s9  ;;  %v17246_v47 = vld [vmem:[#allocation23_spill] sm:$0xff] }
 0x739   : > { %v15683_v22 = vpop.permute.xlu1 %9924  ;;  %v10827_v45 = vcombine.high %v17246_v47, %v17245_v10  ;;  %v17253_v10 = vld [vmem:[#allocation29_spill] sm:$0xff] }
 0x73a   : > { %17240 = vst [vmem:[#allocation130_spill] sm:$0xff] %v15683_v22  ;;  %v15691_v63 = vpop.permute.xlu0 %8556  ;;  %v7506_v47 = vcombine.low %v17253_v10, %v17252_v35  ;;  %v6513_v10 = vrot.slane %v6245_v25, %v11824_v36 }
 0x73b   : > { %6585 = vrot.lane.b32.xlu1 %v6582_v42, %s11479_s15  ;;  %v6478_v42 = vrot.slane %v6201_v31, %v11824_v36  ;;  %v17254_v31 = vld [vmem:[#allocation101_spill] sm:$0xff]  ;;  %v7715_v35 = vrot.slane %v10827_v45, %v11824_v36  ;;  %v7585_v45 = vrot.slane %v15259_v11, %v11837_v49 }
 0x73c   : > { %6583 = vrot.lane.b32.xlu0 %v6575_v44, %s11479_s15  ;;  %v8518_v44 = vsel %vm5912_vm10, %v8516_v24, %v15604_v17  ;;  %v7540_v17 = vrot.slane %v15302_v40, %v11837_v49 }
 0x73d   : > { %v15697_v6 = vpop.permute.xlu1 %9926  ;;  %v8520_v53 = vsel %vm5915_vm11, %v8518_v44, %v15642_v27  ;;  %v7531_v44 = vrot.slane %v7524_v9, %v11837_v49 }
 0x73e   : > { %17244 = vst [vmem:[#allocation57_spill] sm:$0xff] %v15697_v6  ;;  %v15707_v16 = vpop.permute.xlu0 %9992  ;;  %v7515_v6 = vcombine.low %v17255_v2, %v17254_v31  ;;  %v8522_v24 = vsel %vm5918_vm12, %v8520_v53, %v8373_v29  ;;  %v7513_v29 = vrot.slane %v7506_v47, %v11837_v49  ;;  %v7758_v53 = vrot.slane %v7540_v17, %v11824_v36 }
 0x73f   : > { %6411 = vrot.lane.b32.xlu1 %v6408_v7, %s11476_s14  ;;  %v10826_v7 = vcombine.high %v17251_v3, %v17250_v59  ;;  %v17256_v59 = vld [vmem:[#allocation16_spill] sm:$0xff]  ;;  %v6246_v47 = vcombine.high %v6245_v25, %v17007_v48  ;;  %v7828_v25 = vrot.slane %v7585_v45, %v11824_v36 }
 0x740   : > { %7970 = vrot.lane.b32.xlu0 %v7967_v50, %s11479_s15  ;;  %v17257_v3 = vld [vmem:[#allocation84_spill] sm:$0xff] }
 0x741   : > { %v15718_v33 = vpop.permute.xlu1 %8558  ;;  %v7497_v22 = vcombine.low %v17257_v3, %v17256_v59  ;;  %v7708_v40 = vrot.slane %v10826_v7, %v11824_v36 }
 0x742   : > { %v8408_v50 = vpop.permute.xlu0 %8407 }
 0x743   : > { %6481 = vrot.lane.b32.xlu1 %v6478_v42, %s11478_s28  ;;  %v8524_v27 = vsel %vm5921_vm13, %v8522_v24, %v8408_v50  ;;  %v7522_v42 = vrot.slane %v7515_v6, %v11837_v49  ;;  %v7504_v2 = vrot.slane %v7497_v22, %v11837_v49  ;;  %v7716_v7 = vcombine.low %v7708_v40, %v7715_v35  ;;  %v17259_v6 = vld [vmem:[#allocation61_spill] sm:$0xff]  ;;  %v17260_v50 = vld [vmem:[#allocation71_spill] sm:$0xff]  ;;  %v17264_v35 = vld [vmem:[#allocation80_spill] sm:$0xff] }
 0x744   : > { %7726 = vrot.lane.b32.xlu0 %v7723_v19, %s11474_s13  ;;  %v8526_v9 = vsel %vm5924_vm14, %v8524_v27, %v8443_v55  ;;  %v7569_v59 = vcombine.low %v17260_v50, %v17259_v6  ;;  %v17262_v55 = vld [vmem:[#allocation127_spill] sm:$0xff]  ;;  %v17267_v6 = vld [vmem:[#allocation88_spill] sm:$0xff] }
 0x745   : > { %v15740_v34 = vpop.permute.xlu1 %9930  ;;  %v7736_v24 = vcombine.low %v7522_v42, %v7531_v44  ;;  %v7735_v22 = vcombine.low %v7504_v2, %v7513_v29 }
 0x746   : > { %17258 = vst [vmem:[#allocation59_spill] sm:$0xff] %v15740_v34  ;;  %v8478_v31 = vpop.permute.xlu0 %8477 }
 0x747   : > { %6516 = vrot.lane.b32.xlu1 %v6513_v10, %s11480_s21  ;;  %v8528_v19 = vsel %vm5927_vm15, %v8526_v9, %v8478_v31  ;;  %v17261_v10 = vld [vmem:[#allocation154_spill] sm:$0xff]  ;;  %v7541_v31 = vcombine.high %v7540_v17, %v17007_v48  ;;  %v7750_v50 = vrot.slane %v7736_v24, %v11824_v36 }
 0x748   : > { %v8530_v11 = vsel %vm5930_vm0, %v8528_v19, %v8512_v0  ;;  %7761 = vrot.lane.b32.xlu0 %v7758_v53, %s11475_s27  ;;  %v7551_v27 = vcombine.low %v17262_v55, %v17261_v10  ;;  %v17263_v9 = vld [vmem:[#allocation102_spill] sm:$0xff]  ;;  %v17266_v19 = vld [vmem:[#allocation39_spill] sm:$0xff]  ;;  %v10829_v10 = vcombine.high %v7522_v42, %v7531_v44  ;;  %v7576_v55 = vrot.slane %v7569_v59, %v11837_v49 }
 0x749   : > { %v15757_v3 = vpop.permute.xlu1 %9994  ;;  %10845 = vst.msk [vmem:[%s15230_s12 + $0x48] sm:$0x1] %vm5935_vm2, %v8530_v11  ;;  %v7560_v40 = vcombine.low %v17264_v35, %v17263_v9  ;;  %v7542_v53 = vcombine.low %v17267_v6, %v17266_v19  ;;  %v6548_v11 = vrot.slane %v6246_v47, %v11824_v36  ;;  %v10828_v9 = vcombine.high %v7504_v2, %v7513_v29  ;;  %v17269_v59 = vld [vmem:[#allocation138_spill] sm:$0xff]  ;;  %v17270_v29 = vld [vmem:[#allocation124_spill] sm:$0xff] }
 0x74a   : > { %v15769_v0 = vpop.permute.xlu0 %8560  ;;  %v7558_v17 = vrot.slane %v7551_v27, %v11837_v49  ;;  %v7586_v19 = vcombine.high %v7585_v45, %v17007_v48  ;;  %v7793_v24 = vrot.slane %v7541_v31, %v11824_v36  ;;  %v7785_v47 = vrot.slane %v10829_v10, %v11824_v36  ;;  %v17272_v31 = vld [vmem:[#allocation139_spill] sm:$0xff] }
 0x74b   : > { %7724 = vrot.lane.b32.xlu1 %v7716_v7, %s11474_s13  ;;  %17265 = vst [vmem:[#allocation64_spill] sm:$0xff] %v15769_v0  ;;  %v7743_v7 = vrot.slane %v7735_v22, %v11824_v36  ;;  %v7567_v35 = vrot.slane %v7560_v40, %v11837_v49  ;;  %v7549_v42 = vrot.slane %v7542_v53, %v11837_v49  ;;  %v17271_v40 = vld [vmem:[#allocation67_spill] sm:$0xff] }
 0x74c   : > { %7831 = vrot.lane.b32.xlu0 %v7828_v25, %s11477_s25  ;;  %v7614_v2 = vcombine.low %v17270_v29, %v17269_v59  ;;  %v7596_v6 = vcombine.low %v17272_v31, %v17271_v40  ;;  %v17274_v0 = vld [vmem:[#allocation119_spill] sm:$0xff]  ;;  %v7863_v10 = vrot.slane %v7586_v19, %v11824_v36  ;;  %v7630_v59 = vrot.slane %v15326_v56, %v11837_v49 }
 0x74d   : > { %v15776_v34 = vpop.permute.xlu1 %8562  ;;  %v7806_v27 = vcombine.low %v7567_v35, %v7576_v55  ;;  %v7751_v22 = vcombine.low %v7743_v7, %v7750_v50  ;;  %v7805_v45 = vcombine.low %v7549_v42, %v7558_v17  ;;  %v17276_v50 = vld [vmem:[#allocation96_spill] sm:$0xff]  ;;  %v10830_v56 = vcombine.high %v7549_v42, %v7558_v17  ;;  %v17278_v42 = vld [vmem:[#allocation147_spill] sm:$0xff] }
 0x74e   : > { %v15785_v44 = vpop.permute.xlu0 %9928  ;;  %v7621_v39 = vrot.slane %v7614_v2, %v11837_v49  ;;  %v7631_v8 = vcombine.high %v7630_v59, %v17007_v48  ;;  %v15819_v2 = vrot.slane %v15707_v16, %v11837_v49 }
 0x74f   : > { %6551 = vrot.lane.b32.xlu1 %v6548_v11, %s11481_s9  ;;  %17268 = vst [vmem:[#allocation87_spill] sm:$0xff] %v15785_v44  ;;  %v7778_v11 = vrot.slane %v10828_v9, %v11824_v36  ;;  %v17273_v44 = vld [vmem:[#allocation68_spill] sm:$0xff]  ;;  %v7820_v40 = vrot.slane %v7806_v27, %v11824_v36  ;;  %v10831_v9 = vcombine.high %v7567_v35, %v7576_v55  ;;  %v17279_v27 = vld [vmem:[#allocation27_spill] sm:$0xff] }
 0x750   : > { %7796 = vrot.lane.b32.xlu0 %v7793_v24, %s11476_s14  ;;  %v7605_v53 = vcombine.low %v17274_v0, %v17273_v44  ;;  %v17275_v24 = vld [vmem:[#allocation25_spill] sm:$0xff]  ;;  %v7813_v19 = vrot.slane %v7805_v45, %v11824_v36  ;;  %v7603_v44 = vrot.slane %v7596_v6, %v11837_v49  ;;  %v7656_v45 = vcombine.low %v17279_v27, %v17278_v42 }
 0x751   : > { %v15791_v25 = vpop.permute.xlu1 %9998  ;;  %v7587_v7 = vcombine.low %v17276_v50, %v17275_v24  ;;  %v7786_v0 = vcombine.low %v7778_v11, %v7785_v47  ;;  %v7898_v24 = vrot.slane %v7630_v59, %v11824_v36  ;;  %v7855_v17 = vrot.slane %v10831_v9, %v11824_v36 }
 0x752   : > { %v15803_v29 = vpop.permute.xlu0 %9996  ;;  %v7821_v11 = vcombine.low %v7813_v19, %v7820_v40  ;;  %v7848_v16 = vrot.slane %v10830_v56, %v11824_v36  ;;  %v10042_v50 = vcombine.low %v15441_v15, %v15666_v32  ;;  %v7933_v20 = vrot.slane %v7631_v8, %v11824_v36  ;;  %v17284_v19 = vld [vmem:[#allocation123_spill] sm:$0xff]  ;;  %v17285_v56 = vld [vmem:[#allocation100_spill] sm:$0xff] }
 0x753   : > { %7759 = vrot.lane.b32.xlu1 %v7751_v22, %s11475_s27  ;;  %v7612_v22 = vrot.slane %v7605_v53, %v11837_v49  ;;  %v7594_v35 = vrot.slane %v7587_v7, %v11837_v49  ;;  %v17280_v53 = vld [vmem:[#allocation85_spill] sm:$0xff]  ;;  %v10086_v42 = vcombine.high %v15819_v2, %v17007_v48  ;;  %v7663_v38 = vrot.slane %v7656_v45, %v11837_v49 }
 0x754   : > { %7866 = vrot.lane.b32.xlu0 %v7863_v10, %s11478_s28  ;;  %v17281_v10 = vld [vmem:[#allocation140_spill] sm:$0xff]  ;;  %v7856_v8 = vcombine.low %v7848_v16, %v7855_v17 }
 0x755   : > { %v15809_v31 = vpop.permute.xlu1 %9645  ;;  %v7876_v47 = vcombine.low %v7612_v22, %v7621_v39  ;;  %v7640_v59 = vcombine.low %v17281_v10, %v17280_v53  ;;  %v7875_v7 = vcombine.low %v7594_v35, %v7603_v44  ;;  %v10832_v27 = vcombine.high %v7594_v35, %v7603_v44  ;;  %v17286_v53 = vld [vmem:[#allocation159_spill] sm:$0xff] }
 0x756   : > { %v15822_v55 = vpop.permute.xlu0 %10000  ;;  %v10833_v32 = vcombine.high %v7612_v22, %v7621_v39  ;;  %v10313_v35 = vrot.slane %v10086_v42, %v11824_v36 }
 0x757   : > { %7794 = vrot.lane.b32.xlu1 %v7786_v0, %s11476_s14  ;;  %17277 = vst [vmem:[#allocation69_spill] sm:$0xff] %v15822_v55  ;;  %v17282_v0 = vld [vmem:[#allocation162_spill] sm:$0xff]  ;;  %v17283_v55 = vld [vmem:[#allocation89_spill] sm:$0xff]  ;;  %v7890_v15 = vrot.slane %v7876_v47, %v11824_v36  ;;  %v7883_v39 = vrot.slane %v7875_v7, %v11824_v36  ;;  %v7918_v42 = vrot.slane %v10832_v27, %v11824_v36 }
 0x758   : > { %7901 = vrot.lane.b32.xlu0 %v7898_v24, %s11480_s21  ;;  %v7648_v9 = vcombine.low %v17283_v55, %v17282_v0  ;;  %v7632_v24 = vcombine.low %v17285_v56, %v17284_v19  ;;  %v7647_v0 = vrot.slane %v7640_v59, %v11837_v49  ;;  %v15854_v19 = vrot.slane %v10042_v50, %v11837_v49 }
 0x759   : > { %v15828_v6 = vpop.permute.xlu1 %9680  ;;  %v7925_v45 = vrot.slane %v10833_v32, %v11824_v36  ;;  %v7891_v50 = vcombine.low %v7883_v39, %v7890_v15  ;;  %v17287_v27 = vcombine.low %v15507_v52, %v15510_v57 }
 0x75a   : > { %v9933_v40 = vpop.permute.xlu0 %9932  ;;  %v7655_v22 = vrot.slane %v7648_v9, %v11837_v49 }
 0x75b   : > { %7829 = vrot.lane.b32.xlu1 %v7821_v11, %s11477_s25  ;;  %v10051_v10 = vcombine.low %v9933_v40, %v17286_v53  ;;  %v8664_v11 = vcombine.low %v15291_v62, %v15456_v37  ;;  %v7639_v62 = vrot.slane %v7632_v24, %v11837_v49  ;;  %v7926_v32 = vcombine.low %v7918_v42, %v7925_v45  ;;  %v17289_v45 = vld [vmem:[#allocation97_spill] sm:$0xff] }
 0x75c   : > { %7936 = vrot.lane.b32.xlu0 %v7933_v20, %s11481_s9  ;;  %v10130_v20 = vrot.slane %v15757_v3, %v11837_v49  ;;  %v7945_v16 = vcombine.low %v7655_v22, %v7663_v38 }
 0x75d   : > { %v15847_v55 = vpop.permute.xlu1 %9715  ;;  %v15857_v44 = vrot.slane %v10051_v10, %v11837_v49  ;;  %v7944_v7 = vcombine.low %v7639_v62, %v7647_v0  ;;  %v15874_v3 = vrot.slane %v8664_v11, %v11837_v49  ;;  %v15895_v10 = vrot.slane %v17287_v27, %v11824_v36 }
 0x75e   : > { %v8565_v47 = vpop.permute.xlu0 %8564  ;;  %v10131_v40 = vcombine.high %v10130_v20, %v17007_v48  ;;  %v7959_v53 = vrot.slane %v7945_v16, %v11824_v36  ;;  %v10175_v11 = vrot.slane %v15803_v29, %v11837_v49  ;;  %v8752_v62 = vrot.slane %v15526_v1, %v11837_v49 }
 0x75f   : > { %7864 = vrot.lane.b32.xlu1 %v7856_v8, %s11478_s28  ;;  %v10259_v37 = vcombine.low %v15854_v19, %v15857_v44  ;;  %v8673_v17 = vcombine.low %v15674_v61, %v8565_v47  ;;  %v10348_v61 = vrot.slane %v10130_v20, %v11824_v36  ;;  %v7952_v8 = vrot.slane %v7944_v7, %v11824_v36 }
 0x760   : > { %10316 = vrot.lane.b32.xlu0 %v10313_v35, %s11474_s13  ;;  %v10383_v0 = vrot.slane %v10131_v40, %v11824_v36  ;;  %v17288_v20 = vcombine.low %v15316_v14, %v15319_v60  ;;  %v15922_v29 = vrot.slane %v15553_v23, %v11837_v49  ;;  %v8852_v16 = vcombine.low %v15776_v34, %v17289_v45 }
 0x761   : > { %v15870_v59 = vpop.permute.xlu1 %9750  ;;  %v15877_v9 = vrot.slane %v8673_v17, %v11837_v49  ;;  %v15883_v38 = vrot.slane %v10259_v37, %v11824_v36  ;;  %v7960_v17 = vcombine.low %v7952_v8, %v7959_v53  ;;  %v10418_v7 = vrot.slane %v10175_v11, %v11824_v36  ;;  %v17291_v53 = vld [vmem:[#allocation37_spill] sm:$0xff] }
 0x762   : > { %v15886_v56 = vpop.permute.xlu0 %9889  ;;  %v15916_v47 = vrot.slane %v17288_v20, %v11824_v36  ;;  %v8844_v23 = vcombine.low %v15348_v54, %v15504_v13  ;;  %v8868_v40 = vcombine.low %v15278_v18, %v15406_v12  ;;  %v8708_v34 = vcombine.high %v15922_v29, %v17007_v48 }
 0x763   : > { %7899 = vrot.lane.b32.xlu1 %v7891_v50, %s11480_s21  ;;  %v8881_v24 = vcombine.low %v15874_v3, %v15877_v9  ;;  %v10275_v35 = vcombine.low %v15883_v38, %v15895_v10  ;;  %v10220_v50 = vrot.slane %v15791_v25, %v11837_v49  ;;  %v9611_v54 = vrot.slane %v15336_v28, %v11824_v36 }
 0x764   : > { %10351 = vrot.lane.b32.xlu0 %v10348_v61, %s11475_s27  ;;  %v8970_v61 = vrot.slane %v8752_v62, %v11824_v36  ;;  %v10176_v18 = vcombine.high %v10175_v11, %v17007_v48  ;;  %v8851_v8 = vrot.slane %v8844_v23, %v11837_v49  ;;  %v8875_v20 = vrot.slane %v8868_v40, %v11837_v49 }
 0x765   : > { %v15897_v15 = vpop.permute.xlu1 %8566  ;;  %v15905_v39 = vrot.slane %v8881_v24, %v11824_v36  ;;  %v17290_v24 = vld [vmem:[#allocation51_spill] sm:$0xff]  ;;  %v10488_v13 = vrot.slane %v10220_v50, %v11824_v36  ;;  %v8935_v45 = vrot.slane %v8708_v34, %v11824_v36  ;;  %v17292_v34 = vld [vmem:[#allocation77_spill] sm:$0xff] }
 0x766   : > { %v15908_v22 = vpop.permute.xlu0 %9934  ;;  %v8860_v27 = vcombine.low %v17291_v53, %v17290_v24  ;;  %v10453_v40 = vrot.slane %v10176_v18, %v11824_v36  ;;  %v8736_v24 = vcombine.low %v17292_v34, %v15361_v21  ;;  %v10847_v18 = vcombine.high %v15316_v14, %v15319_v60  ;;  %v17299_v34 = vld [vmem:[#allocation62_spill] sm:$0xff] }
 0x767   : > { %7934 = vrot.lane.b32.xlu1 %v7926_v32, %s11481_s9  ;;  %v8897_v1 = vcombine.low %v15905_v39, %v15916_v47  ;;  %v8859_v32 = vrot.slane %v8852_v16, %v11837_v49 }
 0x768   : > { %10386 = vrot.lane.b32.xlu0 %v10383_v0, %s11476_s14  ;;  %v9894_v0 = vsel %vm5909_vm9, %v9611_v54, %v15809_v31  ;;  %v8867_v11 = vrot.slane %v8860_v27, %v11837_v49  ;;  %v10221_v31 = vcombine.high %v10220_v50, %v17007_v48  ;;  %v8709_v50 = vcombine.low %v15221_v58, %v15482_v43 }
 0x769   : > { %v9786_v37 = vpop.permute.xlu1 %9785  ;;  %v9896_v28 = vsel %vm5912_vm10, %v9894_v0, %v15828_v6  ;;  %v8718_v6 = vcombine.low %v15691_v63, %v15897_v15  ;;  %v17293_v63 = vld [vmem:[#allocation128_spill] sm:$0xff]  ;;  %v17294_v15 = vld [vmem:[#allocation19_spill] sm:$0xff] }
 0x76a   : > { %v9821_v42 = vpop.permute.xlu0 %9820  ;;  %v9898_v23 = vsel %vm5915_vm11, %v9896_v28, %v15847_v55  ;;  %v9157_v55 = vcombine.low %v8867_v11, %v8875_v20  ;;  %v8727_v54 = vcombine.low %v17294_v15, %v17293_v63  ;;  %v8211_v28 = vcombine.low %v15424_v30, %v15433_v46 }
 0x76b   : > { %7968 = vrot.lane.b32.xlu1 %v7960_v17, %s11479_s15  ;;  %v8753_v17 = vcombine.high %v8752_v62, %v17007_v48  ;;  %v9900_v62 = vsel %vm5918_vm12, %v9898_v23, %v15870_v59  ;;  %v8797_v59 = vrot.slane %v15615_v41, %v11837_v49  ;;  %v8725_v58 = vrot.slane %v8718_v6, %v11837_v49  ;;  %v17298_v6 = vld [vmem:[#allocation156_spill] sm:$0xff] }
 0x76c   : > { %10421 = vrot.lane.b32.xlu0 %v10418_v7, %s11477_s25  ;;  %v9156_v7 = vcombine.low %v8851_v8, %v8859_v32  ;;  %v9902_v53 = vsel %vm5921_vm13, %v9900_v62, %v9786_v37  ;;  %v10523_v37 = vrot.slane %v10221_v31, %v11824_v36  ;;  %v8743_v8 = vrot.slane %v8736_v24, %v11837_v49 }
 0x76d   : > { %v15940_v25 = vpop.permute.xlu1 %9938  ;;  %v9005_v27 = vrot.slane %v8753_v17, %v11824_v36  ;;  %v9904_v43 = vsel %vm5924_vm14, %v9902_v53, %v9821_v42  ;;  %v9171_v20 = vrot.slane %v9157_v55, %v11824_v36  ;;  %v8716_v17 = vrot.slane %v8709_v50, %v11837_v49 }
 0x76e   : > { %v15951_v12 = vpop.permute.xlu0 %8568  ;;  %v9164_v21 = vrot.slane %v9156_v7, %v11824_v36  ;;  %v8734_v14 = vrot.slane %v8727_v54, %v11837_v49  ;;  %v8927_v46 = vrot.slane %v10847_v18, %v11824_v36  ;;  %v8754_v24 = vcombine.low %v17299_v34, %v17298_v6  ;;  %v17311_v34 = vld [vmem:[#allocation40_spill] sm:$0xff] }
 0x76f   : > { %8973 = vrot.lane.b32.xlu1 %v8970_v61, %s11475_s27  ;;  %v8763_v7 = vcombine.low %v15718_v33, %v15951_v12  ;;  %v16038_v55 = vrot.slane %v8211_v28, %v11824_v36 }
 0x770   : > { %10491 = vrot.lane.b32.xlu0 %v10488_v13, %s11480_s21  ;;  %v10846_v13 = vcombine.high %v15874_v3, %v15877_v9  ;;  %v8842_v3 = vrot.slane %v15567_v5, %v11837_v49  ;;  %v9040_v9 = vrot.slane %v8797_v59, %v11824_v36  ;;  %v8947_v5 = vcombine.low %v8716_v17, %v8725_v58 }
 0x771   : > { %v15961_v16 = vpop.permute.xlu1 %8570  ;;  %v9172_v31 = vcombine.low %v9164_v21, %v9171_v20 }
 0x772   : > { %v15974_v61 = vpop.permute.xlu0 %9936  ;;  %v8920_v11 = vrot.slane %v10846_v13, %v11824_v36  ;;  %v9110_v33 = vrot.slane %v8842_v3, %v11824_v36  ;;  %v8955_v50 = vrot.slane %v8947_v5, %v11824_v36  ;;  %v17307_v5 = vld [vmem:[#allocation52_spill] sm:$0xff] }
 0x773   : > { %8938 = vrot.lane.b32.xlu1 %v8935_v45, %s11474_s13  ;;  %v8210_v45 = vcombine.low %v15437_v51, %v15430_v4  ;;  %v8948_v4 = vcombine.low %v8734_v14, %v8743_v8  ;;  %v17297_v51 = vld [vmem:[#allocation13_spill] sm:$0xff] }
 0x774   : > { %10456 = vrot.lane.b32.xlu0 %v10453_v40, %s11478_s28  ;;  %v17296_v40 = vld [vmem:[#allocation110_spill] sm:$0xff]  ;;  %v8781_v30 = vcombine.low %v17297_v51, %v15390_v26  ;;  %v10848_v26 = vcombine.high %v8716_v17, %v8725_v58  ;;  %v8928_v15 = vcombine.low %v8920_v11, %v8927_v46  ;;  %v17300_v58 = vld [vmem:[#allocation129_spill] sm:$0xff] }
 0x775   : > { %v15984_v32 = vpop.permute.xlu1 %8509  ;;  %v16035_v53 = vrot.slane %v8210_v45, %v11824_v36  ;;  %v8962_v21 = vrot.slane %v8948_v4, %v11824_v36  ;;  %v9179_v18 = vrot.slane %v17300_v58, %v11824_v36  ;;  %v17306_v11 = vld [vmem:[#allocation49_spill] sm:$0xff] }
 0x776   : > { %v9856_v41 = vpop.permute.xlu0 %9855  ;;  %v8788_v13 = vrot.slane %v8781_v30, %v11837_v49  ;;  %v17314_v58 = vld [vmem:[#allocation105_spill] sm:$0xff] }
 0x777   : > { %9008 = vrot.lane.b32.xlu1 %v9005_v27, %s11476_s14  ;;  %v9906_v0 = vsel %vm5927_vm15, %v9904_v43, %v9856_v41  ;;  %v8770_v27 = vrot.slane %v8763_v7, %v11837_v49  ;;  %v8761_v43 = vrot.slane %v8754_v24, %v11837_v49  ;;  %v8798_v41 = vcombine.high %v8797_v59, %v17007_v48  ;;  %v17308_v59 = vld [vmem:[#allocation130_spill] sm:$0xff] }
 0x778   : > { %10526 = vrot.lane.b32.xlu0 %v10523_v37, %s11481_s9  ;;  %v9908_v60 = vsel %vm5930_vm0, %v9906_v0, %v15886_v56  ;;  %v17295_v56 = vld [vmem:[#allocation86_spill] sm:$0xff]  ;;  %v10849_v37 = vcombine.high %v8734_v14, %v8743_v8  ;;  %v17301_v0 = vld [vmem:[#allocation163_spill] sm:$0xff]  ;;  %v17304_v8 = vld [vmem:[#allocation36_spill] sm:$0xff]  ;;  %v10114_v7 = vcombine.low %v17307_v5, %v17306_v11  ;;  %v8963_v30 = vcombine.low %v8955_v50, %v8962_v21 }
 0x779   : > { %v16005_v42 = vpop.permute.xlu1 %8265  ;;  %10874 = vst.msk [vmem:[%s15230_s12 + $0x68] sm:$0x1] %vm5935_vm2, %v9908_v60  ;;  %v8772_v62 = vcombine.low %v17296_v40, %v17295_v56  ;;  %v10096_v20 = vcombine.low %v15908_v22, %v17301_v0  ;;  %v17303_v60 = vld [vmem:[#allocation20_spill] sm:$0xff]  ;;  %v17305_v14 = vld [vmem:[#allocation125_spill] sm:$0xff]  ;;  %v8990_v40 = vrot.slane %v10848_v26, %v11824_v36  ;;  %v17312_v24 = vld [vmem:[#allocation14_spill] sm:$0xff]  ;;  %v8843_v26 = vcombine.high %v8842_v3, %v17007_v48 }
 0x77a   : > { %v16021_v23 = vpop.permute.xlu0 %9940  ;;  %v10105_v28 = vcombine.low %v17305_v14, %v17304_v8  ;;  %v17310_v22 = vld [vmem:[#allocation64_spill] sm:$0xff]  ;;  %v8997_v46 = vrot.slane %v10849_v37, %v11824_v36  ;;  %v10876_v21 = vcombine.high %v15507_v52, %v15510_v57  ;;  %v10121_v37 = vrot.slane %v10114_v7, %v11837_v49 }
 0x77b   : > { %9043 = vrot.lane.b32.xlu1 %v9040_v9, %s11477_s25  ;;  %v8779_v54 = vrot.slane %v8772_v62, %v11837_v49  ;;  %v17302_v9 = vld [vmem:[#allocation50_spill] sm:$0xff]  ;;  %v9017_v62 = vcombine.low %v8761_v43, %v8770_v27  ;;  %v8808_v4 = vcombine.low %v17310_v22, %v15961_v16  ;;  %v10875_v16 = vcombine.high %v15854_v19, %v15857_v44 }
 0x77c   : > { %9180 = vrot.lane.b32.xlu0 %v9172_v31, %s11479_s15  ;;  %v8817_v45 = vcombine.low %v17303_v60, %v17302_v9  ;;  %v17309_v31 = vld [vmem:[#allocation135_spill] sm:$0xff]  ;;  %v9075_v9 = vrot.slane %v8798_v41, %v11824_v36  ;;  %v10112_v50 = vrot.slane %v10105_v28, %v11837_v49  ;;  %v10850_v41 = vcombine.high %v8761_v43, %v8770_v27  ;;  %v17315_v27 = vld [vmem:[#allocation165_spill] sm:$0xff]  ;;  %v17319_v22 = vld [vmem:[#allocation66_spill] sm:$0xff] }
 0x77d   : > { %v16031_v12 = vpop.permute.xlu1 %8300  ;;  %v10087_v56 = vcombine.low %v17309_v31, %v17308_v59  ;;  %v9018_v6 = vcombine.low %v8779_v54, %v8788_v13  ;;  %v9025_v3 = vrot.slane %v9017_v62, %v11824_v36  ;;  %v8815_v19 = vrot.slane %v8808_v4, %v11837_v49  ;;  %v17316_v31 = vld [vmem:[#allocation54_spill] sm:$0xff]  ;;  %v17318_v62 = vld [vmem:[#allocation57_spill] sm:$0xff] }
 0x77e   : > { %v16043_v63 = vpop.permute.xlu0 %9643  ;;  %v10851_v14 = vcombine.high %v8779_v54, %v8788_v13  ;;  %v9145_v57 = vrot.slane %v8843_v26, %v11824_v36  ;;  %v10298_v11 = vrot.slane %v10875_v16, %v11824_v36  ;;  %v10141_v43 = vcombine.low %v15974_v61, %v17315_v27 }
 0x77f   : > { %9113 = vrot.lane.b32.xlu1 %v9110_v33, %s11480_s21  ;;  %v8826_v33 = vcombine.low %v17312_v24, %v17311_v34  ;;  %v10094_v48 = vrot.slane %v10087_v56, %v11837_v49  ;;  %v9032_v8 = vrot.slane %v9018_v6, %v11824_v36  ;;  %v8824_v59 = vrot.slane %v8817_v45, %v11837_v49  ;;  %v17317_v56 = vld [vmem:[#allocation47_spill] sm:$0xff]  ;;  %v17320_v34 = vld [vmem:[#allocation132_spill] sm:$0xff] }
 0x780   : > { %8936 = vrot.lane.b32.xlu0 %v8928_v15, %s11474_s13  ;;  %v17313_v15 = vld [vmem:[#allocation53_spill] sm:$0xff]  ;;  %v10305_v54 = vrot.slane %v10876_v21, %v11824_v36  ;;  %v10326_v13 = vcombine.low %v10112_v50, %v10121_v37  ;;  %v10132_v4 = vcombine.low %v17319_v22, %v17318_v62  ;;  %v17321_v24 = vld [vmem:[#allocation95_spill] sm:$0xff]  ;;  %v9067_v45 = vrot.slane %v10851_v14, %v11824_v36 }
 0x781   : > { %v16054_v17 = vpop.permute.xlu1 %8335  ;;  %v8799_v0 = vcombine.low %v17314_v58, %v17313_v15  ;;  %v8833_v28 = vrot.slane %v8826_v33, %v11837_v49  ;;  %v9033_v6 = vcombine.low %v9025_v3, %v9032_v8  ;;  %v10150_v33 = vcombine.low %v17321_v24, %v17320_v34  ;;  %v17323_v8 = vld [vmem:[#allocation38_spill] sm:$0xff]  ;;  %v17330_v34 = vld [vmem:[#allocation157_spill] sm:$0xff] }
 0x782   : > { %v16069_v51 = vpop.permute.xlu0 %9678  ;;  %v10306_v21 = vcombine.low %v10298_v11, %v10305_v54  ;;  %v10878_v3 = vcombine.high %v10112_v50, %v10121_v37  ;;  %v17326_v50 = vld [vmem:[#allocation164_spill] sm:$0xff] }
 0x783   : > { %9182 = vrot.lane.b32.xlu1 %v9179_v18, %s11479_s15  ;;  %v10103_v18 = vrot.slane %v10096_v20, %v11837_v49  ;;  %v8998_v20 = vcombine.low %v8990_v40, %v8997_v46  ;;  %v8806_v52 = vrot.slane %v8799_v0, %v11837_v49  ;;  %v10159_v40 = vcombine.low %v17317_v56, %v17316_v31 }
 0x784   : > { %8971 = vrot.lane.b32.xlu0 %v8963_v30, %s11475_s27  ;;  %v9060_v30 = vrot.slane %v10850_v41, %v11824_v36  ;;  %v9088_v15 = vcombine.low %v8824_v59, %v8833_v28  ;;  %v10853_v0 = vcombine.high %v8824_v59, %v8833_v28  ;;  %v10340_v41 = vrot.slane %v10326_v13, %v11824_v36  ;;  %v17325_v59 = vld [vmem:[#allocation22_spill] sm:$0xff] }
 0x785   : > { %v16081_v60 = vpop.permute.xlu1 %8370  ;;  %v10325_v5 = vcombine.low %v10094_v48, %v10103_v18  ;;  %v9087_v46 = vcombine.low %v8806_v52, %v8815_v19  ;;  %v10877_v58 = vcombine.high %v10094_v48, %v10103_v18  ;;  %v10166_v14 = vrot.slane %v10159_v40, %v11837_v49 }
 0x786   : > { %v16092_v44 = vpop.permute.xlu0 %9713  ;;  %v10139_v18 = vrot.slane %v10132_v4, %v11837_v49  ;;  %v10852_v28 = vcombine.high %v8806_v52, %v8815_v19  ;;  %v9068_v27 = vcombine.low %v9060_v30, %v9067_v45  ;;  %v10186_v37 = vcombine.low %v15940_v25, %v17326_v50  ;;  %v17327_v25 = vld [vmem:[#allocation87_spill] sm:$0xff] }
 0x787   : > { %9078 = vrot.lane.b32.xlu1 %v9075_v9, %s11478_s28  ;;  %v10333_v26 = vrot.slane %v10325_v5, %v11824_v36  ;;  %v10148_v9 = vrot.slane %v10141_v43, %v11837_v49  ;;  %v9095_v48 = vrot.slane %v9087_v46, %v11824_v36  ;;  %v17324_v43 = vld [vmem:[#allocation150_spill] sm:$0xff]  ;;  %v10368_v54 = vrot.slane %v10877_v58, %v11824_v36  ;;  %v17328_v30 = vld [vmem:[#allocation151_spill] sm:$0xff] }
 0x788   : > { %9006 = vrot.lane.b32.xlu0 %v8998_v20, %s11476_s14  ;;  %v17322_v20 = vld [vmem:[#allocation15_spill] sm:$0xff]  ;;  %v10195_v11 = vcombine.low %v17325_v59, %v17324_v43  ;;  %v8226_v13 = vcombine.low %v16035_v53, %v16038_v55  ;;  %v10157_v31 = vrot.slane %v10150_v33, %v11837_v49  ;;  %v9102_v56 = vrot.slane %v9088_v15, %v11824_v36 }
 0x789   : > { %v16101_v7 = vpop.permute.xlu1 %8405  ;;  %v10395_v19 = vcombine.low %v10139_v18, %v10148_v9  ;;  %v10341_v40 = vcombine.low %v10333_v26, %v10340_v41  ;;  %v9137_v62 = vrot.slane %v10853_v0, %v11824_v36  ;;  %v10375_v22 = vrot.slane %v10878_v3, %v11824_v36 }
 0x78a   : > { %v9749_v61 = vpop.permute.xlu0 %9748  ;;  %v10177_v46 = vcombine.low %v17328_v30, %v17327_v25  ;;  %v10396_v53 = vcombine.low %v10157_v31, %v10166_v14  ;;  %v9130_v55 = vrot.slane %v10852_v28, %v11824_v36  ;;  %v9103_v15 = vcombine.low %v9095_v48, %v9102_v56 }
 0x78b   : > { %9148 = vrot.lane.b32.xlu1 %v9145_v57, %s11481_s9  ;;  %v10204_v57 = vcombine.low %v17323_v8, %v17322_v20  ;;  %v10193_v58 = vrot.slane %v10186_v37, %v11837_v49  ;;  %v8515_v0 = vsel %vm5909_vm9, %v8226_v13, %v16005_v42  ;;  %v10403_v41 = vrot.slane %v10395_v19, %v11824_v36  ;;  %v17333_v13 = vld [vmem:[#allocation33_spill] sm:$0xff]  ;;  %v17336_v19 = vld [vmem:[#allocation148_spill] sm:$0xff] }
 0x78c   : > { %9041 = vrot.lane.b32.xlu0 %v9033_v6, %s11477_s25  ;;  %v17329_v6 = vld [vmem:[#allocation98_spill] sm:$0xff]  ;;  %v10879_v3 = vcombine.high %v10139_v18, %v10148_v9  ;;  %v10184_v48 = vrot.slane %v10177_v46, %v11837_v49  ;;  %v10410_v28 = vrot.slane %v10396_v53, %v11824_v36  ;;  %v9138_v18 = vcombine.low %v9130_v55, %v9137_v62  ;;  %v17337_v62 = vld [vmem:[#allocation69_spill] sm:$0xff] }
 0x78d   : > { %v16117_v16 = vpop.permute.xlu1 %9818  ;;  %v16140_v4 = vrot.slane %v10204_v57, %v11837_v49  ;;  %v17331_v24 = vcombine.low %v17329_v6, %v17330_v34  ;;  %v10880_v57 = vcombine.high %v10157_v31, %v10166_v14  ;;  %v10202_v14 = vrot.slane %v10195_v11, %v11837_v49  ;;  %v17334_v31 = vld [vmem:[#allocation99_spill] sm:$0xff]  ;;  %v17338_v46 = vld [vmem:[#allocation109_spill] sm:$0xff] }
 0x78e   : > { %v9784_v5 = vpop.permute.xlu0 %9783  ;;  %v10246_v56 = vcombine.low %v17334_v31, %v17333_v13  ;;  %v10881_v55 = vcombine.high %v10184_v48, %v10193_v58 }
 0x78f   : > { %10314 = vrot.lane.b32.xlu1 %v10306_v21, %s11474_s13  ;;  %v9893_v33 = vsel %vm5909_vm9, %v17331_v24, %v16043_v63  ;;  %v10376_v21 = vcombine.low %v10368_v54, %v10375_v22  ;;  %v8517_v63 = vsel %vm5912_vm10, %v8515_v0, %v16031_v12  ;;  %v10466_v50 = vcombine.low %v10202_v14, %v16140_v4 }
 0x790   : > { %9076 = vrot.lane.b32.xlu0 %v9068_v27, %s11478_s28  ;;  %v9895_v26 = vsel %vm5912_vm10, %v9893_v33, %v16069_v51  ;;  %v8519_v42 = vsel %vm5915_vm11, %v8517_v63, %v16054_v17  ;;  %v10465_v27 = vcombine.low %v10184_v48, %v10193_v58  ;;  %v10438_v17 = vrot.slane %v10879_v3, %v11824_v36 }
 0x791   : > { %v9854_v52 = vpop.permute.xlu1 %9853  ;;  %v9897_v20 = vsel %vm5915_vm11, %v9895_v26, %v16092_v44  ;;  %v8521_v9 = vsel %vm5918_vm12, %v8519_v42, %v16081_v60  ;;  %v10445_v11 = vrot.slane %v10880_v57, %v11824_v36  ;;  %v10557_v22 = vrot.slane %v17337_v62, %v11824_v36 }
 0x792   : > { %v16151_v45 = vpop.permute.xlu0 %6339  ;;  %v9899_v51 = vsel %vm5918_vm12, %v9897_v20, %v9749_v61  ;;  %v8523_v43 = vsel %vm5921_vm13, %v8521_v9, %v16101_v7  ;;  %v17332_v61 = vld [vmem:[#allocation111_spill] sm:$0xff]  ;;  %v10473_v6 = vrot.slane %v10465_v27, %v11824_v36  ;;  %v10480_v0 = vrot.slane %v10466_v50, %v11824_v36 }
 0x793   : > { %10349 = vrot.lane.b32.xlu1 %v10341_v40, %s11475_s27  ;;  %v9901_v12 = vsel %vm5921_vm13, %v9899_v51, %v9784_v5  ;;  %v10230_v59 = vcombine.low %v16021_v23, %v17332_v61  ;;  %v10411_v5 = vcombine.low %v10403_v41, %v10410_v28  ;;  %v17335_v23 = vld [vmem:[#allocation59_spill] sm:$0xff]  ;;  %v10882_v26 = vcombine.high %v10202_v14, %v16140_v4 }
 0x794   : > { %9111 = vrot.lane.b32.xlu0 %v9103_v15, %s11480_s21  ;;  %v9903_v37 = vsel %vm5924_vm14, %v9901_v12, %v16117_v16  ;;  %v10222_v40 = vcombine.low %v17336_v19, %v17335_v23  ;;  %v17339_v16 = vld [vmem:[#allocation118_spill] sm:$0xff]  ;;  %v10253_v58 = vrot.slane %v10246_v56, %v11837_v49  ;;  %v10508_v3 = vrot.slane %v10881_v55, %v11824_v36  ;;  %v17340_v12 = vld [vmem:[#allocation136_spill] sm:$0xff] }
 0x795   : > { %v8441_v8 = vpop.permute.xlu1 %8440  ;;  %v10238_v53 = vcombine.low %v17339_v16, %v17338_v46  ;;  %v10237_v34 = vrot.slane %v10230_v59, %v11837_v49  ;;  %v9905_v24 = vsel %vm5927_vm15, %v9903_v37, %v9854_v52  ;;  %v10515_v57 = vrot.slane %v10882_v26, %v11824_v36  ;;  %v17343_v23 = vld [vmem:[#allocation152_spill] sm:$0xff] }
 0x796   : > { %v6375_v44 = vpop.permute.xlu0 %6374  ;;  %v8525_v54 = vsel %vm5924_vm14, %v8523_v43, %v8441_v8  ;;  %v10481_v8 = vcombine.low %v10473_v6, %v10480_v0  ;;  %v6307_v19 = vrot.slane %v17343_v23, %v11824_v36  ;;  %v17344_v0 = vld [vmem:[#allocation155_spill] sm:$0xff] }
 0x797   : > { %10384 = vrot.lane.b32.xlu1 %v10376_v21, %s11476_s14  ;;  %v10229_v21 = vrot.slane %v10222_v40, %v11837_v49  ;;  %v10245_v52 = vrot.slane %v10238_v53, %v11837_v49  ;;  %v10516_v28 = vcombine.low %v10508_v3, %v10515_v57  ;;  %v7692_v26 = vrot.slane %v17344_v0, %v11824_v36 }
 0x798   : > { %9146 = vrot.lane.b32.xlu0 %v9138_v18, %s11481_s9  ;;  %v17341_v18 = vld [vmem:[#allocation48_spill] sm:$0xff] }
 0x799   : > { %v8476_v60 = vpop.permute.xlu1 %8475  ;;  %v10534_v63 = vcombine.low %v10229_v21, %v10237_v34  ;;  %v10535_v48 = vcombine.low %v10245_v52, %v10253_v58  ;;  %v17342_v14 = vcombine.low %v17340_v12, %v17341_v18  ;;  %v17345_v12 = vld [vmem:[#allocation26_spill] sm:$0xff]  ;;  %v17346_v18 = vld [vmem:[#allocation24_spill] sm:$0xff] }
 0x79a   : > { %v8527_v7 = vsel %vm5927_vm15, %v8525_v54, %v8476_v60  ;;  %v6410_v30 = vpop.permute.xlu0 %6409 }
 0x79b   : > { %v8529_v25 = vsel %vm5930_vm0, %v8527_v7, %v15984_v32  ;;  %10419 = vrot.lane.b32.xlu1 %v10411_v5, %s11477_s25  ;;  %v10446_v32 = vcombine.low %v10438_v17, %v10445_v11  ;;  %v10542_v42 = vrot.slane %v10534_v63, %v11824_v36  ;;  %v10549_v9 = vrot.slane %v10535_v48, %v11824_v36 }
 0x79c   : > { %10844 = vst.msk [vmem:[%s15230_s12 + $0x40] sm:$0xff] %vm5933_vm1, %v8529_v25  ;;  %10560 = vrot.lane.b32.xlu0 %v10557_v22, %s11479_s15  ;;  %v6589_v27 = vsel %vm5909_vm9, %v17342_v14, %v16151_v45  ;;  %v17347_v14 = vcombine.low %v17345_v12, %v17346_v18 }
 0x79d   : > { %v9888_v33 = vpop.permute.xlu1 %9887  ;;  %v10550_v17 = vcombine.low %v10542_v42, %v10549_v9  ;;  %v6591_v61 = vsel %vm5912_vm10, %v6589_v27, %v6375_v44 }
 0x79e   : > { %v9907_v15 = vsel %vm5930_vm0, %v9905_v24, %v9888_v33  ;;  %v6445_v41 = vpop.permute.xlu0 %6444  ;;  %v6593_v59 = vsel %vm5915_vm11, %v6591_v61, %v6410_v30 }
 0x79f   : > { %10873 = vst.msk [vmem:[%s15230_s12 + $0x60] sm:$0xff] %vm5933_vm1, %v9907_v15  ;;  %10454 = vrot.lane.b32.xlu1 %v10446_v32, %s11478_s28  ;;  %v6595_v60 = vsel %vm5918_vm12, %v6593_v59, %v6445_v41 }
 0x7a1   : > { %v6342_v20 = vpop.permute.xlu1 %6341 }
 0x7a2   : > { %v6480_v4 = vpop.permute.xlu0 %6479  ;;  %v6590_v62 = vsel %vm5909_vm9, %v6307_v19, %v6342_v20 }
 0x7a3   : > { %10489 = vrot.lane.b32.xlu1 %v10481_v8, %s11480_s21  ;;  %v6597_v5 = vsel %vm5921_vm13, %v6595_v60, %v6480_v4 }
 0x7a5   : > { %v6377_v51 = vpop.permute.xlu1 %6376 }
 0x7a6   : > { %v6515_v49 = vpop.permute.xlu0 %6514  ;;  %v6592_v22 = vsel %vm5912_vm10, %v6590_v62, %v6377_v51 }
 0x7a7   : > { %10524 = vrot.lane.b32.xlu1 %v10516_v28, %s11481_s9  ;;  %v6599_v11 = vsel %vm5924_vm14, %v6597_v5, %v6515_v49 }
 0x7a9   : > { %v6447_v43 = vpop.permute.xlu1 %6446 }
 0x7aa   : > { %v6550_v54 = vpop.permute.xlu0 %6549 }
 0x7ab   : > { %10558 = vrot.lane.b32.xlu1 %v10550_v17, %s11479_s15  ;;  %v6601_v37 = vsel %vm5927_vm15, %v6599_v11, %v6550_v54 }
 0x7ad   : > { %v6586_v50 = vpop.permute.xlu1 %6585 }
 0x7ae   : > { %v6584_v7 = vpop.permute.xlu0 %6583 }
 0x7af   : > { %v6603_v45 = vsel %vm5930_vm0, %v6601_v37, %v6584_v7 }
 0x7b0   : > { %10805 = vst.msk [vmem:[%s15230_s12 + $0x10] sm:$0xff] %vm5933_vm1, %v6603_v45 }
 0x7b1   : > { %v6412_v44 = vpop.permute.xlu1 %6411 }
 0x7b2   : > { %v7971_v13 = vpop.permute.xlu0 %7970  ;;  %v6594_v30 = vsel %vm5915_vm11, %v6592_v22, %v6412_v44 }
 0x7b3   : > { %v6596_v16 = vsel %vm5918_vm12, %v6594_v30, %v6447_v43 }
 0x7b5   : > { %v6482_v31 = vpop.permute.xlu1 %6481 }
 0x7b6   : > { %v7727_v56 = vpop.permute.xlu0 %7726  ;;  %v6598_v55 = vsel %vm5921_vm13, %v6596_v16, %v6482_v31 }
 0x7b7   : > { %v7975_v21 = vsel %vm5909_vm9, %v7692_v26, %v7727_v56 }
 0x7b9   : > { %v6517_v40 = vpop.permute.xlu1 %6516 }
 0x7ba   : > { %v7762_v25 = vpop.permute.xlu0 %7761  ;;  %v6600_v6 = vsel %vm5924_vm14, %v6598_v55, %v6517_v40 }
 0x7bb   : > { %v7977_v41 = vsel %vm5912_vm10, %v7975_v21, %v7762_v25  ;;  %v8904_v25 = vrot.slane %v15922_v29, %v11824_v36 }
 0x7bd   : > { %v7725_v46 = vpop.permute.xlu1 %7724 }
 0x7be   : > { %v7832_v53 = vpop.permute.xlu0 %7831  ;;  %v7974_v27 = vsel %vm5909_vm9, %v17347_v14, %v7725_v46 }
 0x7c1   : > { %v6552_v34 = vpop.permute.xlu1 %6551 }
 0x7c2   : > { %v6602_v24 = vsel %vm5927_vm15, %v6600_v6, %v6552_v34  ;;  %v7797_v32 = vpop.permute.xlu0 %7796 }
 0x7c3   : > { %v6604_v33 = vsel %vm5930_vm0, %v6602_v24, %v6586_v50  ;;  %v7979_v3 = vsel %vm5915_vm11, %v7977_v41, %v7797_v32 }
 0x7c4   : > { %10806 = vst.msk [vmem:[%s15230_s12 + $0x18] sm:$0x1] %vm5935_vm2, %v6604_v33  ;;  %v7981_v20 = vsel %vm5918_vm12, %v7979_v3, %v7832_v53 }
 0x7c5   : > { %v7760_v15 = vpop.permute.xlu1 %7759 }
 0x7c6   : > { %v7867_v58 = vpop.permute.xlu0 %7866  ;;  %v7976_v17 = vsel %vm5912_vm10, %v7974_v27, %v7760_v15 }
 0x7c7   : > { %v7983_v57 = vsel %vm5921_vm13, %v7981_v20, %v7867_v58 }
 0x7c9   : > { %v7795_v52 = vpop.permute.xlu1 %7794 }
 0x7ca   : > { %v7902_v63 = vpop.permute.xlu0 %7901  ;;  %v7978_v61 = vsel %vm5915_vm11, %v7976_v17, %v7795_v52  ;;  %v10282_v52 = vrot.slane %v15819_v2, %v11824_v36 }
 0x7cb   : > { %v7985_v48 = vsel %vm5924_vm14, %v7983_v57, %v7902_v63 }
 0x7cd   : > { %v7830_v8 = vpop.permute.xlu1 %7829 }
 0x7ce   : > { %v7937_v4 = vpop.permute.xlu0 %7936  ;;  %v7980_v54 = vsel %vm5918_vm12, %v7978_v61, %v7830_v8 }
 0x7cf   : > { %v7987_v42 = vsel %vm5927_vm15, %v7985_v48, %v7937_v4 }
 0x7d0   : > { %v7989_v51 = vsel %vm5930_vm0, %v7987_v42, %v7971_v13 }
 0x7d1   : > { %v7865_v28 = vpop.permute.xlu1 %7864  ;;  %10835 = vst.msk [vmem:[%s15230_s12 + $0x38] sm:$0x1] %vm5935_vm2, %v7989_v51 }
 0x7d2   : > { %v10317_v9 = vpop.permute.xlu0 %10316  ;;  %v7982_v60 = vsel %vm5921_vm13, %v7980_v54, %v7865_v28 }
 0x7d3   : > { %v10565_v20 = vsel %vm5909_vm9, %v10282_v52, %v10317_v9 }
 0x7d5   : > { %v7900_v49 = vpop.permute.xlu1 %7899 }
 0x7d6   : > { %v10352_v43 = vpop.permute.xlu0 %10351  ;;  %v7984_v50 = vsel %vm5924_vm14, %v7982_v60, %v7900_v49 }
 0x7d7   : > { %v10567_v48 = vsel %vm5912_vm10, %v10565_v20, %v10352_v43 }
 0x7d9   : > { %v7935_v59 = vpop.permute.xlu1 %7934 }
 0x7da   : > { %v10387_v5 = vpop.permute.xlu0 %10386  ;;  %v7986_v11 = vsel %vm5927_vm15, %v7984_v50, %v7935_v59 }
 0x7db   : > { %v10569_v42 = vsel %vm5915_vm11, %v10567_v48, %v10387_v5 }
 0x7dd   : > { %v7969_v37 = vpop.permute.xlu1 %7968 }
 0x7de   : > { %v7988_v7 = vsel %vm5930_vm0, %v7986_v11, %v7969_v37  ;;  %v10422_v45 = vpop.permute.xlu0 %10421 }
 0x7df   : > { %10834 = vst.msk [vmem:[%s15230_s12 + $0x30] sm:$0xff] %vm5933_vm1, %v7988_v7  ;;  %v10571_v39 = vsel %vm5918_vm12, %v10569_v42, %v10422_v45 }
 0x7e1   : > { %v8974_v44 = vpop.permute.xlu1 %8973 }
 0x7e2   : > { %v10492_v13 = vpop.permute.xlu0 %10491 }
 0x7e5   : > { %v8939_v31 = vpop.permute.xlu1 %8938 }
 0x7e6   : > { %v10457_v56 = vpop.permute.xlu0 %10456  ;;  %v9187_v46 = vsel %vm5909_vm9, %v8904_v25, %v8939_v31 }
 0x7e7   : > { %v9189_v53 = vsel %vm5912_vm10, %v9187_v46, %v8974_v44 }
 0x7e9   : > { %v9009_v23 = vpop.permute.xlu1 %9008 }
 0x7ea   : > { %v10527_v19 = vpop.permute.xlu0 %10526  ;;  %v9191_v6 = vsel %vm5915_vm11, %v9189_v53, %v9009_v23 }
 0x7ed   : > { %v9044_v40 = vpop.permute.xlu1 %9043 }
 0x7ee   : > { %v9181_v62 = vpop.permute.xlu0 %9180  ;;  %v9193_v34 = vsel %vm5918_vm12, %v9191_v6, %v9044_v40 }
 0x7f1   : > { %v9114_v22 = vpop.permute.xlu1 %9113 }
 0x7f2   : > { %v8937_v30 = vpop.permute.xlu0 %8936 }
 0x7f3   : > { %v9186_v63 = vsel %vm5909_vm9, %v8897_v1, %v8937_v30  ;;  %v10573_v1 = vsel %vm5921_vm13, %v10571_v39, %v10457_v56 }
 0x7f4   : > { %v10575_v18 = vsel %vm5924_vm14, %v10573_v1, %v10492_v13 }
 0x7f5   : > { %v9183_v16 = vpop.permute.xlu1 %9182  ;;  %v10577_v14 = vsel %vm5927_vm15, %v10575_v18, %v10527_v19 }
 0x7f6   : > { %v8972_v55 = vpop.permute.xlu0 %8971 }
 0x7f7   : > { %v9188_v8 = vsel %vm5912_vm10, %v9186_v63, %v8972_v55 }
 0x7f9   : > { %v9079_v24 = vpop.permute.xlu1 %9078 }
 0x7fa   : > { %v9195_v33 = vsel %vm5921_vm13, %v9193_v34, %v9079_v24  ;;  %v9007_v32 = vpop.permute.xlu0 %9006 }
 0x7fb   : > { %v9197_v15 = vsel %vm5924_vm14, %v9195_v33, %v9114_v22  ;;  %v9190_v4 = vsel %vm5915_vm11, %v9188_v8, %v9007_v32 }
 0x7fd   : > { %v9149_v0 = vpop.permute.xlu1 %9148 }
 0x7fe   : > { %v9199_v29 = vsel %vm5927_vm15, %v9197_v15, %v9149_v0  ;;  %v9042_v58 = vpop.permute.xlu0 %9041 }
 0x7ff   : > { %v9201_v26 = vsel %vm5930_vm0, %v9199_v29, %v9183_v16  ;;  %v9192_v36 = vsel %vm5918_vm12, %v9190_v4, %v9042_v58 }
 0x800   : > { %10855 = vst.msk [vmem:[%s15230_s12 + $0x58] sm:$0x1] %vm5935_vm2, %v9201_v26 }
 0x801   : > { %v10315_v21 = vpop.permute.xlu1 %10314 }
 0x802   : > { %v9077_v41 = vpop.permute.xlu0 %9076  ;;  %v10564_v59 = vsel %vm5909_vm9, %v10275_v35, %v10315_v21 }
 0x803   : > { %v9194_v47 = vsel %vm5921_vm13, %v9192_v36, %v9077_v41 }
 0x805   : > { %v10350_v3 = vpop.permute.xlu1 %10349 }
 0x806   : > { %v9112_v57 = vpop.permute.xlu0 %9111  ;;  %v10566_v54 = vsel %vm5912_vm10, %v10564_v59, %v10350_v3 }
 0x807   : > { %v9196_v51 = vsel %vm5924_vm14, %v9194_v47, %v9112_v57 }
 0x809   : > { %v10385_v2 = vpop.permute.xlu1 %10384 }
 0x80a   : > { %v9147_v28 = vpop.permute.xlu0 %9146  ;;  %v10568_v60 = vsel %vm5915_vm11, %v10566_v54, %v10385_v2 }
 0x80b   : > { %v9198_v9 = vsel %vm5927_vm15, %v9196_v51, %v9147_v28 }
 0x80c   : > { %v9200_v49 = vsel %vm5930_vm0, %v9198_v9, %v9181_v62 }
 0x80d   : > { %v10420_v12 = vpop.permute.xlu1 %10419  ;;  %10854 = vst.msk [vmem:[%s15230_s12 + $0x50] sm:$0xff] %vm5933_vm1, %v9200_v49 }
 0x80e   : > { %v10561_v27 = vpop.permute.xlu0 %10560  ;;  %v10570_v50 = vsel %vm5918_vm12, %v10568_v60, %v10420_v12 }
 0x80f   : > { %v10579_v43 = vsel %vm5930_vm0, %v10577_v14, %v10561_v27 }
 0x810   : > { %10884 = vst.msk [vmem:[%s15230_s12 + $0x78] sm:$0x1] %vm5935_vm2, %v10579_v43 }
 0x811   : > { %v10455_v17 = vpop.permute.xlu1 %10454 }
 0x812   : > { %v10572_v11 = vsel %vm5921_vm13, %v10570_v50, %v10455_v17 }
 0x815   : > { %v10490_v61 = vpop.permute.xlu1 %10489 }
 0x816   : > { %v10574_v37 = vsel %vm5924_vm14, %v10572_v11, %v10490_v61 }
 0x819   : > { %v10525_v5 = vpop.permute.xlu1 %10524 }
 0x81a   : > { %v10576_v7 = vsel %vm5927_vm15, %v10574_v37, %v10525_v5 }
 0x81d   : > { %v10559_v45 = vpop.permute.xlu1 %10558 }
 0x81e   : > { %v10578_v44 = vsel %vm5930_vm0, %v10576_v7, %v10559_v45 }
 0x81f   : > { %10883 = vst.msk [vmem:[%s15230_s12 + $0x70] sm:$0xff] %vm5933_vm1, %v10578_v44 }
 0x820 PF: > { %s19_s20 = sadd.s32 1, %s11451_s20   ;;  %s17348_s15 = smov %s11435_s16 }
 0x821   : > { %p16_p4 = scmp.ge.s32.totalorder %s19_s20, 10   ;;  %s17349_s16 = smov %s11439_s17 }
 0x822   : > { %s17350_s17 = smov %s11660_s5  ;;  %s17351_s18 = smov %s11447_s19 }
 0x823   : > { %s17352_s19 = smov %s17354_s26  ;;  %18 = sbr.rel (!%p16_p4) target bundleno = 6 (0x6), region = 108 }
 0x82a   :  { %10604 = vsyncpa [#allocation4], 1 }
 0x82b   :  { %10606 = vsyncpa [#allocation4 + $0x1], 1 }
 0x82c   :  { %10607 = vsyncpa [#allocation6], 1 }
 0x82d   :  { %10608 = vsyncpa [#allocation9], 1 }

</bundles_post_ra>
